<compile_context>
chip_gen: v6e
topology: v6e:2x2x1
jax: 0.10.0
libtpu: 0.0.40
codegen_flags: <defaults>
</compile_context>

<pallas_src>
import functools

import jax
import jax.numpy as jnp
from jax.experimental import pallas as pl
from jax.experimental.pallas import tpu as pltpu

_EPS = 1e-5          # BatchNorm2d default eps
_LANE = 128          # TPU lane width


def _round_up(x, m):
    return (x + m - 1) // m * m


# ------------------------------- kernels ----------------------------------- #

def _sigmoid(y):
    # exp and approximate reciprocal both run on the EUP slot (frees the VALU).
    return pl.reciprocal(1.0 + jnp.exp(-y), approx=True)


def _mm_bn_silu(x, w, s, b):
    """(rows, Cin) @ (Cin, Cout) -> folded-BN affine -> SiLU (f32 epilogue)."""
    y = jnp.dot(x, w, preferred_element_type=jnp.float32)
    y = y * s + b
    return y * _sigmoid(y)


def cv12_kernel(x_ref, w1_ref, s1_ref, b1_ref, w2_ref, s2_ref, b2_ref,
                y1_ref, y2_ref):
    """cv1 and cv2 (both 1x1 conv + BN + SiLU) fused: x tile read once."""
    x = x_ref[...]
    y1_ref[...] = _mm_bn_silu(x, w1_ref[...], s1_ref[...],
                              b1_ref[...]).astype(y1_ref.dtype)
    y2_ref[...] = _mm_bn_silu(x, w2_ref[...], s2_ref[...],
                              b2_ref[...]).astype(y2_ref.dtype)


def resblock_kernel(y2_ref, wa_ref, sa_ref, ba_ref, wb_ref, sb_ref, bb_ref,
                    o_ref, pad_ref):
    """Fused ResidualBlock: 1x1 conv+BN+SiLU -> 3x3 conv (9 shifted matmuls
    against a zero-padded halo scratch) + BN + SiLU -> residual add."""
    H, W, C = y2_ref.shape
    x = y2_ref[...]                                   # (H, W, C)
    xf = x.reshape(H * W, C)

    # conv1 (1x1) + BN + SiLU
    h = _mm_bn_silu(xf, wa_ref[...], sa_ref[...], ba_ref[...])   # f32 (H*W, C)

    # zero-padded halo buffer for the 'SAME' 3x3 conv
    pad_ref[...] = jnp.zeros_like(pad_ref)
    pad_ref[1:H + 1, 1:W + 1, :] = h.reshape(H, W, C).astype(pad_ref.dtype)

    # conv2 (3x3) as 9 shifted matmuls accumulated in f32
    acc = jnp.zeros((H * W, C), jnp.float32)
    for k in range(9):
        dy, dx = k // 3, k % 3
        patch = pad_ref[dy:dy + H, dx:dx + W, :].reshape(H * W, C)
        acc = acc + jnp.dot(patch, wb_ref[k],
                            preferred_element_type=jnp.float32)

    y = acc * sb_ref[...] + bb_ref[...]
    y = y * _sigmoid(y)
    o_ref[...] = (xf.astype(jnp.float32) + y).reshape(H, W, C).astype(o_ref.dtype)


def cv3_kernel(y1_ref, y2_ref, w3a_ref, w3b_ref, s_ref, b_ref, o_ref):
    """cv3 on concat([y1, y2], channel) == y1 @ W3[:c_] + y2 @ W3[c_:]."""
    y = (jnp.dot(y1_ref[...], w3a_ref[...], preferred_element_type=jnp.float32)
         + jnp.dot(y2_ref[...], w3b_ref[...], preferred_element_type=jnp.float32))
    y = y * s_ref[...] + b_ref[...]
    o_ref[...] = (y * _sigmoid(y)).astype(o_ref.dtype)


# -------------------------------- glue -------------------------------------- #

def _compiler_params():
    return pltpu.CompilerParams(
        dimension_semantics=("parallel",),       # shard tiles across TCs (v7x)
        vmem_limit_bytes=48 * 1024 * 1024,       # raised scoped VMEM for bigger tiles
    )


def _pad2(w, rows, cols):
    return jnp.pad(w, ((0, rows - w.shape[0]), (0, cols - w.shape[1])))


def _pad_sb(v, cols):
    return jnp.pad(v, ((0, 0), (0, cols - v.shape[1])))


def csp_stage_forward(x_nchw, params, *, tile_n=512, act_dtype=jnp.float32):
    """CSPStage forward.  x_nchw: (B, C1, H, W) -> (B, C1, H, W).

    act_dtype: storage/matmul dtype for activations & weights (BN/SiLU epilogue
    stays f32).  Use jnp.bfloat16 on v6e/v7x to halve HBM traffic.
    """
    B, C1, H, W = x_nchw.shape
    C_ = C1 // 2
    C1p = _round_up(C1, _LANE)
    C_p = _round_up(C_, _LANE)
    N = B * H * W
    f32 = jnp.float32

    # NCHW -> channels-last (N, C1p), channels zero-padded to a lane multiple.
    x = jnp.transpose(x_nchw, (0, 2, 3, 1)).reshape(N, C1).astype(act_dtype)
    if C1p != C1:
        x = jnp.pad(x, ((0, 0), (0, C1p - C1)))

    # ---- pad parameters to lane multiples (padded channels stay zero) -------
    w1 = _pad2(params['w1'], C1p, C_p).astype(act_dtype)
    w2 = _pad2(params['w2'], C1p, C_p).astype(act_dtype)
    s1, b1 = _pad_sb(params['s1'], C_p), _pad_sb(params['b1'], C_p)
    s2, b2 = _pad_sb(params['s2'], C_p), _pad_sb(params['b2'], C_p)

    blocks = []
    for blk in params['blocks']:
        wa = _pad2(blk['wa'], C_p, C_p).astype(act_dtype)
        sa, ba = _pad_sb(blk['sa'], C_p), _pad_sb(blk['ba'], C_p)
        w3 = jnp.pad(blk['w3x3'],
                     ((0, 0), (0, 0), (0, C_p - C_), (0, C_p - C_)))
        wb = w3.reshape(9, C_p, C_p).astype(act_dtype)   # (tap, Cin, Cout)
        sb, bb = _pad_sb(blk['sb'], C_p), _pad_sb(blk['bb'], C_p)
        blocks.append((wa, sa, ba, wb, sb, bb))

    w3a = _pad2(params['w3a'], C_p, C1p).astype(act_dtype)
    w3b = _pad2(params['w3b'], C_p, C1p).astype(act_dtype)
    s3, b3 = _pad_sb(params['s3'], C1p), _pad_sb(params['b3'], C1p)

    # ---- tiling over N -------------------------------------------------------
    TN = max(8, (min(tile_n, N) // 8) * 8)
    nt = pl.cdiv(N, TN)
    cparams = _compiler_params()

    def _wspec(shape):
        # weights / scales: same block every grid step -> stays VMEM-resident
        return pl.BlockSpec(shape, lambda i, _s=shape: tuple(0 for _ in _s))

    # --- cv1 + cv2 fused, tiled over N ---------------------------------------
    y1, y2 = pl.pallas_call(
        cv12_kernel,
        out_shape=(jax.ShapeDtypeStruct((N, C_p), act_dtype),
                   jax.ShapeDtypeStruct((N, C_p), act_dtype)),
        grid=(nt,),
        in_specs=[
            pl.BlockSpec((TN, C1p), lambda i: (i, 0)),
            _wspec((C1p, C_p)), _wspec((1, C_p)), _wspec((1, C_p)),
            _wspec((C1p, C_p)), _wspec((1, C_p)), _wspec((1, C_p)),
        ],
        out_specs=(pl.BlockSpec((TN, C_p), lambda i: (i, 0)),
                   pl.BlockSpec((TN, C_p), lambda i: (i, 0))),
        compiler_params=cparams,
    )(x, w1, s1, b1, w2, s2, b2)

    # --- fused residual blocks, one pallas_call each, grid over batch images --
    # TODO(synk): for large H*W, tile rows with a halo instead of whole images,
    #             and fuse the n-block loop into one kernel with stacked weights.
    y2 = y2.reshape(B, H, W, C_p)
    for (wa, sa, ba, wb, sb, bb) in blocks:
        y2 = pl.pallas_call(
            resblock_kernel,
            out_shape=jax.ShapeDtypeStruct((B, H, W, C_p), act_dtype),
            grid=(B,),
            in_specs=[
                pl.BlockSpec((None, H, W, C_p), lambda b: (b, 0, 0, 0)),
                _wspec((C_p, C_p)), _wspec((1, C_p)), _wspec((1, C_p)),
                _wspec((9, C_p, C_p)), _wspec((1, C_p)), _wspec((1, C_p)),
            ],
            out_specs=pl.BlockSpec((None, H, W, C_p), lambda b: (b, 0, 0, 0)),
            scratch_shapes=[pltpu.VMEM((H + 2, W + 2, C_p), act_dtype)],
            input_output_aliases={0: 0},          # y2 updated in place
            compiler_params=cparams,
        )(y2, wa, sa, ba, wb, sb, bb)
    y2 = y2.reshape(N, C_p)

    # --- cv3 on the (folded) channel concat, tiled over N ---------------------
    out = pl.pallas_call(
        cv3_kernel,
        out_shape=jax.ShapeDtypeStruct((N, C1p), act_dtype),
        grid=(nt,),
        in_specs=[
            pl.BlockSpec((TN, C_p), lambda i: (i, 0)),
            pl.BlockSpec((TN, C_p), lambda i: (i, 0)),
            _wspec((C_p, C1p)), _wspec((C_p, C1p)),
            _wspec((1, C1p)), _wspec((1, C1p)),
        ],
        out_specs=pl.BlockSpec((TN, C1p), lambda i: (i, 0)),
        compiler_params=cparams,
    )(y1, y2, w3a, w3b, s3, b3)

    out = out[:, :C1].astype(f32).reshape(B, H, W, C1).transpose(0, 3, 1, 2)
    return out


# ------------------------ deterministic parameters -------------------------- #

def init_params(key, c1, n_blocks):
    c_ = c1 // 2
    keys = iter(jax.random.split(key, 64))

    def wmat(ci, co, fan):
        return jax.random.normal(next(keys), (ci, co), jnp.float32) / jnp.sqrt(float(fan))

    def bn(c):
        gamma = jax.random.uniform(next(keys), (c,), jnp.float32, 0.5, 1.5)
        beta = 0.1 * jax.random.normal(next(keys), (c,), jnp.float32)
        rmean = 0.1 * jax.random.normal(next(keys), (c,), jnp.float32)
        rvar = jax.random.uniform(next(keys), (c,), jnp.float32, 0.5, 1.5)
        scale = gamma / jnp.sqrt(rvar + _EPS)
        bias = beta - rmean * scale
        return scale.reshape(1, c), bias.reshape(1, c)

    p = {}
    p['w1'] = wmat(c1, c_, c1); p['s1'], p['b1'] = bn(c_)
    p['w2'] = wmat(c1, c_, c1); p['s2'], p['b2'] = bn(c_)
    blocks = []
    for _ in range(n_blocks):
        blk = {}
        blk['wa'] = wmat(c_, c_, c_); blk['sa'], blk['ba'] = bn(c_)
        blk['w3x3'] = (jax.random.normal(next(keys), (3, 3, c_, c_), jnp.float32)
                       / jnp.sqrt(9.0 * c_))                       # HWIO
        blk['sb'], blk['bb'] = bn(c_)
        blocks.append(blk)
    p['blocks'] = blocks
    w3 = wmat(2 * c_, c1, 2 * c_)
    p['w3a'], p['w3b'] = w3[:c_], w3[c_:]
    p['s3'], p['b3'] = bn(c1)
    return p


# -------------------------------- reference --------------------------------- #

def reference_forward(x_nchw, params):
    x = jnp.transpose(x_nchw, (0, 2, 3, 1)).astype(jnp.float32)

    def silu(v):
        return v * jax.nn.sigmoid(v)

    def c1x1(v, w, s, b):
        y = jnp.einsum('bhwc,cd->bhwd', v, w)
        return silu(y * s.reshape(1, 1, 1, -1) + b.reshape(1, 1, 1, -1))

    y1 = c1x1(x, params['w1'], params['s1'], params['b1'])
    y2 = c1x1(x, params['w2'], params['s2'], params['b2'])
    for blk in params['blocks']:
        h = c1x1(y2, blk['wa'], blk['sa'], blk['ba'])
        h = jax.lax.conv_general_dilated(
            h, blk['w3x3'], (1, 1), 'SAME',
            dimension_numbers=('NHWC', 'HWIO', 'NHWC'))
        h = silu(h * blk['sb'].reshape(1, 1, 1, -1) + blk['bb'].reshape(1, 1, 1, -1))
        y2 = y2 + h
    cat = jnp.concatenate([y1, y2], axis=-1)
    w3 = jnp.concatenate([params['w3a'], params['w3b']], axis=0)
    out = c1x1(cat, w3, params['s3'], params['b3'])
    return out.transpose(0, 3, 1, 2)


# ---------------------------------- main ------------------------------------- #

if __name__ == "__main__":
    key = jax.random.PRNGKey(0)
    kx, kp = jax.random.split(key)
    B, C1, H, W = 2, 16, 16, 16     # NCHW; c1 even so c_ = c1 // 2; W % 8 == 0
    n_blocks = 2

    x = jax.random.normal(kx, (B, C1, H, W), jnp.float32)
    params = init_params(kp, C1, n_blocks)

    # tile_n=128 -> 4 grid steps over N=512: exercises tiling + pipelining.
    fwd = jax.jit(functools.partial(csp_stage_forward, tile_n=128))
    out = jax.block_until_ready(fwd(x, params))

    ref = reference_forward(x, params)
    assert out.shape == (B, C1, H, W), out.shape
    err = float(jnp.max(jnp.abs(out - ref)))
    assert jnp.allclose(out, ref, atol=2e-2, rtol=2e-2), err
    print("KERNEL_OK")
</pallas_src>

<mosaic_0001>
module attributes {stable_mosaic.version = 11 : i64} {
  func.func @cv12_kernel(%arg0: i32, %arg1: memref<128x128xf32, #tpu.memory_space<vmem>>, %arg2: memref<128x128xf32, #tpu.memory_space<vmem>>, %arg3: memref<1x128xf32, #tpu.memory_space<vmem>>, %arg4: memref<1x128xf32, #tpu.memory_space<vmem>>, %arg5: memref<128x128xf32, #tpu.memory_space<vmem>>, %arg6: memref<1x128xf32, #tpu.memory_space<vmem>>, %arg7: memref<1x128xf32, #tpu.memory_space<vmem>>, %arg8: memref<128x128xf32, #tpu.memory_space<vmem>>, %arg9: memref<128x128xf32, #tpu.memory_space<vmem>>) attributes {dimension_semantics = [#tpu.dimension_semantics<parallel>], iteration_bounds = array<i64: 4>, scalar_prefetch = 0 : i64, scratch_operands = 0 : i64, tpu.core_type = #tpu.core_type<tc>, window_params = [{transform_indices = @transform_0, window_bounds = array<i64: 128, 128>}, {pipeline_mode = #tpu.pipeline_mode<synchronous>, transform_indices = @transform_1, window_bounds = array<i64: 128, 128>}, {pipeline_mode = #tpu.pipeline_mode<synchronous>, transform_indices = @transform_2, window_bounds = array<i64: 1, 128>}, {pipeline_mode = #tpu.pipeline_mode<synchronous>, transform_indices = @transform_3, window_bounds = array<i64: 1, 128>}, {pipeline_mode = #tpu.pipeline_mode<synchronous>, transform_indices = @transform_4, window_bounds = array<i64: 128, 128>}, {pipeline_mode = #tpu.pipeline_mode<synchronous>, transform_indices = @transform_5, window_bounds = array<i64: 1, 128>}, {pipeline_mode = #tpu.pipeline_mode<synchronous>, transform_indices = @transform_6, window_bounds = array<i64: 1, 128>}, {transform_indices = @transform_7, window_bounds = array<i64: 128, 128>}, {transform_indices = @transform_8, window_bounds = array<i64: 128, 128>}]} {
    %c0 = arith.constant 0 : index
    %c0_0 = arith.constant 0 : index
    %0 = vector.load %arg1[%c0, %c0_0] : memref<128x128xf32, #tpu.memory_space<vmem>>, vector<128x128xf32>
    %c0_1 = arith.constant 0 : index
    %c0_2 = arith.constant 0 : index
    %1 = vector.load %arg2[%c0_1, %c0_2] : memref<128x128xf32, #tpu.memory_space<vmem>>, vector<128x128xf32>
    %c0_3 = arith.constant 0 : index
    %c0_4 = arith.constant 0 : index
    %2 = vector.load %arg3[%c0_3, %c0_4] : memref<1x128xf32, #tpu.memory_space<vmem>>, vector<1x128xf32>
    %c0_5 = arith.constant 0 : index
    %c0_6 = arith.constant 0 : index
    %3 = vector.load %arg4[%c0_5, %c0_6] : memref<1x128xf32, #tpu.memory_space<vmem>>, vector<1x128xf32>
    %cst = arith.constant dense<0.000000e+00> : vector<128x128xf32>
    %4 = tpu.matmul %0, %1, %cst {dimension_numbers = #tpu.dot_dimension_numbers<[1], [0], [0], [1], [0, 0, 1, 1], [], []>} : vector<128x128xf32>, vector<128x128xf32>, vector<128x128xf32> -> vector<128x128xf32>
    %5 = vector.broadcast %2 : vector<1x128xf32> to vector<128x128xf32>
    %6 = arith.mulf %4, %5 : vector<128x128xf32>
    %7 = vector.broadcast %3 : vector<1x128xf32> to vector<128x128xf32>
    %8 = arith.addf %6, %7 : vector<128x128xf32>
    %cst_7 = arith.constant 0.000000e+00 : f32
    %9 = vector.broadcast %cst_7 : f32 to vector<128x128xf32>
    %10 = arith.subf %9, %8 : vector<128x128xf32>
    %11 = math.exp %10 : vector<128x128xf32>
    %cst_8 = arith.constant 1.000000e+00 : f32
    %12 = vector.broadcast %cst_8 : f32 to vector<128x128xf32>
    %13 = arith.addf %12, %11 : vector<128x128xf32>
    %14 = tpu.reciprocal %13 {approx = true} : vector<128x128xf32> -> vector<128x128xf32>
    %15 = arith.mulf %8, %14 : vector<128x128xf32>
    %c0_9 = arith.constant 0 : index
    %c0_10 = arith.constant 0 : index
    %16 = vector.load %arg8[%c0_9, %c0_10] : memref<128x128xf32, #tpu.memory_space<vmem>>, vector<128x128xf32>
    tpu.vector_store %arg8[%c0_9, %c0_10], %15 {strides = array<i32>} : memref<128x128xf32, #tpu.memory_space<vmem>>, vector<128x128xf32>,
    %c0_11 = arith.constant 0 : index
    %c0_12 = arith.constant 0 : index
    %17 = vector.load %arg5[%c0_11, %c0_12] : memref<128x128xf32, #tpu.memory_space<vmem>>, vector<128x128xf32>
    %c0_13 = arith.constant 0 : index
    %c0_14 = arith.constant 0 : index
    %18 = vector.load %arg6[%c0_13, %c0_14] : memref<1x128xf32, #tpu.memory_space<vmem>>, vector<1x128xf32>
    %c0_15 = arith.constant 0 : index
    %c0_16 = arith.constant 0 : index
    %19 = vector.load %arg7[%c0_15, %c0_16] : memref<1x128xf32, #tpu.memory_space<vmem>>, vector<1x128xf32>
    %cst_17 = arith.constant dense<0.000000e+00> : vector<128x128xf32>
    %20 = tpu.matmul %0, %17, %cst_17 {dimension_numbers = #tpu.dot_dimension_numbers<[1], [0], [0], [1], [0, 0, 1, 1], [], []>} : vector<128x128xf32>, vector<128x128xf32>, vector<128x128xf32> -> vector<128x128xf32>
    %21 = vector.broadcast %18 : vector<1x128xf32> to vector<128x128xf32>
    %22 = arith.mulf %20, %21 : vector<128x128xf32>
    %23 = vector.broadcast %19 : vector<1x128xf32> to vector<128x128xf32>
    %24 = arith.addf %22, %23 : vector<128x128xf32>
    %cst_18 = arith.constant 0.000000e+00 : f32
    %25 = vector.broadcast %cst_18 : f32 to vector<128x128xf32>
    %26 = arith.subf %25, %24 : vector<128x128xf32>
    %27 = math.exp %26 : vector<128x128xf32>
    %cst_19 = arith.constant 1.000000e+00 : f32
    %28 = vector.broadcast %cst_19 : f32 to vector<128x128xf32>
    %29 = arith.addf %28, %27 : vector<128x128xf32>
    %30 = tpu.reciprocal %29 {approx = true} : vector<128x128xf32> -> vector<128x128xf32>
    %31 = arith.mulf %24, %30 : vector<128x128xf32>
    %c0_20 = arith.constant 0 : index
    %c0_21 = arith.constant 0 : index
    %32 = vector.load %arg9[%c0_20, %c0_21] : memref<128x128xf32, #tpu.memory_space<vmem>>, vector<128x128xf32>
    tpu.vector_store %arg9[%c0_20, %c0_21], %31 {strides = array<i32>} : memref<128x128xf32, #tpu.memory_space<vmem>>, vector<128x128xf32>,
    return
  }
  func.func @transform_0(%arg0: i32) -> (i32, i32) {
    %c0_i32 = arith.constant 0 : i32
    %c0_i32_0 = arith.constant 0 : i32
    return %arg0, %c0_i32 : i32, i32
  }
  func.func @transform_1(%arg0: i32) -> (i32, i32) {
    %c0_i32 = arith.constant 0 : i32
    %c0_i32_0 = arith.constant 0 : i32
    %c0_i32_1 = arith.constant 0 : i32
    return %c0_i32, %c0_i32_0 : i32, i32
  }
  func.func @transform_2(%arg0: i32) -> (i32, i32) {
    %c0_i32 = arith.constant 0 : i32
    %c0_i32_0 = arith.constant 0 : i32
    %c0_i32_1 = arith.constant 0 : i32
    return %c0_i32, %c0_i32_0 : i32, i32
  }
  func.func @transform_3(%arg0: i32) -> (i32, i32) {
    %c0_i32 = arith.constant 0 : i32
    %c0_i32_0 = arith.constant 0 : i32
    %c0_i32_1 = arith.constant 0 : i32
    return %c0_i32, %c0_i32_0 : i32, i32
  }
  func.func @transform_4(%arg0: i32) -> (i32, i32) {
    %c0_i32 = arith.constant 0 : i32
    %c0_i32_0 = arith.constant 0 : i32
    %c0_i32_1 = arith.constant 0 : i32
    return %c0_i32, %c0_i32_0 : i32, i32
  }
  func.func @transform_5(%arg0: i32) -> (i32, i32) {
    %c0_i32 = arith.constant 0 : i32
    %c0_i32_0 = arith.constant 0 : i32
    %c0_i32_1 = arith.constant 0 : i32
    return %c0_i32, %c0_i32_0 : i32, i32
  }
  func.func @transform_6(%arg0: i32) -> (i32, i32) {
    %c0_i32 = arith.constant 0 : i32
    %c0_i32_0 = arith.constant 0 : i32
    %c0_i32_1 = arith.constant 0 : i32
    return %c0_i32, %c0_i32_0 : i32, i32
  }
  func.func @transform_7(%arg0: i32) -> (i32, i32) {
    %c0_i32 = arith.constant 0 : i32
    %c0_i32_0 = arith.constant 0 : i32
    return %arg0, %c0_i32 : i32, i32
  }
  func.func @transform_8(%arg0: i32) -> (i32, i32) {
    %c0_i32 = arith.constant 0 : i32
    %c0_i32_0 = arith.constant 0 : i32
    return %arg0, %c0_i32 : i32, i32
  }
}

module attributes {stable_mosaic.version = 11 : i64} {
  func.func @resblock_kernel(%arg0: i32, %arg1: memref<1x16x16x128xf32, #tpu.memory_space<vmem>>, %arg2: memref<128x128xf32, #tpu.memory_space<vmem>>, %arg3: memref<1x128xf32, #tpu.memory_space<vmem>>, %arg4: memref<1x128xf32, #tpu.memory_space<vmem>>, %arg5: memref<9x128x128xf32, #tpu.memory_space<vmem>>, %arg6: memref<1x128xf32, #tpu.memory_space<vmem>>, %arg7: memref<1x128xf32, #tpu.memory_space<vmem>>, %arg8: memref<1x16x16x128xf32, #tpu.memory_space<vmem>>, %arg9: memref<18x18x128xf32, #tpu.memory_space<vmem>>) attributes {dimension_semantics = [#tpu.dimension_semantics<parallel>], iteration_bounds = array<i64: 2>, scalar_prefetch = 0 : i64, scratch_operands = 1 : i64, tpu.core_type = #tpu.core_type<tc>, window_params = [{transform_indices = @transform_0, window_bounds = array<i64: 1, 16, 16, 128>}, {pipeline_mode = #tpu.pipeline_mode<synchronous>, transform_indices = @transform_1, window_bounds = array<i64: 128, 128>}, {pipeline_mode = #tpu.pipeline_mode<synchronous>, transform_indices = @transform_2, window_bounds = array<i64: 1, 128>}, {pipeline_mode = #tpu.pipeline_mode<synchronous>, transform_indices = @transform_3, window_bounds = array<i64: 1, 128>}, {pipeline_mode = #tpu.pipeline_mode<synchronous>, transform_indices = @transform_4, window_bounds = array<i64: 9, 128, 128>}, {pipeline_mode = #tpu.pipeline_mode<synchronous>, transform_indices = @transform_5, window_bounds = array<i64: 1, 128>}, {pipeline_mode = #tpu.pipeline_mode<synchronous>, transform_indices = @transform_6, window_bounds = array<i64: 1, 128>}, {transform_indices = @transform_7, window_bounds = array<i64: 1, 16, 16, 128>}]} {
    %c0 = arith.constant 0 : index
    %c0_0 = arith.constant 0 : index
    %c0_1 = arith.constant 0 : index
    %c0_2 = arith.constant 0 : index
    %0 = vector.load %arg1[%c0, %c0_0, %c0_1, %c0_2] : memref<1x16x16x128xf32, #tpu.memory_space<vmem>>, vector<1x16x16x128xf32>
    %1 = vector.shape_cast %0 : vector<1x16x16x128xf32> to vector<16x16x128xf32>
    %2 = vector.shape_cast %1 : vector<16x16x128xf32> to vector<256x128xf32>
    %c0_3 = arith.constant 0 : index
    %c0_4 = arith.constant 0 : index
    %3 = vector.load %arg2[%c0_3, %c0_4] : memref<128x128xf32, #tpu.memory_space<vmem>>, vector<128x128xf32>
    %c0_5 = arith.constant 0 : index
    %c0_6 = arith.constant 0 : index
    %4 = vector.load %arg3[%c0_5, %c0_6] : memref<1x128xf32, #tpu.memory_space<vmem>>, vector<1x128xf32>
    %c0_7 = arith.constant 0 : index
    %c0_8 = arith.constant 0 : index
    %5 = vector.load %arg4[%c0_7, %c0_8] : memref<1x128xf32, #tpu.memory_space<vmem>>, vector<1x128xf32>
    %cst = arith.constant dense<0.000000e+00> : vector<256x128xf32>
    %6 = tpu.matmul %2, %3, %cst {dimension_numbers = #tpu.dot_dimension_numbers<[1], [0], [0], [1], [0, 0, 1, 1], [], []>} : vector<256x128xf32>, vector<128x128xf32>, vector<256x128xf32> -> vector<256x128xf32>
    %7 = vector.broadcast %4 : vector<1x128xf32> to vector<256x128xf32>
    %8 = arith.mulf %6, %7 : vector<256x128xf32>
    %9 = vector.broadcast %5 : vector<1x128xf32> to vector<256x128xf32>
    %10 = arith.addf %8, %9 : vector<256x128xf32>
    %cst_9 = arith.constant 0.000000e+00 : f32
    %11 = vector.broadcast %cst_9 : f32 to vector<256x128xf32>
    %12 = arith.subf %11, %10 : vector<256x128xf32>
    %13 = math.exp %12 : vector<256x128xf32>
    %cst_10 = arith.constant 1.000000e+00 : f32
    %14 = vector.broadcast %cst_10 : f32 to vector<256x128xf32>
    %15 = arith.addf %14, %13 : vector<256x128xf32>
    %16 = tpu.reciprocal %15 {approx = true} : vector<256x128xf32> -> vector<256x128xf32>
    %17 = arith.mulf %10, %16 : vector<256x128xf32>
    %cst_11 = arith.constant 0.000000e+00 : f32
    %18 = vector.broadcast %cst_11 : f32 to vector<18x18x128xf32>
    %c0_12 = arith.constant 0 : index
    %c0_13 = arith.constant 0 : index
    %c0_14 = arith.constant 0 : index
    %19 = vector.load %arg9[%c0_12, %c0_13, %c0_14] : memref<18x18x128xf32, #tpu.memory_space<vmem>>, vector<18x18x128xf32>
    tpu.vector_store %arg9[%c0_12, %c0_13, %c0_14], %18 {strides = array<i32>} : memref<18x18x128xf32, #tpu.memory_space<vmem>>, vector<18x18x128xf32>,
    %20 = vector.shape_cast %17 : vector<256x128xf32> to vector<16x16x128xf32>
    %c1 = arith.constant 1 : index
    %c1_15 = arith.constant 1 : index
    %c0_16 = arith.constant 0 : index
    %21 = vector.load %arg9[%c1, %c1_15, %c0_16] : memref<18x18x128xf32, #tpu.memory_space<vmem>>, vector<16x16x128xf32>
    tpu.vector_store %arg9[%c1, %c1_15, %c0_16], %20 {strides = array<i32>} : memref<18x18x128xf32, #tpu.memory_space<vmem>>, vector<16x16x128xf32>,
    %cst_17 = arith.constant 0.000000e+00 : f32
    %22 = vector.broadcast %cst_17 : f32 to vector<256x128xf32>
    %c0_18 = arith.constant 0 : index
    %c0_19 = arith.constant 0 : index
    %c0_20 = arith.constant 0 : index
    %23 = vector.load %arg9[%c0_18, %c0_19, %c0_20] : memref<18x18x128xf32, #tpu.memory_space<vmem>>, vector<16x16x128xf32>
    %24 = vector.shape_cast %23 : vector<16x16x128xf32> to vector<256x128xf32>
    %c0_21 = arith.constant 0 : index
    %c0_22 = arith.constant 0 : index
    %c0_23 = arith.constant 0 : index
    %25 = vector.load %arg5[%c0_21, %c0_22, %c0_23] : memref<9x128x128xf32, #tpu.memory_space<vmem>>, vector<1x128x128xf32>
    %26 = vector.shape_cast %25 : vector<1x128x128xf32> to vector<128x128xf32>
    %cst_24 = arith.constant dense<0.000000e+00> : vector<256x128xf32>
    %27 = tpu.matmul %24, %26, %cst_24 {dimension_numbers = #tpu.dot_dimension_numbers<[1], [0], [0], [1], [0, 0, 1, 1], [], []>} : vector<256x128xf32>, vector<128x128xf32>, vector<256x128xf32> -> vector<256x128xf32>
    %28 = arith.addf %22, %27 : vector<256x128xf32>
    %c0_25 = arith.constant 0 : index
    %c1_26 = arith.constant 1 : index
    %c0_27 = arith.constant 0 : index
    %29 = vector.load %arg9[%c0_25, %c1_26, %c0_27] : memref<18x18x128xf32, #tpu.memory_space<vmem>>, vector<16x16x128xf32>
    %30 = vector.shape_cast %29 : vector<16x16x128xf32> to vector<256x128xf32>
    %c1_28 = arith.constant 1 : index
    %c0_29 = arith.constant 0 : index
    %c0_30 = arith.constant 0 : index
    %31 = vector.load %arg5[%c1_28, %c0_29, %c0_30] : memref<9x128x128xf32, #tpu.memory_space<vmem>>, vector<1x128x128xf32>
    %32 = vector.shape_cast %31 : vector<1x128x128xf32> to vector<128x128xf32>
    %cst_31 = arith.constant dense<0.000000e+00> : vector<256x128xf32>
    %33 = tpu.matmul %30, %32, %cst_31 {dimension_numbers = #tpu.dot_dimension_numbers<[1], [0], [0], [1], [0, 0, 1, 1], [], []>} : vector<256x128xf32>, vector<128x128xf32>, vector<256x128xf32> -> vector<256x128xf32>
    %34 = arith.addf %28, %33 : vector<256x128xf32>
    %c0_32 = arith.constant 0 : index
    %c2 = arith.constant 2 : index
    %c0_33 = arith.constant 0 : index
    %35 = vector.load %arg9[%c0_32, %c2, %c0_33] : memref<18x18x128xf32, #tpu.memory_space<vmem>>, vector<16x16x128xf32>
    %36 = vector.shape_cast %35 : vector<16x16x128xf32> to vector<256x128xf32>
    %c2_34 = arith.constant 2 : index
    %c0_35 = arith.constant 0 : index
    %c0_36 = arith.constant 0 : index
    %37 = vector.load %arg5[%c2_34, %c0_35, %c0_36] : memref<9x128x128xf32, #tpu.memory_space<vmem>>, vector<1x128x128xf32>
    %38 = vector.shape_cast %37 : vector<1x128x128xf32> to vector<128x128xf32>
    %cst_37 = arith.constant dense<0.000000e+00> : vector<256x128xf32>
    %39 = tpu.matmul %36, %38, %cst_37 {dimension_numbers = #tpu.dot_dimension_numbers<[1], [0], [0], [1], [0, 0, 1, 1], [], []>} : vector<256x128xf32>, vector<128x128xf32>, vector<256x128xf32> -> vector<256x128xf32>
    %40 = arith.addf %34, %39 : vector<256x128xf32>
    %c1_38 = arith.constant 1 : index
    %c0_39 = arith.constant 0 : index
    %c0_40 = arith.constant 0 : index
    %41 = vector.load %arg9[%c1_38, %c0_39, %c0_40] : memref<18x18x128xf32, #tpu.memory_space<vmem>>, vector<16x16x128xf32>
    %42 = vector.shape_cast %41 : vector<16x16x128xf32> to vector<256x128xf32>
    %c3 = arith.constant 3 : index
    %c0_41 = arith.constant 0 : index
    %c0_42 = arith.constant 0 : index
    %43 = vector.load %arg5[%c3, %c0_41, %c0_42] : memref<9x128x128xf32, #tpu.memory_space<vmem>>, vector<1x128x128xf32>
    %44 = vector.shape_cast %43 : vector<1x128x128xf32> to vector<128x128xf32>
    %cst_43 = arith.constant dense<0.000000e+00> : vector<256x128xf32>
    %45 = tpu.matmul %42, %44, %cst_43 {dimension_numbers = #tpu.dot_dimension_numbers<[1], [0], [0], [1], [0, 0, 1, 1], [], []>} : vector<256x128xf32>, vector<128x128xf32>, vector<256x128xf32> -> vector<256x128xf32>
    %46 = arith.addf %40, %45 : vector<256x128xf32>
    %c1_44 = arith.constant 1 : index
    %c1_45 = arith.constant 1 : index
    %c0_46 = arith.constant 0 : index
    %47 = vector.load %arg9[%c1_44, %c1_45, %c0_46] : memref<18x18x128xf32, #tpu.memory_space<vmem>>, vector<16x16x128xf32>
    %48 = vector.shape_cast %47 : vector<16x16x128xf32> to vector<256x128xf32>
    %c4 = arith.constant 4 : index
    %c0_47 = arith.constant 0 : index
    %c0_48 = arith.constant 0 : index
    %49 = vector.load %arg5[%c4, %c0_47, %c0_48] : memref<9x128x128xf32, #tpu.memory_space<vmem>>, vector<1x128x128xf32>
    %50 = vector.shape_cast %49 : vector<1x128x128xf32> to vector<128x128xf32>
    %cst_49 = arith.constant dense<0.000000e+00> : vector<256x128xf32>
    %51 = tpu.matmul %48, %50, %cst_49 {dimension_numbers = #tpu.dot_dimension_numbers<[1], [0], [0], [1], [0, 0, 1, 1], [], []>} : vector<256x128xf32>, vector<128x128xf32>, vector<256x128xf32> -> vector<256x128xf32>
    %52 = arith.addf %46, %51 : vector<256x128xf32>
    %c1_50 = arith.constant 1 : index
    %c2_51 = arith.constant 2 : index
    %c0_52 = arith.constant 0 : index
    %53 = vector.load %arg9[%c1_50, %c2_51, %c0_52] : memref<18x18x128xf32, #tpu.memory_space<vmem>>, vector<16x16x128xf32>
    %54 = vector.shape_cast %53 : vector<16x16x128xf32> to vector<256x128xf32>
    %c5 = arith.constant 5 : index
    %c0_53 = arith.constant 0 : index
    %c0_54 = arith.constant 0 : index
    %55 = vector.load %arg5[%c5, %c0_53, %c0_54] : memref<9x128x128xf32, #tpu.memory_space<vmem>>, vector<1x128x128xf32>
    %56 = vector.shape_cast %55 : vector<1x128x128xf32> to vector<128x128xf32>
    %cst_55 = arith.constant dense<0.000000e+00> : vector<256x128xf32>
    %57 = tpu.matmul %54, %56, %cst_55 {dimension_numbers = #tpu.dot_dimension_numbers<[1], [0], [0], [1], [0, 0, 1, 1], [], []>} : vector<256x128xf32>, vector<128x128xf32>, vector<256x128xf32> -> vector<256x128xf32>
    %58 = arith.addf %52, %57 : vector<256x128xf32>
    %c2_56 = arith.constant 2 : index
    %c0_57 = arith.constant 0 : index
    %c0_58 = arith.constant 0 : index
    %59 = vector.load %arg9[%c2_56, %c0_57, %c0_58] : memref<18x18x128xf32, #tpu.memory_space<vmem>>, vector<16x16x128xf32>
    %60 = vector.shape_cast %59 : vector<16x16x128xf32> to vector<256x128xf32>
    %c6 = arith.constant 6 : index
    %c0_59 = arith.constant 0 : index
    %c0_60 = arith.constant 0 : index
    %61 = vector.load %arg5[%c6, %c0_59, %c0_60] : memref<9x128x128xf32, #tpu.memory_space<vmem>>, vector<1x128x128xf32>
    %62 = vector.shape_cast %61 : vector<1x128x128xf32> to vector<128x128xf32>
    %cst_61 = arith.constant dense<0.000000e+00> : vector<256x128xf32>
    %63 = tpu.matmul %60, %62, %cst_61 {dimension_numbers = #tpu.dot_dimension_numbers<[1], [0], [0], [1], [0, 0, 1, 1], [], []>} : vector<256x128xf32>, vector<128x128xf32>, vector<256x128xf32> -> vector<256x128xf32>
    %64 = arith.addf %58, %63 : vector<256x128xf32>
    %c2_62 = arith.constant 2 : index
    %c1_63 = arith.constant 1 : index
    %c0_64 = arith.constant 0 : index
    %65 = vector.load %arg9[%c2_62, %c1_63, %c0_64] : memref<18x18x128xf32, #tpu.memory_space<vmem>>, vector<16x16x128xf32>
    %66 = vector.shape_cast %65 : vector<16x16x128xf32> to vector<256x128xf32>
    %c7 = arith.constant 7 : index
    %c0_65 = arith.constant 0 : index
    %c0_66 = arith.constant 0 : index
    %67 = vector.load %arg5[%c7, %c0_65, %c0_66] : memref<9x128x128xf32, #tpu.memory_space<vmem>>, vector<1x128x128xf32>
    %68 = vector.shape_cast %67 : vector<1x128x128xf32> to vector<128x128xf32>
    %cst_67 = arith.constant dense<0.000000e+00> : vector<256x128xf32>
    %69 = tpu.matmul %66, %68, %cst_67 {dimension_numbers = #tpu.dot_dimension_numbers<[1], [0], [0], [1], [0, 0, 1, 1], [], []>} : vector<256x128xf32>, vector<128x128xf32>, vector<256x128xf32> -> vector<256x128xf32>
    %70 = arith.addf %64, %69 : vector<256x128xf32>
    %c2_68 = arith.constant 2 : index
    %c2_69 = arith.constant 2 : index
    %c0_70 = arith.constant 0 : index
    %71 = vector.load %arg9[%c2_68, %c2_69, %c0_70] : memref<18x18x128xf32, #tpu.memory_space<vmem>>, vector<16x16x128xf32>
    %72 = vector.shape_cast %71 : vector<16x16x128xf32> to vector<256x128xf32>
    %c8 = arith.constant 8 : index
    %c0_71 = arith.constant 0 : index
    %c0_72 = arith.constant 0 : index
    %73 = vector.load %arg5[%c8, %c0_71, %c0_72] : memref<9x128x128xf32, #tpu.memory_space<vmem>>, vector<1x128x128xf32>
    %74 = vector.shape_cast %73 : vector<1x128x128xf32> to vector<128x128xf32>
    %cst_73 = arith.constant dense<0.000000e+00> : vector<256x128xf32>
    %75 = tpu.matmul %72, %74, %cst_73 {dimension_numbers = #tpu.dot_dimension_numbers<[1], [0], [0], [1], [0, 0, 1, 1], [], []>} : vector<256x128xf32>, vector<128x128xf32>, vector<256x128xf32> -> vector<256x128xf32>
    %76 = arith.addf %70, %75 : vector<256x128xf32>
    %c0_74 = arith.constant 0 : index
    %c0_75 = arith.constant 0 : index
    %77 = vector.load %arg6[%c0_74, %c0_75] : memref<1x128xf32, #tpu.memory_space<vmem>>, vector<1x128xf32>
    %78 = vector.broadcast %77 : vector<1x128xf32> to vector<256x128xf32>
    %79 = arith.mulf %76, %78 : vector<256x128xf32>
    %c0_76 = arith.constant 0 : index
    %c0_77 = arith.constant 0 : index
    %80 = vector.load %arg7[%c0_76, %c0_77] : memref<1x128xf32, #tpu.memory_space<vmem>>, vector<1x128xf32>
    %81 = vector.broadcast %80 : vector<1x128xf32> to vector<256x128xf32>
    %82 = arith.addf %79, %81 : vector<256x128xf32>
    %cst_78 = arith.constant 0.000000e+00 : f32
    %83 = vector.broadcast %cst_78 : f32 to vector<256x128xf32>
    %84 = arith.subf %83, %82 : vector<256x128xf32>
    %85 = math.exp %84 : vector<256x128xf32>
    %cst_79 = arith.constant 1.000000e+00 : f32
    %86 = vector.broadcast %cst_79 : f32 to vector<256x128xf32>
    %87 = arith.addf %86, %85 : vector<256x128xf32>
    %88 = tpu.reciprocal %87 {approx = true} : vector<256x128xf32> -> vector<256x128xf32>
    %89 = arith.mulf %82, %88 : vector<256x128xf32>
    %90 = arith.addf %2, %89 : vector<256x128xf32>
    %91 = vector.shape_cast %90 : vector<256x128xf32> to vector<16x16x128xf32>
    %c0_80 = arith.constant 0 : index
    %c0_81 = arith.constant 0 : index
    %c0_82 = arith.constant 0 : index
    %c0_83 = arith.constant 0 : index
    %92 = vector.load %arg8[%c0_80, %c0_81, %c0_82, %c0_83] : memref<1x16x16x128xf32, #tpu.memory_space<vmem>>, vector<1x16x16x128xf32>
    %93 = vector.shape_cast %92 : vector<1x16x16x128xf32> to vector<16x16x128xf32>
    %94 = vector.shape_cast %91 : vector<16x16x128xf32> to vector<1x16x16x128xf32>
    tpu.vector_store %arg8[%c0_80, %c0_81, %c0_82, %c0_83], %94 {strides = array<i32>} : memref<1x16x16x128xf32, #tpu.memory_space<vmem>>, vector<1x16x16x128xf32>,
    return
  }
  func.func @transform_0(%arg0: i32) -> (i32, i32, i32, i32) {
    %c0_i32 = arith.constant 0 : i32
    %c0_i32_0 = arith.constant 0 : i32
    %c0_i32_1 = arith.constant 0 : i32
    %c0_i32_2 = arith.constant 0 : i32
    return %arg0, %c0_i32, %c0_i32_0, %c0_i32_1 : i32, i32, i32, i32
  }
  func.func @transform_1(%arg0: i32) -> (i32, i32) {
    %c0_i32 = arith.constant 0 : i32
    %c0_i32_0 = arith.constant 0 : i32
    %c0_i32_1 = arith.constant 0 : i32
    return %c0_i32, %c0_i32_0 : i32, i32
  }
  func.func @transform_2(%arg0: i32) -> (i32, i32) {
    %c0_i32 = arith.constant 0 : i32
    %c0_i32_0 = arith.constant 0 : i32
    %c0_i32_1 = arith.constant 0 : i32
    return %c0_i32, %c0_i32_0 : i32, i32
  }
  func.func @transform_3(%arg0: i32) -> (i32, i32) {
    %c0_i32 = arith.constant 0 : i32
    %c0_i32_0 = arith.constant 0 : i32
    %c0_i32_1 = arith.constant 0 : i32
    return %c0_i32, %c0_i32_0 : i32, i32
  }
  func.func @transform_4(%arg0: i32) -> (i32, i32, i32) {
    %c0_i32 = arith.constant 0 : i32
    %c0_i32_0 = arith.constant 0 : i32
    %c0_i32_1 = arith.constant 0 : i32
    %c0_i32_2 = arith.constant 0 : i32
    return %c0_i32, %c0_i32_0, %c0_i32_1 : i32, i32, i32
  }
  func.func @transform_5(%arg0: i32) -> (i32, i32) {
    %c0_i32 = arith.constant 0 : i32
    %c0_i32_0 = arith.constant 0 : i32
    %c0_i32_1 = arith.constant 0 : i32
    return %c0_i32, %c0_i32_0 : i32, i32
  }
  func.func @transform_6(%arg0: i32) -> (i32, i32) {
    %c0_i32 = arith.constant 0 : i32
    %c0_i32_0 = arith.constant 0 : i32
    %c0_i32_1 = arith.constant 0 : i32
    return %c0_i32, %c0_i32_0 : i32, i32
  }
  func.func @transform_7(%arg0: i32) -> (i32, i32, i32, i32) {
    %c0_i32 = arith.constant 0 : i32
    %c0_i32_0 = arith.constant 0 : i32
    %c0_i32_1 = arith.constant 0 : i32
    %c0_i32_2 = arith.constant 0 : i32
    return %arg0, %c0_i32, %c0_i32_0, %c0_i32_1 : i32, i32, i32, i32
  }
}

module attributes {stable_mosaic.version = 11 : i64} {
  func.func @cv3_kernel(%arg0: i32, %arg1: memref<128x128xf32, #tpu.memory_space<vmem>>, %arg2: memref<128x128xf32, #tpu.memory_space<vmem>>, %arg3: memref<128x128xf32, #tpu.memory_space<vmem>>, %arg4: memref<128x128xf32, #tpu.memory_space<vmem>>, %arg5: memref<1x128xf32, #tpu.memory_space<vmem>>, %arg6: memref<1x128xf32, #tpu.memory_space<vmem>>, %arg7: memref<128x128xf32, #tpu.memory_space<vmem>>) attributes {dimension_semantics = [#tpu.dimension_semantics<parallel>], iteration_bounds = array<i64: 4>, scalar_prefetch = 0 : i64, scratch_operands = 0 : i64, tpu.core_type = #tpu.core_type<tc>, window_params = [{transform_indices = @transform_0, window_bounds = array<i64: 128, 128>}, {transform_indices = @transform_1, window_bounds = array<i64: 128, 128>}, {pipeline_mode = #tpu.pipeline_mode<synchronous>, transform_indices = @transform_2, window_bounds = array<i64: 128, 128>}, {pipeline_mode = #tpu.pipeline_mode<synchronous>, transform_indices = @transform_3, window_bounds = array<i64: 128, 128>}, {pipeline_mode = #tpu.pipeline_mode<synchronous>, transform_indices = @transform_4, window_bounds = array<i64: 1, 128>}, {pipeline_mode = #tpu.pipeline_mode<synchronous>, transform_indices = @transform_5, window_bounds = array<i64: 1, 128>}, {transform_indices = @transform_6, window_bounds = array<i64: 128, 128>}]} {
    %c0 = arith.constant 0 : index
    %c0_0 = arith.constant 0 : index
    %0 = vector.load %arg1[%c0, %c0_0] : memref<128x128xf32, #tpu.memory_space<vmem>>, vector<128x128xf32>
    %c0_1 = arith.constant 0 : index
    %c0_2 = arith.constant 0 : index
    %1 = vector.load %arg3[%c0_1, %c0_2] : memref<128x128xf32, #tpu.memory_space<vmem>>, vector<128x128xf32>
    %cst = arith.constant dense<0.000000e+00> : vector<128x128xf32>
    %2 = tpu.matmul %0, %1, %cst {dimension_numbers = #tpu.dot_dimension_numbers<[1], [0], [0], [1], [0, 0, 1, 1], [], []>} : vector<128x128xf32>, vector<128x128xf32>, vector<128x128xf32> -> vector<128x128xf32>
    %c0_3 = arith.constant 0 : index
    %c0_4 = arith.constant 0 : index
    %3 = vector.load %arg2[%c0_3, %c0_4] : memref<128x128xf32, #tpu.memory_space<vmem>>, vector<128x128xf32>
    %c0_5 = arith.constant 0 : index
    %c0_6 = arith.constant 0 : index
    %4 = vector.load %arg4[%c0_5, %c0_6] : memref<128x128xf32, #tpu.memory_space<vmem>>, vector<128x128xf32>
    %cst_7 = arith.constant dense<0.000000e+00> : vector<128x128xf32>
    %5 = tpu.matmul %3, %4, %cst_7 {dimension_numbers = #tpu.dot_dimension_numbers<[1], [0], [0], [1], [0, 0, 1, 1], [], []>} : vector<128x128xf32>, vector<128x128xf32>, vector<128x128xf32> -> vector<128x128xf32>
    %6 = arith.addf %2, %5 : vector<128x128xf32>
    %c0_8 = arith.constant 0 : index
    %c0_9 = arith.constant 0 : index
    %7 = vector.load %arg5[%c0_8, %c0_9] : memref<1x128xf32, #tpu.memory_space<vmem>>, vector<1x128xf32>
    %8 = vector.broadcast %7 : vector<1x128xf32> to vector<128x128xf32>
    %9 = arith.mulf %6, %8 : vector<128x128xf32>
    %c0_10 = arith.constant 0 : index
    %c0_11 = arith.constant 0 : index
    %10 = vector.load %arg6[%c0_10, %c0_11] : memref<1x128xf32, #tpu.memory_space<vmem>>, vector<1x128xf32>
    %11 = vector.broadcast %10 : vector<1x128xf32> to vector<128x128xf32>
    %12 = arith.addf %9, %11 : vector<128x128xf32>
    %cst_12 = arith.constant 0.000000e+00 : f32
    %13 = vector.broadcast %cst_12 : f32 to vector<128x128xf32>
    %14 = arith.subf %13, %12 : vector<128x128xf32>
    %15 = math.exp %14 : vector<128x128xf32>
    %cst_13 = arith.constant 1.000000e+00 : f32
    %16 = vector.broadcast %cst_13 : f32 to vector<128x128xf32>
    %17 = arith.addf %16, %15 : vector<128x128xf32>
    %18 = tpu.reciprocal %17 {approx = true} : vector<128x128xf32> -> vector<128x128xf32>
    %19 = arith.mulf %12, %18 : vector<128x128xf32>
    %c0_14 = arith.constant 0 : index
    %c0_15 = arith.constant 0 : index
    %20 = vector.load %arg7[%c0_14, %c0_15] : memref<128x128xf32, #tpu.memory_space<vmem>>, vector<128x128xf32>
    tpu.vector_store %arg7[%c0_14, %c0_15], %19 {strides = array<i32>} : memref<128x128xf32, #tpu.memory_space<vmem>>, vector<128x128xf32>,
    return
  }
  func.func @transform_0(%arg0: i32) -> (i32, i32) {
    %c0_i32 = arith.constant 0 : i32
    %c0_i32_0 = arith.constant 0 : i32
    return %arg0, %c0_i32 : i32, i32
  }
  func.func @transform_1(%arg0: i32) -> (i32, i32) {
    %c0_i32 = arith.constant 0 : i32
    %c0_i32_0 = arith.constant 0 : i32
    return %arg0, %c0_i32 : i32, i32
  }
  func.func @transform_2(%arg0: i32) -> (i32, i32) {
    %c0_i32 = arith.constant 0 : i32
    %c0_i32_0 = arith.constant 0 : i32
    %c0_i32_1 = arith.constant 0 : i32
    return %c0_i32, %c0_i32_0 : i32, i32
  }
  func.func @transform_3(%arg0: i32) -> (i32, i32) {
    %c0_i32 = arith.constant 0 : i32
    %c0_i32_0 = arith.constant 0 : i32
    %c0_i32_1 = arith.constant 0 : i32
    return %c0_i32, %c0_i32_0 : i32, i32
  }
  func.func @transform_4(%arg0: i32) -> (i32, i32) {
    %c0_i32 = arith.constant 0 : i32
    %c0_i32_0 = arith.constant 0 : i32
    %c0_i32_1 = arith.constant 0 : i32
    return %c0_i32, %c0_i32_0 : i32, i32
  }
  func.func @transform_5(%arg0: i32) -> (i32, i32) {
    %c0_i32 = arith.constant 0 : i32
    %c0_i32_0 = arith.constant 0 : i32
    %c0_i32_1 = arith.constant 0 : i32
    return %c0_i32, %c0_i32_0 : i32, i32
  }
  func.func @transform_6(%arg0: i32) -> (i32, i32) {
    %c0_i32 = arith.constant 0 : i32
    %c0_i32_0 = arith.constant 0 : i32
    return %arg0, %c0_i32 : i32, i32
  }
}

</mosaic_0001>

<bundles_post_ra>
// kernel: csp_stage_forward.7
= control target key start
LH: loop header
LB: loop body
LE: loop exit
PB: predicated region body
PF: predicated region fallthrough
CT: control target
= control target key end

     0   :  { %s1163_s21 = smov 0   ;;  %s1446_s0 = inlined_call_operand.vmem [shape: f32[512,128], index: 0, kind: input, shape index: {}]   ;;  %s1447_s1 = inlined_call_operand.vmem [shape: f32[512,128], index: 1, kind: input, shape index: {}]   ;;  %s1448_s2 = inlined_call_operand.vmem [shape: f32[128,128], index: 2, kind: input, shape index: {}]   ;;  %s1449_s3 = inlined_call_operand.vmem [shape: f32[128,128], index: 3, kind: input, shape index: {}]   ;;  %s1450_s4 = inlined_call_operand.vmem [shape: f32[1,128], index: 4, kind: input, shape index: {}]   ;;  %s1451_s5 = inlined_call_operand.vmem [shape: f32[1,128], index: 5, kind: input, shape index: {}]   ;;  %s1452_s6 = inlined_call_operand.vmem [shape: f32[512,128], index: 6, kind: output, shape index: {}]  }
   0x1 LB: > { %s857_s22 = sadd.s32 4294967295, %s1126_s21   ;;  %p861_p0 = scmp.ge.s32.totalorder %s1126_s21, 1  ;;  %s1126_s21 = sphi %s1163_s21, %s16_s21  }
   0x2   : > { %p224_p1 = scmp.lt.s32.totalorder %s1126_s21, 5 }
   0x4   : > { %p225_p2 = pnand %p861_p0, %p224_p1 }
   0x5   : > { %s862_s9 = sshll.u32 (!%p225_p2), %s857_s22, 4 }
   0x6   : > { %228 = sbr.rel (%p225_p2) target bundleno = 314 (0x13a), region = 44  ;;  %p260_p3 = scmp.lt.s32.totalorder (!%p225_p2), %s862_s9, 63 }
   0xb   : > { %v340_v0 = vld [vmem:[%s1449_s3 + $0x78] sm:$0xff]  ;;  %v339_v2 = vld [vmem:[%s1449_s3 + $0x70] sm:$0xff]  ;;  %v338_v4 = vld [vmem:[%s1449_s3 + $0x68] sm:$0xff]  ;;  %s1454_s9 = smov (!%p260_p3, %s862_s9), 63 }
   0xc   : > { %v308_v1 = vld [vmem:[%s1448_s2 + $0x78] sm:$0xff]  ;;  %936 = vmatprep.subr.mxu0 %v340_v0  ;;  %v307_v3 = vld [vmem:[%s1448_s2 + $0x70] sm:$0xff]  ;;  %v306_v5 = vld [vmem:[%s1448_s2 + $0x68] sm:$0xff]  ;;  %s1251_s7 = sshll.u32 %s1454_s9, 3 }
   0xd   : > { %992 = vmatprep.subr.mxu1 %v308_v1  ;;  %937 = vmatpush3.msra.mxu0 %v340_v0  ;;  %v337_v6 = vld [vmem:[%s1449_s3 + $0x60] sm:$0xff]  ;;  %v336_v8 = vld [vmem:[%s1449_s3 + $0x58] sm:$0xff]  ;;  %v335_v10 = vld [vmem:[%s1449_s3 + $0x50] sm:$0xff]  ;;  %s1269_s17 = scalar_lea.vmem %s1447_s1, %s1251_s7  ;;  %s1275_s20 = scalar_lea.vmem %s1446_s0, %s1251_s7 }
   0xe   : > { %993 = vmatpush3.msra.mxu1 %v308_v1  ;;  %938 = vmatprep.subr.mxu0 %v339_v2  ;;  %v305_v7 = vld [vmem:[%s1448_s2 + $0x60] sm:$0xff]  ;;  %v304_v9 = vld [vmem:[%s1448_s2 + $0x58] sm:$0xff]  ;;  %v303_v11 = vld [vmem:[%s1448_s2 + $0x50] sm:$0xff]  ;;  %s1409_s11 = scalar_lea.vmem %s1452_s6, %s1251_s7 }
   0xf   : > { %994 = vmatprep.subr.mxu1 %v307_v3  ;;  %939 = vmatpush3.msra.mxu0 %v339_v2  ;;  %v334_v12 = vld [vmem:[%s1449_s3 + $0x48] sm:$0xff]  ;;  %v333_v14 = vld [vmem:[%s1449_s3 + $0x40] sm:$0xff]  ;;  %v332_v16 = vld [vmem:[%s1449_s3 + $0x38] sm:$0xff] }
  0x10   : > { %995 = vmatpush3.msra.mxu1 %v307_v3  ;;  %940 = vmatprep.subr.mxu0 %v338_v4  ;;  %v302_v13 = vld [vmem:[%s1448_s2 + $0x48] sm:$0xff]  ;;  %v301_v15 = vld [vmem:[%s1448_s2 + $0x40] sm:$0xff]  ;;  %v300_v17 = vld [vmem:[%s1448_s2 + $0x38] sm:$0xff] }
  0x11   : > { %996 = vmatprep.subr.mxu1 %v306_v5  ;;  %941 = vmatpush3.msra.mxu0 %v338_v4  ;;  %v331_v18 = vld [vmem:[%s1449_s3 + $0x30] sm:$0xff]  ;;  %v330_v20 = vld [vmem:[%s1449_s3 + $0x28] sm:$0xff]  ;;  %v329_v22 = vld [vmem:[%s1449_s3 + $0x20] sm:$0xff] }
  0x12   : > { %997 = vmatpush3.msra.mxu1 %v306_v5  ;;  %942 = vmatprep.subr.mxu0 %v337_v6  ;;  %v299_v19 = vld [vmem:[%s1448_s2 + $0x30] sm:$0xff]  ;;  %v298_v21 = vld [vmem:[%s1448_s2 + $0x28] sm:$0xff]  ;;  %v297_v23 = vld [vmem:[%s1448_s2 + $0x20] sm:$0xff] }
  0x13   : > { %998 = vmatprep.subr.mxu1 %v305_v7  ;;  %943 = vmatpush3.msra.mxu0 %v337_v6  ;;  %v328_v24 = vld [vmem:[%s1449_s3 + $0x18] sm:$0xff]  ;;  %v327_v26 = vld [vmem:[%s1449_s3 + $0x10] sm:$0xff]  ;;  %v326_v28 = vld [vmem:[%s1449_s3 + $0x8] sm:$0xff] }
  0x14   : > { %999 = vmatpush3.msra.mxu1 %v305_v7  ;;  %944 = vmatprep.subr.mxu0 %v336_v8  ;;  %v296_v25 = vld [vmem:[%s1448_s2 + $0x18] sm:$0xff]  ;;  %v295_v27 = vld [vmem:[%s1448_s2 + $0x10] sm:$0xff]  ;;  %v294_v29 = vld [vmem:[%s1448_s2 + $0x8] sm:$0xff] }
  0x15   : > { %1000 = vmatprep.subr.mxu1 %v304_v9  ;;  %945 = vmatpush3.msra.mxu0 %v336_v8  ;;  %v325_v30 = vld [vmem:[%s1449_s3] sm:$0xff]  ;;  %v310_v34 = vld [vmem:[%s1269_s17 + $0x8] sm:$0xff]  ;;  %v311_v36 = vld [vmem:[%s1269_s17 + $0x10] sm:$0xff] }
  0x16   : > { %1001 = vmatpush3.msra.mxu1 %v304_v9  ;;  %946 = vmatprep.subr.mxu0 %v335_v10  ;;  %v293_v31 = vld [vmem:[%s1448_s2] sm:$0xff]  ;;  %v278_v35 = vld [vmem:[%s1275_s20 + $0x8] sm:$0xff]  ;;  %v279_v37 = vld [vmem:[%s1275_s20 + $0x10] sm:$0xff] }
  0x17   : > { %1002 = vmatprep.subr.mxu1 %v303_v11  ;;  %947 = vmatpush3.msra.mxu0 %v335_v10  ;;  %v309_v32 = vld [vmem:[%s1269_s17] sm:$0xff]  ;;  %v312_v38 = vld [vmem:[%s1269_s17 + $0x18] sm:$0xff]  ;;  %v314_v42 = vld [vmem:[%s1269_s17 + $0x28] sm:$0xff] }
  0x18   : > { %1003 = vmatpush3.msra.mxu1 %v303_v11  ;;  %948 = vmatprep.subr.mxu0 %v334_v12  ;;  %v277_v33 = vld [vmem:[%s1275_s20] sm:$0xff]  ;;  %v280_v39 = vld [vmem:[%s1275_s20 + $0x18] sm:$0xff]  ;;  %v282_v43 = vld [vmem:[%s1275_s20 + $0x28] sm:$0xff] }
  0x19   : > { %1004 = vmatprep.subr.mxu1 %v302_v13  ;;  %949 = vmatpush3.msra.mxu0 %v334_v12  ;;  %v313_v40 = vld [vmem:[%s1269_s17 + $0x20] sm:$0xff]  ;;  %v315_v44 = vld [vmem:[%s1269_s17 + $0x30] sm:$0xff]  ;;  %v316_v46 = vld [vmem:[%s1269_s17 + $0x38] sm:$0xff] }
  0x1a   : > { %1005 = vmatpush3.msra.mxu1 %v302_v13  ;;  %950 = vmatprep.subr.mxu0 %v333_v14  ;;  %v281_v41 = vld [vmem:[%s1275_s20 + $0x20] sm:$0xff]  ;;  %v283_v45 = vld [vmem:[%s1275_s20 + $0x30] sm:$0xff]  ;;  %v284_v47 = vld [vmem:[%s1275_s20 + $0x38] sm:$0xff] }
  0x1b   : > { %1006 = vmatprep.subr.mxu1 %v301_v15  ;;  %951 = vmatpush3.msra.mxu0 %v333_v14  ;;  %v317_v48 = vld [vmem:[%s1269_s17 + $0x40] sm:$0xff]  ;;  %v318_v50 = vld [vmem:[%s1269_s17 + $0x48] sm:$0xff]  ;;  %v319_v52 = vld [vmem:[%s1269_s17 + $0x50] sm:$0xff] }
  0x1c   : > { %1007 = vmatpush3.msra.mxu1 %v301_v15  ;;  %952 = vmatprep.subr.mxu0 %v332_v16  ;;  %v285_v49 = vld [vmem:[%s1275_s20 + $0x40] sm:$0xff]  ;;  %v286_v51 = vld [vmem:[%s1275_s20 + $0x48] sm:$0xff]  ;;  %v287_v53 = vld [vmem:[%s1275_s20 + $0x50] sm:$0xff] }
  0x1d   : > { %1008 = vmatprep.subr.mxu1 %v300_v17  ;;  %953 = vmatpush3.msra.mxu0 %v332_v16  ;;  %v320_v54 = vld [vmem:[%s1269_s17 + $0x58] sm:$0xff]  ;;  %v321_v56 = vld [vmem:[%s1269_s17 + $0x60] sm:$0xff]  ;;  %v322_v58 = vld [vmem:[%s1269_s17 + $0x68] sm:$0xff] }
  0x1e   : > { %1009 = vmatpush3.msra.mxu1 %v300_v17  ;;  %954 = vmatprep.subr.mxu0 %v331_v18  ;;  %v288_v55 = vld [vmem:[%s1275_s20 + $0x58] sm:$0xff]  ;;  %v289_v57 = vld [vmem:[%s1275_s20 + $0x60] sm:$0xff]  ;;  %v290_v59 = vld [vmem:[%s1275_s20 + $0x68] sm:$0xff] }
  0x1f   : > { %1010 = vmatprep.subr.mxu1 %v299_v19  ;;  %955 = vmatpush3.msra.mxu0 %v331_v18  ;;  %v323_v60 = vld [vmem:[%s1269_s17 + $0x70] sm:$0xff]  ;;  %v324_v62 = vld [vmem:[%s1269_s17 + $0x78] sm:$0xff]  ;;  %v1318_v2 = vld [vmem:[%s1450_s4] ss:$0 sm:$0xff] }
  0x20   : > { %1011 = vmatpush3.msra.mxu1 %v299_v19  ;;  %956 = vmatprep.subr.mxu0 %v330_v20  ;;  %v291_v61 = vld [vmem:[%s1275_s20 + $0x70] sm:$0xff]  ;;  %v292_v63 = vld [vmem:[%s1275_s20 + $0x78] sm:$0xff]  ;;  %v1323_v4 = vld [vmem:[%s1451_s5] ss:$0 sm:$0xff] }
  0x21   : > { %1012 = vmatprep.subr.mxu1 %v298_v21  ;;  %957 = vmatpush3.msra.mxu0 %v330_v20 }
  0x22   : > { %1013 = vmatpush3.msra.mxu1 %v298_v21  ;;  %958 = vmatprep.subr.mxu0 %v329_v22 }
  0x23   : > { %1014 = vmatprep.subr.mxu1 %v297_v23  ;;  %959 = vmatpush3.msra.mxu0 %v329_v22 }
  0x24   : > { %1015 = vmatpush3.msra.mxu1 %v297_v23  ;;  %960 = vmatprep.subr.mxu0 %v328_v24 }
  0x25   : > { %1016 = vmatprep.subr.mxu1 %v296_v25  ;;  %961 = vmatpush3.msra.mxu0 %v328_v24 }
  0x26   : > { %1017 = vmatpush3.msra.mxu1 %v296_v25  ;;  %962 = vmatprep.subr.mxu0 %v327_v26 }
  0x27   : > { %1018 = vmatprep.subr.mxu1 %v295_v27  ;;  %963 = vmatpush3.msra.mxu0 %v327_v26 }
  0x28   : > { %1019 = vmatpush3.msra.mxu1 %v295_v27  ;;  %964 = vmatprep.subr.mxu0 %v326_v28 }
  0x29   : > { %1020 = vmatprep.subr.mxu1 %v294_v29  ;;  %965 = vmatpush3.msra.mxu0 %v326_v28 }
  0x2a   : > { %1021 = vmatpush3.msra.mxu1 %v294_v29  ;;  %966 = vmatprep.subr.mxu0 %v325_v30 }
  0x2b   : > { %1022 = vmatprep.subr.mxu1 %v293_v31  ;;  %967 = vmatpush3.msra.mxu0 %v325_v30 }
  0x2c   : > { %968 = vmatprep.mubr.f32.mxu0 %v309_v32  ;;  %1023 = vmatpush3.msra.mxu1 %v293_v31 }
  0x2d   : > { %1024 = vmatprep.mubr.f32.mxu1 %v277_v33  ;;  %969 = vmatmul.mubr.f32.vlgmr.msra.gmra.mxu0 %v310_v34 }
  0x2e   : > { %1025 = vmatmul.mubr.f32.vlgmr.msra.gmra.mxu1 %v278_v35  ;;  %971 = vmatprep.mubr.f32.mxu0 %v311_v36 }
  0x2f   : > { %1027 = vmatprep.mubr.f32.mxu1 %v279_v37 }
  0x31   : > { %972 = vmatmul.mubr.f32.gmra.mxu0 %v312_v38 }
  0x32   : > { %1028 = vmatmul.mubr.f32.gmra.mxu1 %v280_v39  ;;  %974 = vmatprep.mubr.f32.mxu0 %v313_v40 }
  0x33   : > { %1030 = vmatprep.mubr.f32.mxu1 %v281_v41 }
  0x35   : > { %975 = vmatmul.mubr.f32.gmra.mxu0 %v314_v42 }
  0x36   : > { %1031 = vmatmul.mubr.f32.gmra.mxu1 %v282_v43  ;;  %977 = vmatprep.mubr.f32.mxu0 %v315_v44 }
  0x37   : > { %1033 = vmatprep.mubr.f32.mxu1 %v283_v45 }
  0x39   : > { %978 = vmatmul.mubr.f32.gmra.mxu0 %v316_v46 }
  0x3a   : > { %1034 = vmatmul.mubr.f32.gmra.mxu1 %v284_v47  ;;  %980 = vmatprep.mubr.f32.mxu0 %v317_v48 }
  0x3b   : > { %1036 = vmatprep.mubr.f32.mxu1 %v285_v49 }
  0x3d   : > { %981 = vmatmul.mubr.f32.gmra.mxu0 %v318_v50 }
  0x3e   : > { %1037 = vmatmul.mubr.f32.gmra.mxu1 %v286_v51  ;;  %983 = vmatprep.mubr.f32.mxu0 %v319_v52 }
  0x3f   : > { %1039 = vmatprep.mubr.f32.mxu1 %v287_v53 }
  0x41   : > { %984 = vmatmul.mubr.f32.gmra.mxu0 %v320_v54 }
  0x42   : > { %1040 = vmatmul.mubr.f32.gmra.mxu1 %v288_v55  ;;  %986 = vmatprep.mubr.f32.mxu0 %v321_v56 }
  0x43   : > { %1042 = vmatprep.mubr.f32.mxu1 %v289_v57 }
  0x45   : > { %987 = vmatmul.mubr.f32.gmra.mxu0 %v322_v58 }
  0x46   : > { %1043 = vmatmul.mubr.f32.gmra.mxu1 %v290_v59  ;;  %989 = vmatprep.mubr.f32.mxu0 %v323_v60 }
  0x47   : > { %1045 = vmatprep.mubr.f32.mxu1 %v291_v61 }
  0x49   : > { %990 = vmatmul.mubr.f32.gmra.mxu0 %v324_v62 }
  0x4a   : > { %1046 = vmatmul.mubr.f32.gmra.mxu1 %v292_v63 }
  0xed   : > { %v970_v0 = vpop.f32.mrf.mxu0 }
  0xee   : > { %v1026_v1 = vpop.f32.mrf.mxu1 }
  0xef   : > { %v558_v3 = vadd.f32 %v1026_v1, %v970_v0  ;;  %v407_v5 = vpop.f32.mrf.mxu0 }
  0xf0   : > { %v552_v6 = vpop.f32.mrf.mxu1 }
  0xf1   : > { %v639_v7 = vmul.f32 %v1318_v2, %v558_v3  ;;  %v553_v8 = vadd.f32 %v552_v6, %v407_v5  ;;  %v973_v9 = vpop.f32.mrf.mxu0 }
  0xf2   : > { %v1029_v10 = vpop.f32.mrf.mxu1 }
  0xf3   : > { %v1327_v11 = vadd.f32 %v1323_v4, %v639_v7  ;;  %v638_v12 = vmul.f32 %v1318_v2, %v553_v8  ;;  %v568_v13 = vadd.f32 %v1029_v10, %v973_v9  ;;  %v417_v14 = vpop.f32.mrf.mxu0 }
  0xf4   : > { %v562_v15 = vpop.f32.mrf.mxu1 }
  0xf5   : > { %v678_v16 = vsub.f32 0.0, %v1327_v11  ;;  %v1332_v17 = vadd.f32 %v1323_v4, %v638_v12  ;;  %v641_v18 = vmul.f32 %v1318_v2, %v568_v13  ;;  %v563_v19 = vadd.f32 %v562_v15, %v417_v14  ;;  %v976_v20 = vpop.f32.mrf.mxu0 }
  0xf6   : > { %v1032_v21 = vpop.f32.mrf.mxu1 }
  0xf7   : > { %v695_v22 = vmul.f32 1.442695, %v678_v16  ;;  %v677_v23 = vsub.f32 0.0, %v1332_v17  ;;  %v1337_v24 = vadd.f32 %v1323_v4, %v641_v18  ;;  %v640_v25 = vmul.f32 %v1318_v2, %v563_v19  ;;  %v427_v27 = vpop.f32.mrf.mxu0 }
  0xf8   : > { %v578_v26 = vadd.f32 %v1032_v21, %v976_v20  ;;  %v572_v28 = vpop.f32.mrf.mxu1 }
  0xf9   : > { %1056 = vpow2.f32 %v695_v22  ;;  %v693_v29 = vmul.f32 1.442695, %v677_v23  ;;  %v680_v30 = vsub.f32 0.0, %v1337_v24  ;;  %v1342_v31 = vadd.f32 %v1323_v4, %v640_v25  ;;  %v979_v34 = vpop.f32.mrf.mxu0 }
  0xfa   : > { %v643_v32 = vmul.f32 %v1318_v2, %v578_v26  ;;  %v573_v33 = vadd.f32 %v572_v28, %v427_v27  ;;  %v1035_v35 = vpop.f32.mrf.mxu1 }
  0xfb   : > { %1058 = vpow2.f32 %v693_v29  ;;  %v699_v36 = vmul.f32 1.442695, %v680_v30  ;;  %v679_v37 = vsub.f32 0.0, %v1342_v31  ;;  %v588_v38 = vadd.f32 %v1035_v35, %v979_v34  ;;  %v437_v41 = vpop.f32.mrf.mxu0 }
  0xfc   : > { %v1347_v39 = vadd.f32 %v1323_v4, %v643_v32  ;;  %v642_v40 = vmul.f32 %v1318_v2, %v573_v33  ;;  %v582_v42 = vpop.f32.mrf.mxu1 }
  0xfd   : > { %1060 = vpow2.f32 %v699_v36  ;;  %v697_v43 = vmul.f32 1.442695, %v679_v37  ;;  %v645_v44 = vmul.f32 %v1318_v2, %v588_v38  ;;  %v583_v45 = vadd.f32 %v582_v42, %v437_v41  ;;  %v982_v48 = vpop.f32.mrf.mxu0 }
  0xfe   : > { %v682_v46 = vsub.f32 0.0, %v1347_v39  ;;  %v1353_v47 = vadd.f32 %v1323_v4, %v642_v40  ;;  %v1038_v49 = vpop.f32.mrf.mxu1 }
  0xff   : > { %1062 = vpow2.f32 %v697_v43  ;;  %v1356_v50 = vadd.f32 %v1323_v4, %v645_v44  ;;  %v644_v51 = vmul.f32 %v1318_v2, %v583_v45  ;;  %v598_v52 = vadd.f32 %v1038_v49, %v982_v48  ;;  %v447_v55 = vpop.f32.mrf.mxu0 }
 0x100   : > { %v703_v53 = vmul.f32 1.442695, %v682_v46  ;;  %v681_v54 = vsub.f32 0.0, %v1353_v47  ;;  %v592_v56 = vpop.f32.mrf.mxu1 }
 0x101   : > { %v684_v57 = vsub.f32 0.0, %v1356_v50  ;;  %v1362_v58 = vadd.f32 %v1323_v4, %v644_v51  ;;  %v647_v59 = vmul.f32 %v1318_v2, %v598_v52  ;;  %v593_v60 = vadd.f32 %v592_v56, %v447_v55  ;;  %v985_v62 = vpop.f32.mrf.mxu0 }
 0x102   : > { %1064 = vpow2.f32 %v703_v53  ;;  %v701_v61 = vmul.f32 1.442695, %v681_v54  ;;  %v1041_v63 = vpop.f32.mrf.mxu1 }
 0x103   : > { %v707_v0 = vmul.f32 1.442695, %v684_v57  ;;  %v683_v1 = vsub.f32 0.0, %v1362_v58  ;;  %v1367_v3 = vadd.f32 %v1323_v4, %v647_v59  ;;  %v646_v5 = vmul.f32 %v1318_v2, %v593_v60  ;;  %v457_v7 = vpop.f32.mrf.mxu0 }
 0x104   : > { %1066 = vpow2.f32 %v701_v61  ;;  %v608_v6 = vadd.f32 %v1041_v63, %v985_v62  ;;  %v602_v8 = vpop.f32.mrf.mxu1 }
 0x105   : > { %1068 = vpow2.f32 %v707_v0  ;;  %v705_v9 = vmul.f32 1.442695, %v683_v1  ;;  %v686_v10 = vsub.f32 0.0, %v1367_v3  ;;  %v1372_v12 = vadd.f32 %v1323_v4, %v646_v5  ;;  %v988_v16 = vpop.f32.mrf.mxu0 }
 0x106   : > { %v1057_v13 = vpop.eup %1056  ;;  %v649_v14 = vmul.f32 %v1318_v2, %v608_v6  ;;  %v603_v15 = vadd.f32 %v602_v8, %v457_v7  ;;  %v1044_v18 = vpop.f32.mrf.mxu1 }
 0x107   : > { %v726_v19 = vadd.f32 1.0, %v1057_v13  ;;  %1070 = vpow2.f32 %v705_v9  ;;  %v711_v20 = vmul.f32 1.442695, %v686_v10  ;;  %v685_v21 = vsub.f32 0.0, %v1372_v12  ;;  %v467_v27 = vpop.f32.mrf.mxu0 }
 0x108   : > { %v1059_v22 = vpop.eup %1058  ;;  %v1377_v23 = vadd.f32 %v1323_v4, %v649_v14  ;;  %v648_v25 = vmul.f32 %v1318_v2, %v603_v15  ;;  %v618_v26 = vadd.f32 %v1044_v18, %v988_v16  ;;  %v612_v28 = vpop.f32.mrf.mxu1 }
 0x109   : > { %1072 = vrcp.f32 %v726_v19  ;;  %v725_v29 = vadd.f32 1.0, %v1059_v22  ;;  %v709_v30 = vmul.f32 1.442695, %v685_v21  ;;  %v613_v32 = vadd.f32 %v612_v28, %v467_v27  ;;  %v991_v37 = vpop.f32.mrf.mxu0 }
 0x10a   : > { %v1061_v33 = vpop.eup %1060  ;;  %1074 = vpow2.f32 %v711_v20  ;;  %v688_v34 = vsub.f32 0.0, %v1377_v23  ;;  %v1382_v35 = vadd.f32 %v1323_v4, %v648_v25  ;;  %v651_v36 = vmul.f32 %v1318_v2, %v618_v26  ;;  %v1047_v38 = vpop.f32.mrf.mxu1 }
 0x10b   : > { %1076 = vrcp.f32 %v725_v29  ;;  %v728_v40 = vadd.f32 1.0, %v1061_v33  ;;  %v650_v41 = vmul.f32 %v1318_v2, %v613_v32  ;;  %v628_v42 = vadd.f32 %v1047_v38, %v991_v37  ;;  %v477_v48 = vpop.f32.mrf.mxu0 }
 0x10c   : > { %v1063_v43 = vpop.eup %1062  ;;  %1078 = vpow2.f32 %v709_v30  ;;  %v715_v44 = vmul.f32 1.442695, %v688_v34  ;;  %v687_v45 = vsub.f32 0.0, %v1382_v35  ;;  %v1388_v46 = vadd.f32 %v1323_v4, %v651_v36  ;;  %v622_v49 = vpop.f32.mrf.mxu1 }
 0x10d   : > { %1080 = vrcp.f32 %v728_v40  ;;  %v727_v51 = vadd.f32 1.0, %v1063_v43  ;;  %v1391_v52 = vadd.f32 %v1323_v4, %v650_v41  ;;  %v653_v53 = vmul.f32 %v1318_v2, %v628_v42 }
 0x10e   : > { %1082 = vpow2.f32 %v715_v44  ;;  %v713_v54 = vmul.f32 1.442695, %v687_v45  ;;  %v690_v55 = vsub.f32 0.0, %v1388_v46  ;;  %v623_v56 = vadd.f32 %v622_v49, %v477_v48 }
 0x10f   : > { %v1065_v57 = vpop.eup %1064  ;;  %1084 = vrcp.f32 %v727_v51  ;;  %v689_v59 = vsub.f32 0.0, %v1391_v52  ;;  %v1397_v60 = vadd.f32 %v1323_v4, %v653_v53 }
 0x110   : > { %v730_v61 = vadd.f32 1.0, %v1065_v57  ;;  %1086 = vpow2.f32 %v713_v54  ;;  %v719_v62 = vmul.f32 1.442695, %v690_v55  ;;  %v652_v63 = vmul.f32 %v1318_v2, %v623_v56 }
 0x111   : > { %v1067_v0 = vpop.eup %1066  ;;  %v692_v1 = vsub.f32 0.0, %v1397_v60  ;;  %v717_v7 = vmul.f32 1.442695, %v689_v59 }
 0x112   : > { %v1069_v5 = vpop.eup %1068  ;;  %1088 = vrcp.f32 %v730_v61  ;;  %v729_v6 = vadd.f32 1.0, %v1067_v0  ;;  %v1402_v8 = vadd.f32 %v1323_v4, %v652_v63 }
 0x113   : > { %v732_v9 = vadd.f32 1.0, %v1069_v5  ;;  %1090 = vpow2.f32 %v719_v62  ;;  %v723_v13 = vmul.f32 1.442695, %v692_v1 }
 0x114   : > { %v1071_v10 = vpop.eup %1070  ;;  %1092 = vrcp.f32 %v729_v6  ;;  %v691_v14 = vsub.f32 0.0, %v1402_v8 }
 0x115   : > { %1094 = vrcp.f32 %v732_v9  ;;  %v731_v2 = vadd.f32 1.0, %v1071_v10 }
 0x116   : > { %v1073_v15 = vpop.eup %1072  ;;  %1096 = vpow2.f32 %v717_v7  ;;  %v721_v4 = vmul.f32 1.442695, %v691_v14 }
 0x117   : > { %v1075_v16 = vpop.eup %1074  ;;  %v758_v18 = vmul.f32 %v1073_v15, %v1327_v11  ;;  %1098 = vrcp.f32 %v731_v2 }
 0x118   : > { %v1077_v19 = vpop.eup %1076  ;;  %v734_v20 = vadd.f32 1.0, %v1075_v16  ;;  %1100 = vpow2.f32 %v723_v13 }
 0x119   : > { %v1079_v21 = vpop.eup %1078  ;;  %774 = vst [vmem:[%s1409_s11 + $0x8] sm:$0xff] %v758_v18  ;;  %v757_v22 = vmul.f32 %v1077_v19, %v1332_v17  ;;  %1102 = vpow2.f32 %v721_v4 }
 0x11a   : > { %v1081_v25 = vpop.eup %1080  ;;  %1104 = vrcp.f32 %v734_v20  ;;  %v733_v26 = vadd.f32 1.0, %v1079_v21 }
 0x11b   : > { %v1083_v27 = vpop.eup %1082  ;;  %773 = vst [vmem:[%s1409_s11] sm:$0xff] %v757_v22  ;;  %v760_v28 = vmul.f32 %v1081_v25, %v1337_v24 }
 0x11c   : > { %v1085_v29 = vpop.eup %1084  ;;  %1106 = vrcp.f32 %v733_v26  ;;  %v736_v11 = vadd.f32 1.0, %v1083_v27 }
 0x11d   : > { %v1087_v30 = vpop.eup %1086  ;;  %776 = vst [vmem:[%s1409_s11 + $0x18] sm:$0xff] %v760_v28  ;;  %v759_v32 = vmul.f32 %v1085_v29, %v1342_v31 }
 0x11e   : > { %1108 = vrcp.f32 %v736_v11  ;;  %v735_v17 = vadd.f32 1.0, %v1087_v30 }
 0x11f   : > { %v1089_v33 = vpop.eup %1088  ;;  %775 = vst [vmem:[%s1409_s11 + $0x10] sm:$0xff] %v759_v32 }
 0x120   : > { %v1091_v34 = vpop.eup %1090  ;;  %v762_v36 = vmul.f32 %v1089_v33, %v1347_v39  ;;  %1110 = vrcp.f32 %v735_v17 }
 0x121   : > { %v1093_v37 = vpop.eup %1092  ;;  %v738_v24 = vadd.f32 1.0, %v1091_v34 }
 0x122   : > { %v1095_v38 = vpop.eup %1094  ;;  %778 = vst [vmem:[%s1409_s11 + $0x28] sm:$0xff] %v762_v36  ;;  %v761_v40 = vmul.f32 %v1093_v37, %v1353_v47 }
 0x123   : > { %v1097_v41 = vpop.eup %1096  ;;  %v764_v31 = vmul.f32 %v1095_v38, %v1356_v50  ;;  %1112 = vrcp.f32 %v738_v24 }
 0x124   : > { %v1099_v42 = vpop.eup %1098  ;;  %777 = vst [vmem:[%s1409_s11 + $0x20] sm:$0xff] %v761_v40  ;;  %v737_v43 = vadd.f32 1.0, %v1097_v41 }
 0x125   : > { %v1101_v44 = vpop.eup %1100  ;;  %780 = vst [vmem:[%s1409_s11 + $0x38] sm:$0xff] %v764_v31  ;;  %v763_v39 = vmul.f32 %v1099_v42, %v1362_v58 }
 0x126   : > { %v1103_v45 = vpop.eup %1102  ;;  %1114 = vrcp.f32 %v737_v43  ;;  %v740_v48 = vadd.f32 1.0, %v1101_v44 }
 0x127   : > { %v1105_v49 = vpop.eup %1104  ;;  %779 = vst [vmem:[%s1409_s11 + $0x30] sm:$0xff] %v763_v39  ;;  %v739_v47 = vadd.f32 1.0, %v1103_v45 }
 0x128   : > { %v766_v50 = vmul.f32 %v1105_v49, %v1367_v3  ;;  %1116 = vrcp.f32 %v740_v48 }
 0x129   : > { %v1107_v51 = vpop.eup %1106  ;;  %1118 = vrcp.f32 %v739_v47 }
 0x12a   : > { %782 = vst [vmem:[%s1409_s11 + $0x48] sm:$0xff] %v766_v50  ;;  %v765_v53 = vmul.f32 %v1107_v51, %v1372_v12 }
 0x12b   : > { %v1109_v54 = vpop.eup %1108 }
 0x12c   : > { %781 = vst [vmem:[%s1409_s11 + $0x40] sm:$0xff] %v765_v53  ;;  %v768_v58 = vmul.f32 %v1109_v54, %v1377_v23 }
 0x12d   : > { %v1111_v55 = vpop.eup %1110 }
 0x12e   : > { %784 = vst [vmem:[%s1409_s11 + $0x58] sm:$0xff] %v768_v58  ;;  %v767_v56 = vmul.f32 %v1111_v55, %v1382_v35 }
 0x130   : > { %v1113_v57 = vpop.eup %1112  ;;  %783 = vst [vmem:[%s1409_s11 + $0x50] sm:$0xff] %v767_v56 }
 0x131   : > { %v770_v3 = vmul.f32 %v1113_v57, %v1388_v46 }
 0x133   : > { %v1115_v59 = vpop.eup %1114  ;;  %786 = vst [vmem:[%s1409_s11 + $0x68] sm:$0xff] %v770_v3 }
 0x134   : > { %v769_v61 = vmul.f32 %v1115_v59, %v1391_v52 }
 0x135   : > { %v1117_v62 = vpop.eup %1116 }
 0x136   : > { %v1119_v12 = vpop.eup %1118  ;;  %785 = vst [vmem:[%s1409_s11 + $0x60] sm:$0xff] %v769_v61  ;;  %v772_v63 = vmul.f32 %v1117_v62, %v1397_v60 }
 0x137   : > { %v771_v23 = vmul.f32 %v1119_v12, %v1402_v8 }
 0x138   : > { %788 = vst [vmem:[%s1409_s11 + $0x78] sm:$0xff] %v772_v63 }
 0x139   : > { %787 = vst [vmem:[%s1409_s11 + $0x70] sm:$0xff] %v771_v23 }
 0x13a PF: > { %s16_s21 = sadd.s32 1, %s1126_s21  }
 0x13b   : > { %p13_p4 = scmp.ge.s32.totalorder %s16_s21, 6  }
 0x13d   :  { %15 = sbr.rel (!%p13_p4) target bundleno = 1 (0x1), region = 77 }

// kernel: csp_stage_forward.4
= control target key start
LH: loop header
LB: loop body
LE: loop exit
PB: predicated region body
PF: predicated region fallthrough
CT: control target
= control target key end

     0   :  { %s1449_s27 = smov 0   ;;  %s1838_s0 = inlined_call_operand.vmem [shape: f32[512,128], index: 0, kind: input, shape index: {}]   ;;  %s1839_s1 = inlined_call_operand.vmem [shape: f32[128,128], index: 1, kind: input, shape index: {}]   ;;  %s1840_s2 = inlined_call_operand.vmem [shape: f32[1,128], index: 2, kind: input, shape index: {}]   ;;  %s1841_s3 = inlined_call_operand.vmem [shape: f32[1,128], index: 3, kind: input, shape index: {}]   ;;  %s1842_s4 = inlined_call_operand.vmem [shape: f32[128,128], index: 4, kind: input, shape index: {}]   ;;  %s1843_s5 = inlined_call_operand.vmem [shape: f32[1,128], index: 5, kind: input, shape index: {}]   ;;  %s1844_s6 = inlined_call_operand.vmem [shape: f32[1,128], index: 6, kind: input, shape index: {}]   ;;  %s1845_s7 = inlined_call_operand.vmem [shape: f32[512,128], index: 7, kind: output, shape index: {0}]   ;;  %s1846_s8 = inlined_call_operand.vmem [shape: f32[512,128], index: 8, kind: output, shape index: {1}]  }
   0x1 LB: > { %s1067_s28 = sadd.s32 4294967295, %s1402_s27   ;;  %p1071_p0 = scmp.ge.s32.totalorder %s1402_s27, 1  ;;  %s1402_s27 = sphi %s1449_s27, %s19_s27  }
   0x2   : > { %p266_p1 = scmp.lt.s32.totalorder %s1402_s27, 5 }
   0x4   : > { %p267_p2 = pnand %p1071_p0, %p266_p1 }
   0x5   : > { %s1072_s19 = sshll.u32 (!%p267_p2), %s1067_s28, 4 }
   0x6   : > { %270 = sbr.rel (%p267_p2) target bundleno = 339 (0x153), region = 48  ;;  %p306_p3 = scmp.lt.s32.totalorder (!%p267_p2), %s1072_s19, 63 }
   0xb   : > { %v354_v0 = vld [vmem:[%s1839_s1 + $0x78] sm:$0xff]  ;;  %v353_v2 = vld [vmem:[%s1839_s1 + $0x70] sm:$0xff]  ;;  %v352_v4 = vld [vmem:[%s1839_s1 + $0x68] sm:$0xff]  ;;  %s1848_s19 = smov (!%p306_p3, %s1072_s19), 63 }
   0xc   : > { %v673_v1 = vld [vmem:[%s1842_s4 + $0x78] sm:$0xff]  ;;  %1148 = vmatprep.subr.mxu0 %v354_v0  ;;  %v672_v3 = vld [vmem:[%s1842_s4 + $0x70] sm:$0xff]  ;;  %v671_v5 = vld [vmem:[%s1842_s4 + $0x68] sm:$0xff]  ;;  %s1537_s20 = sshll.u32 %s1848_s19, 3 }
   0xd   : > { %1204 = vmatprep.subr.mxu1 %v673_v1  ;;  %1149 = vmatpush3.msra.mxu0 %v354_v0  ;;  %v351_v6 = vld [vmem:[%s1839_s1 + $0x60] sm:$0xff]  ;;  %v350_v8 = vld [vmem:[%s1839_s1 + $0x58] sm:$0xff]  ;;  %v349_v10 = vld [vmem:[%s1839_s1 + $0x50] sm:$0xff]  ;;  %s1555_s9 = scalar_lea.vmem %s1838_s0, %s1537_s20  ;;  %s1726_s28 = scalar_lea.vmem %s1845_s7, %s1537_s20 }
   0xe   : > { %1205 = vmatpush3.msra.mxu1 %v673_v1  ;;  %1150 = vmatprep.subr.mxu0 %v353_v2  ;;  %v670_v7 = vld [vmem:[%s1842_s4 + $0x60] sm:$0xff]  ;;  %v669_v9 = vld [vmem:[%s1842_s4 + $0x58] sm:$0xff]  ;;  %v668_v11 = vld [vmem:[%s1842_s4 + $0x50] sm:$0xff]  ;;  %s1733_s29 = scalar_lea.vmem %s1846_s8, %s1537_s20 }
   0xf   : > { %1206 = vmatprep.subr.mxu1 %v672_v3  ;;  %1151 = vmatpush3.msra.mxu0 %v353_v2  ;;  %v348_v12 = vld [vmem:[%s1839_s1 + $0x48] sm:$0xff]  ;;  %v347_v14 = vld [vmem:[%s1839_s1 + $0x40] sm:$0xff]  ;;  %v346_v16 = vld [vmem:[%s1839_s1 + $0x38] sm:$0xff] }
  0x10   : > { %1207 = vmatpush3.msra.mxu1 %v672_v3  ;;  %1152 = vmatprep.subr.mxu0 %v352_v4  ;;  %v667_v13 = vld [vmem:[%s1842_s4 + $0x48] sm:$0xff]  ;;  %v666_v15 = vld [vmem:[%s1842_s4 + $0x40] sm:$0xff]  ;;  %v665_v17 = vld [vmem:[%s1842_s4 + $0x38] sm:$0xff] }
  0x11   : > { %1208 = vmatprep.subr.mxu1 %v671_v5  ;;  %1153 = vmatpush3.msra.mxu0 %v352_v4  ;;  %v345_v18 = vld [vmem:[%s1839_s1 + $0x30] sm:$0xff]  ;;  %v344_v20 = vld [vmem:[%s1839_s1 + $0x28] sm:$0xff]  ;;  %v343_v22 = vld [vmem:[%s1839_s1 + $0x20] sm:$0xff] }
  0x12   : > { %1209 = vmatpush3.msra.mxu1 %v671_v5  ;;  %1154 = vmatprep.subr.mxu0 %v351_v6  ;;  %v664_v19 = vld [vmem:[%s1842_s4 + $0x30] sm:$0xff]  ;;  %v663_v21 = vld [vmem:[%s1842_s4 + $0x28] sm:$0xff]  ;;  %v662_v23 = vld [vmem:[%s1842_s4 + $0x20] sm:$0xff] }
  0x13   : > { %1210 = vmatprep.subr.mxu1 %v670_v7  ;;  %1155 = vmatpush3.msra.mxu0 %v351_v6  ;;  %v342_v24 = vld [vmem:[%s1839_s1 + $0x18] sm:$0xff]  ;;  %v341_v26 = vld [vmem:[%s1839_s1 + $0x10] sm:$0xff]  ;;  %v340_v28 = vld [vmem:[%s1839_s1 + $0x8] sm:$0xff] }
  0x14   : > { %1211 = vmatpush3.msra.mxu1 %v670_v7  ;;  %1156 = vmatprep.subr.mxu0 %v350_v8  ;;  %v661_v25 = vld [vmem:[%s1842_s4 + $0x18] sm:$0xff]  ;;  %v660_v27 = vld [vmem:[%s1842_s4 + $0x10] sm:$0xff]  ;;  %v659_v29 = vld [vmem:[%s1842_s4 + $0x8] sm:$0xff] }
  0x15   : > { %1212 = vmatprep.subr.mxu1 %v669_v9  ;;  %1157 = vmatpush3.msra.mxu0 %v350_v8  ;;  %v339_v30 = vld [vmem:[%s1839_s1] sm:$0xff]  ;;  %v324_v33 = vld [vmem:[%s1555_s9 + $0x8] sm:$0xff]  ;;  %v325_v34 = vld [vmem:[%s1555_s9 + $0x10] sm:$0xff] }
  0x16   : > { %1213 = vmatpush3.msra.mxu1 %v669_v9  ;;  %1158 = vmatprep.subr.mxu0 %v349_v10  ;;  %v658_v31 = vld [vmem:[%s1842_s4] sm:$0xff]  ;;  %v326_v35 = vld [vmem:[%s1555_s9 + $0x18] sm:$0xff]  ;;  %v328_v37 = vld [vmem:[%s1555_s9 + $0x28] sm:$0xff] }
  0x17   : > { %1214 = vmatprep.subr.mxu1 %v668_v11  ;;  %1159 = vmatpush3.msra.mxu0 %v349_v10  ;;  %v323_v32 = vld [vmem:[%s1555_s9] sm:$0xff]  ;;  %v329_v38 = vld [vmem:[%s1555_s9 + $0x30] sm:$0xff]  ;;  %v330_v39 = vld [vmem:[%s1555_s9 + $0x38] sm:$0xff] }
  0x18   : > { %1215 = vmatpush3.msra.mxu1 %v668_v11  ;;  %1160 = vmatprep.subr.mxu0 %v348_v12  ;;  %v327_v36 = vld [vmem:[%s1555_s9 + $0x20] sm:$0xff]  ;;  %v332_v41 = vld [vmem:[%s1555_s9 + $0x48] sm:$0xff]  ;;  %v333_v42 = vld [vmem:[%s1555_s9 + $0x50] sm:$0xff] }
  0x19   : > { %1216 = vmatprep.subr.mxu1 %v667_v13  ;;  %1161 = vmatpush3.msra.mxu0 %v348_v12  ;;  %v331_v40 = vld [vmem:[%s1555_s9 + $0x40] sm:$0xff]  ;;  %v334_v43 = vld [vmem:[%s1555_s9 + $0x58] sm:$0xff]  ;;  %v336_v45 = vld [vmem:[%s1555_s9 + $0x68] sm:$0xff] }
  0x1a   : > { %1217 = vmatpush3.msra.mxu1 %v667_v13  ;;  %1162 = vmatprep.subr.mxu0 %v347_v14  ;;  %v335_v44 = vld [vmem:[%s1555_s9 + $0x60] sm:$0xff]  ;;  %v337_v46 = vld [vmem:[%s1555_s9 + $0x70] sm:$0xff]  ;;  %v338_v47 = vld [vmem:[%s1555_s9 + $0x78] sm:$0xff] }
  0x1b   : > { %1218 = vmatprep.subr.mxu1 %v666_v15  ;;  %1163 = vmatpush3.msra.mxu0 %v347_v14  ;;  %v1582_v48 = vld [vmem:[%s1840_s2] ss:$0 sm:$0xff] }
  0x1c   : > { %1219 = vmatpush3.msra.mxu1 %v666_v15  ;;  %1164 = vmatprep.subr.mxu0 %v346_v16  ;;  %v1587_v49 = vld [vmem:[%s1843_s5] ss:$0 sm:$0xff] }
  0x1d   : > { %1220 = vmatprep.subr.mxu1 %v665_v17  ;;  %1165 = vmatpush3.msra.mxu0 %v346_v16  ;;  %v1592_v50 = vld [vmem:[%s1841_s3] ss:$0 sm:$0xff] }
  0x1e   : > { %1221 = vmatpush3.msra.mxu1 %v665_v17  ;;  %1166 = vmatprep.subr.mxu0 %v345_v18  ;;  %v1597_v52 = vld [vmem:[%s1844_s6] ss:$0 sm:$0xff] }
  0x1f   : > { %1222 = vmatprep.subr.mxu1 %v664_v19  ;;  %1167 = vmatpush3.msra.mxu0 %v345_v18 }
  0x20   : > { %1223 = vmatpush3.msra.mxu1 %v664_v19  ;;  %1168 = vmatprep.subr.mxu0 %v344_v20 }
  0x21   : > { %1224 = vmatprep.subr.mxu1 %v663_v21  ;;  %1169 = vmatpush3.msra.mxu0 %v344_v20 }
  0x22   : > { %1225 = vmatpush3.msra.mxu1 %v663_v21  ;;  %1170 = vmatprep.subr.mxu0 %v343_v22 }
  0x23   : > { %1226 = vmatprep.subr.mxu1 %v662_v23  ;;  %1171 = vmatpush3.msra.mxu0 %v343_v22 }
  0x24   : > { %1227 = vmatpush3.msra.mxu1 %v662_v23  ;;  %1172 = vmatprep.subr.mxu0 %v342_v24 }
  0x25   : > { %1228 = vmatprep.subr.mxu1 %v661_v25  ;;  %1173 = vmatpush3.msra.mxu0 %v342_v24 }
  0x26   : > { %1229 = vmatpush3.msra.mxu1 %v661_v25  ;;  %1174 = vmatprep.subr.mxu0 %v341_v26 }
  0x27   : > { %1230 = vmatprep.subr.mxu1 %v660_v27  ;;  %1175 = vmatpush3.msra.mxu0 %v341_v26 }
  0x28   : > { %1231 = vmatpush3.msra.mxu1 %v660_v27  ;;  %1176 = vmatprep.subr.mxu0 %v340_v28 }
  0x29   : > { %1232 = vmatprep.subr.mxu1 %v659_v29  ;;  %1177 = vmatpush3.msra.mxu0 %v340_v28 }
  0x2a   : > { %1233 = vmatpush3.msra.mxu1 %v659_v29  ;;  %1178 = vmatprep.subr.mxu0 %v339_v30 }
  0x2b   : > { %1234 = vmatprep.subr.mxu1 %v658_v31  ;;  %1179 = vmatpush3.msra.mxu0 %v339_v30 }
  0x2c   : > { %1180 = vmatprep.mubr.f32.mxu0 %v323_v32  ;;  %1235 = vmatpush3.msra.mxu1 %v658_v31 }
  0x2d   : > { %1236 = vmatprep.mubr.f32.mxu1 %v323_v32  ;;  %1181 = vmatmul.mubr.f32.vlgmr.msra.gmra.mxu0 %v324_v33 }
  0x2e   : > { %1237 = vmatmul.mubr.f32.vlgmr.msra.gmra.mxu1 %v324_v33  ;;  %1183 = vmatprep.mubr.f32.mxu0 %v325_v34 }
  0x2f   : > { %1239 = vmatprep.mubr.f32.mxu1 %v325_v34 }
  0x31   : > { %1184 = vmatmul.mubr.f32.gmra.mxu0 %v326_v35 }
  0x32   : > { %1240 = vmatmul.mubr.f32.gmra.mxu1 %v326_v35  ;;  %1186 = vmatprep.mubr.f32.mxu0 %v327_v36 }
  0x33   : > { %1242 = vmatprep.mubr.f32.mxu1 %v327_v36 }
  0x35   : > { %1187 = vmatmul.mubr.f32.gmra.mxu0 %v328_v37 }
  0x36   : > { %1243 = vmatmul.mubr.f32.gmra.mxu1 %v328_v37  ;;  %1189 = vmatprep.mubr.f32.mxu0 %v329_v38 }
  0x37   : > { %1245 = vmatprep.mubr.f32.mxu1 %v329_v38 }
  0x39   : > { %1190 = vmatmul.mubr.f32.gmra.mxu0 %v330_v39 }
  0x3a   : > { %1246 = vmatmul.mubr.f32.gmra.mxu1 %v330_v39  ;;  %1192 = vmatprep.mubr.f32.mxu0 %v331_v40 }
  0x3b   : > { %1248 = vmatprep.mubr.f32.mxu1 %v331_v40 }
  0x3d   : > { %1193 = vmatmul.mubr.f32.gmra.mxu0 %v332_v41 }
  0x3e   : > { %1249 = vmatmul.mubr.f32.gmra.mxu1 %v332_v41  ;;  %1195 = vmatprep.mubr.f32.mxu0 %v333_v42 }
  0x3f   : > { %1251 = vmatprep.mubr.f32.mxu1 %v333_v42 }
  0x41   : > { %1196 = vmatmul.mubr.f32.gmra.mxu0 %v334_v43 }
  0x42   : > { %1252 = vmatmul.mubr.f32.gmra.mxu1 %v334_v43  ;;  %1198 = vmatprep.mubr.f32.mxu0 %v335_v44 }
  0x43   : > { %1254 = vmatprep.mubr.f32.mxu1 %v335_v44 }
  0x45   : > { %1199 = vmatmul.mubr.f32.gmra.mxu0 %v336_v45 }
  0x46   : > { %1255 = vmatmul.mubr.f32.gmra.mxu1 %v336_v45  ;;  %1201 = vmatprep.mubr.f32.mxu0 %v337_v46 }
  0x47   : > { %1257 = vmatprep.mubr.f32.mxu1 %v337_v46 }
  0x49   : > { %1202 = vmatmul.mubr.f32.gmra.mxu0 %v338_v47 }
  0x4a   : > { %1258 = vmatmul.mubr.f32.gmra.mxu1 %v338_v47 }
  0xed   : > { %v1182_v51 = vpop.f32.mrf.mxu0 }
  0xee   : > { %v1238_v53 = vpop.f32.mrf.mxu1  ;;  %v509_v54 = vmul.f32 %v1182_v51, %v1582_v48 }
  0xef   : > { %v828_v55 = vmul.f32 %v1238_v53, %v1587_v49  ;;  %v423_v56 = vpop.f32.mrf.mxu0 }
  0xf0   : > { %v742_v57 = vpop.f32.mrf.mxu1  ;;  %v1602_v58 = vadd.f32 %v1592_v50, %v509_v54  ;;  %v508_v60 = vmul.f32 %v1582_v48, %v423_v56 }
  0xf1   : > { %v1605_v59 = vadd.f32 %v1597_v52, %v828_v55  ;;  %v827_v61 = vmul.f32 %v1587_v49, %v742_v57  ;;  %v1185_v62 = vpop.f32.mrf.mxu0 }
  0xf2   : > { %v1241_v63 = vpop.f32.mrf.mxu1  ;;  %v547_v0 = vsub.f32 0.0, %v1602_v58  ;;  %v1612_v2 = vadd.f32 %v1592_v50, %v508_v60  ;;  %v511_v4 = vmul.f32 %v1185_v62, %v1582_v48 }
  0xf3   : > { %v866_v1 = vsub.f32 0.0, %v1605_v59  ;;  %v1615_v3 = vadd.f32 %v1597_v52, %v827_v61  ;;  %v830_v5 = vmul.f32 %v1241_v63, %v1587_v49  ;;  %v433_v6 = vpop.f32.mrf.mxu0 }
  0xf4   : > { %v752_v7 = vpop.f32.mrf.mxu1  ;;  %v564_v8 = vmul.f32 1.442695, %v547_v0  ;;  %v546_v10 = vsub.f32 0.0, %v1612_v2  ;;  %v1622_v12 = vadd.f32 %v1592_v50, %v511_v4  ;;  %v510_v14 = vmul.f32 %v1582_v48, %v433_v6 }
  0xf5   : > { %v883_v9 = vmul.f32 1.442695, %v866_v1  ;;  %v865_v11 = vsub.f32 0.0, %v1615_v3  ;;  %v1625_v13 = vadd.f32 %v1597_v52, %v830_v5  ;;  %v829_v15 = vmul.f32 %v1587_v49, %v752_v7  ;;  %v1188_v16 = vpop.f32.mrf.mxu0 }
  0xf6   : > { %v1244_v17 = vpop.f32.mrf.mxu1  ;;  %1268 = vpow2.f32 %v564_v8  ;;  %v562_v18 = vmul.f32 1.442695, %v546_v10  ;;  %v513_v20 = vmul.f32 %v1188_v16, %v1582_v48  ;;  %v549_v21 = vsub.f32 0.0, %v1622_v12 }
  0xf7   : > { %v881_v19 = vmul.f32 1.442695, %v865_v11  ;;  %1270 = vpow2.f32 %v883_v9  ;;  %v868_v22 = vsub.f32 0.0, %v1625_v13  ;;  %v1633_v23 = vadd.f32 %v1592_v50, %v510_v14  ;;  %v443_v24 = vpop.f32.mrf.mxu0 }
  0xf8   : > { %v762_v25 = vpop.f32.mrf.mxu1  ;;  %1272 = vpow2.f32 %v562_v18  ;;  %v1636_v26 = vadd.f32 %v1597_v52, %v829_v15  ;;  %v1639_v27 = vadd.f32 %v1592_v50, %v513_v20  ;;  %v832_v28 = vmul.f32 %v1244_v17, %v1587_v49 }
  0xf9   : > { %1274 = vpow2.f32 %v881_v19  ;;  %v568_v29 = vmul.f32 1.442695, %v549_v21  ;;  %v887_v30 = vmul.f32 1.442695, %v868_v22  ;;  %v548_v31 = vsub.f32 0.0, %v1633_v23  ;;  %v1191_v32 = vpop.f32.mrf.mxu0 }
  0xfa   : > { %v1247_v33 = vpop.f32.mrf.mxu1  ;;  %v867_v34 = vsub.f32 0.0, %v1636_v26  ;;  %v551_v35 = vsub.f32 0.0, %v1639_v27  ;;  %v1646_v36 = vadd.f32 %v1597_v52, %v832_v28  ;;  %v512_v37 = vmul.f32 %v1582_v48, %v443_v24 }
  0xfb   : > { %1276 = vpow2.f32 %v568_v29  ;;  %v566_v38 = vmul.f32 1.442695, %v548_v31  ;;  %v831_v39 = vmul.f32 %v1587_v49, %v762_v25  ;;  %v515_v40 = vmul.f32 %v1191_v32, %v1582_v48  ;;  %v453_v41 = vpop.f32.mrf.mxu0 }
  0xfc   : > { %v772_v42 = vpop.f32.mrf.mxu1  ;;  %1278 = vpow2.f32 %v887_v30  ;;  %v885_v43 = vmul.f32 1.442695, %v867_v34  ;;  %v572_v44 = vmul.f32 1.442695, %v551_v35  ;;  %v870_v45 = vsub.f32 0.0, %v1646_v36 }
  0xfd   : > { %1280 = vpow2.f32 %v566_v38  ;;  %v1653_v46 = vadd.f32 %v1592_v50, %v512_v37  ;;  %v1656_v47 = vadd.f32 %v1597_v52, %v831_v39  ;;  %v1659_v51 = vadd.f32 %v1592_v50, %v515_v40  ;;  %v1194_v53 = vpop.f32.mrf.mxu0 }
  0xfe   : > { %v1250_v54 = vpop.f32.mrf.mxu1  ;;  %1282 = vpow2.f32 %v885_v43  ;;  %v891_v55 = vmul.f32 1.442695, %v870_v45  ;;  %v834_v56 = vmul.f32 %v1247_v33, %v1587_v49  ;;  %v514_v57 = vmul.f32 %v1582_v48, %v453_v41 }
  0xff   : > { %1284 = vpow2.f32 %v572_v44  ;;  %v550_v60 = vsub.f32 0.0, %v1653_v46  ;;  %v869_v61 = vsub.f32 0.0, %v1656_v47  ;;  %v553_v62 = vsub.f32 0.0, %v1659_v51  ;;  %v463_v4 = vpop.f32.mrf.mxu0 }
 0x100   : > { %1286 = vpow2.f32 %v891_v55  ;;  %v1667_v63 = vadd.f32 %v1597_v52, %v834_v56  ;;  %v1670_v0 = vadd.f32 %v1592_v50, %v514_v57  ;;  %v833_v1 = vmul.f32 %v1587_v49, %v772_v42  ;;  %v782_v9 = vpop.f32.mrf.mxu1 }
 0x101   : > { %v570_v5 = vmul.f32 1.442695, %v550_v60  ;;  %v889_v6 = vmul.f32 1.442695, %v869_v61  ;;  %v576_v7 = vmul.f32 1.442695, %v553_v62  ;;  %v517_v8 = vmul.f32 %v1194_v53, %v1582_v48  ;;  %v1197_v21 = vpop.f32.mrf.mxu0 }
 0x102   : > { %v872_v10 = vsub.f32 0.0, %v1667_v63  ;;  %v1676_v11 = vadd.f32 %v1597_v52, %v833_v1  ;;  %v552_v15 = vsub.f32 0.0, %v1670_v0  ;;  %v836_v16 = vmul.f32 %v1250_v54, %v1587_v49  ;;  %v1253_v28 = vpop.f32.mrf.mxu1 }
 0x103   : > { %v1269_v14 = vpop.eup %1268  ;;  %1288 = vpow2.f32 %v570_v5  ;;  %v1681_v19 = vadd.f32 %v1592_v50, %v517_v8  ;;  %v516_v20 = vmul.f32 %v1582_v48, %v463_v4  ;;  %v835_v25 = vmul.f32 %v1587_v49, %v782_v9  ;;  %v473_v40 = vpop.f32.mrf.mxu0 }
 0x104   : > { %v1271_v17 = vpop.eup %1270  ;;  %v595_v18 = vadd.f32 1.0, %v1269_v14  ;;  %1290 = vpow2.f32 %v889_v6  ;;  %v895_v31 = vmul.f32 1.442695, %v872_v10  ;;  %v871_v32 = vsub.f32 0.0, %v1676_v11  ;;  %v792_v45 = vpop.f32.mrf.mxu1 }
 0x105   : > { %v1273_v22 = vpop.eup %1272  ;;  %v914_v24 = vadd.f32 1.0, %v1271_v17  ;;  %1292 = vpow2.f32 %v576_v7  ;;  %v1687_v34 = vadd.f32 %v1597_v52, %v836_v16  ;;  %v574_v37 = vmul.f32 1.442695, %v552_v15  ;;  %v1200_v7 = vpop.f32.mrf.mxu0 }
 0x106   : > { %v1275_v29 = vpop.eup %1274  ;;  %1294 = vrcp.f32 %v595_v18  ;;  %v594_v30 = vadd.f32 1.0, %v1273_v22  ;;  %v555_v38 = vsub.f32 0.0, %v1681_v19  ;;  %v1691_v39 = vadd.f32 %v1592_v50, %v516_v20  ;;  %v1256_v15 = vpop.f32.mrf.mxu1 }
 0x107   : > { %1296 = vrcp.f32 %v914_v24  ;;  %v913_v33 = vadd.f32 1.0, %v1275_v29  ;;  %v519_v43 = vmul.f32 %v1197_v21, %v1582_v48  ;;  %v838_v44 = vmul.f32 %v1253_v28, %v1587_v49 }
 0x108   : > { %v1277_v35 = vpop.eup %1276  ;;  %1298 = vrcp.f32 %v594_v30  ;;  %v893_v55 = vmul.f32 1.442695, %v871_v32  ;;  %v1696_v56 = vadd.f32 %v1597_v52, %v835_v25  ;;  %v874_v61 = vsub.f32 0.0, %v1687_v34  ;;  %v483_v30 = vpop.f32.mrf.mxu0 }
 0x109   : > { %v1279_v41 = vpop.eup %1278  ;;  %1300 = vrcp.f32 %v913_v33  ;;  %v597_v42 = vadd.f32 1.0, %v1277_v35  ;;  %v1700_v62 = vadd.f32 %v1592_v50, %v519_v43  ;;  %v554_v5 = vsub.f32 0.0, %v1691_v39 }
 0x10a   : > { %v1281_v53 = vpop.eup %1280  ;;  %v916_v54 = vadd.f32 1.0, %v1279_v41  ;;  %1302 = vpow2.f32 %v895_v31  ;;  %v518_v6 = vmul.f32 %v1582_v48, %v473_v40  ;;  %v580_v10 = vmul.f32 1.442695, %v555_v38 }
 0x10b   : > { %v1283_v57 = vpop.eup %1282  ;;  %1304 = vrcp.f32 %v597_v42  ;;  %v596_v60 = vadd.f32 1.0, %v1281_v53  ;;  %v1705_v14 = vadd.f32 %v1597_v52, %v838_v44  ;;  %v873_v17 = vsub.f32 0.0, %v1696_v56  ;;  %v802_v53 = vpop.f32.mrf.mxu1 }
 0x10c   : > { %v1285_v1 = vpop.eup %1284  ;;  %1306 = vrcp.f32 %v916_v54  ;;  %v915_v4 = vadd.f32 1.0, %v1283_v57  ;;  %v557_v18 = vsub.f32 0.0, %v1700_v62  ;;  %v1710_v20 = vadd.f32 %v1592_v50, %v518_v6 }
 0x10d   : > { %v1287_v8 = vpop.eup %1286  ;;  %1308 = vrcp.f32 %v596_v60  ;;  %v599_v9 = vadd.f32 1.0, %v1285_v1  ;;  %v837_v21 = vmul.f32 %v1587_v49, %v792_v45  ;;  %v521_v22 = vmul.f32 %v1200_v7, %v1582_v48 }
 0x10e   : > { %1310 = vrcp.f32 %v915_v4  ;;  %v918_v16 = vadd.f32 1.0, %v1287_v8  ;;  %v899_v25 = vmul.f32 1.442695, %v874_v61  ;;  %v578_v28 = vmul.f32 1.442695, %v554_v5  ;;  %v1203_v61 = vpop.f32.mrf.mxu0 }
 0x10f   : > { %1312 = vrcp.f32 %v599_v9  ;;  %v840_v29 = vmul.f32 %v1256_v15, %v1587_v49  ;;  %v876_v33 = vsub.f32 0.0, %v1705_v14  ;;  %v1717_v35 = vadd.f32 %v1597_v52, %v837_v21 }
 0x110   : > { %v1289_v24 = vpop.eup %1288  ;;  %1314 = vrcp.f32 %v918_v16  ;;  %v897_v41 = vmul.f32 1.442695, %v873_v17  ;;  %v1720_v42 = vadd.f32 %v1592_v50, %v521_v22  ;;  %v584_v44 = vmul.f32 1.442695, %v557_v18  ;;  %v1259_v18 = vpop.f32.mrf.mxu1 }
 0x111   : > { %v1291_v31 = vpop.eup %1290  ;;  %v598_v32 = vadd.f32 1.0, %v1289_v24  ;;  %1316 = vpow2.f32 %v574_v37  ;;  %v556_v45 = vsub.f32 0.0, %v1710_v20  ;;  %v1737_v57 = vadd.f32 %v1597_v52, %v840_v29 }
 0x112   : > { %v1293_v38 = vpop.eup %1292  ;;  %v917_v40 = vadd.f32 1.0, %v1291_v31  ;;  %1318 = vpow2.f32 %v893_v55  ;;  %v520_v60 = vmul.f32 %v1582_v48, %v483_v30  ;;  %v903_v5 = vmul.f32 1.442695, %v876_v33 }
 0x113   : > { %v1295_v43 = vpop.eup %1294  ;;  %1320 = vrcp.f32 %v598_v32  ;;  %v601_v37 = vadd.f32 1.0, %v1293_v38  ;;  %v875_v6 = vsub.f32 0.0, %v1717_v35  ;;  %v559_v8 = vsub.f32 0.0, %v1720_v42 }
 0x114   : > { %v1297_v54 = vpop.eup %1296  ;;  %v627_v55 = vmul.f32 %v1295_v43, %v1602_v58  ;;  %1322 = vrcp.f32 %v917_v40  ;;  %v1746_v9 = vadd.f32 %v1592_v50, %v520_v60  ;;  %v839_v16 = vmul.f32 %v1587_v49, %v802_v53 }
 0x115   : > { %v1299_v1 = vpop.eup %1298  ;;  %v946_v4 = vmul.f32 %v1297_v54, %v1605_v59  ;;  %1324 = vrcp.f32 %v601_v37  ;;  %v523_v17 = vmul.f32 %v1203_v61, %v1582_v48  ;;  %v878_v22 = vsub.f32 0.0, %v1737_v57 }
 0x116   : > { %v1301_v7 = vpop.eup %1300  ;;  %643 = vst [vmem:[%s1726_s28 + $0x8] sm:$0xff] %v627_v55  ;;  %v626_v58 = vmul.f32 %v1299_v1, %v1612_v2  ;;  %1326 = vpow2.f32 %v580_v10  ;;  %v582_v10 = vmul.f32 1.442695, %v556_v45  ;;  %v842_v32 = vmul.f32 %v1259_v18, %v1587_v49  ;;  %v493_v55 = vpop.f32.mrf.mxu0 }
 0x117   : > { %v1303_v15 = vpop.eup %1302  ;;  %962 = vst [vmem:[%s1733_s29 + $0x8] sm:$0xff] %v946_v4  ;;  %v945_v59 = vmul.f32 %v1301_v7, %v1615_v3  ;;  %1328 = vpow2.f32 %v899_v25  ;;  %v1757_v3 = vadd.f32 %v1597_v52, %v839_v16  ;;  %v1760_v25 = vadd.f32 %v1592_v50, %v523_v17  ;;  %v812_v4 = vpop.f32.mrf.mxu1 }
 0x118   : > { %v1305_v21 = vpop.eup %1304  ;;  %642 = vst [vmem:[%s1726_s28] sm:$0xff] %v626_v58  ;;  %v920_v2 = vadd.f32 1.0, %v1303_v15  ;;  %1330 = vpow2.f32 %v578_v28  ;;  %v901_v28 = vmul.f32 1.442695, %v875_v6  ;;  %v588_v38 = vmul.f32 1.442695, %v559_v8 }
 0x119   : > { %v1307_v24 = vpop.eup %1306  ;;  %961 = vst [vmem:[%s1733_s29] sm:$0xff] %v945_v59  ;;  %v629_v29 = vmul.f32 %v1305_v21, %v1622_v12  ;;  %1332 = vpow2.f32 %v897_v41  ;;  %v558_v40 = vsub.f32 0.0, %v1746_v9  ;;  %v877_v37 = vsub.f32 0.0, %v1757_v3 }
 0x11a   : > { %v1309_v30 = vpop.eup %1308  ;;  %v948_v31 = vmul.f32 %v1307_v24, %v1625_v13  ;;  %1334 = vrcp.f32 %v920_v2  ;;  %v907_v13 = vmul.f32 1.442695, %v878_v22  ;;  %v522_v8 = vmul.f32 %v1582_v48, %v493_v55 }
 0x11b   : > { %v1311_v33 = vpop.eup %1310  ;;  %645 = vst [vmem:[%s1726_s28 + $0x18] sm:$0xff] %v629_v29  ;;  %v628_v12 = vmul.f32 %v1309_v30, %v1633_v23  ;;  %1336 = vpow2.f32 %v584_v44  ;;  %v561_v23 = vsub.f32 0.0, %v1760_v25  ;;  %v586_v1 = vmul.f32 1.442695, %v558_v40 }
 0x11c   : > { %v1313_v41 = vpop.eup %1312  ;;  %964 = vst [vmem:[%s1733_s29 + $0x18] sm:$0xff] %v948_v31  ;;  %v947_v43 = vmul.f32 %v1311_v33, %v1636_v26  ;;  %1338 = vpow2.f32 %v903_v5  ;;  %v1776_v26 = vadd.f32 %v1597_v52, %v842_v32  ;;  %v905_v6 = vmul.f32 1.442695, %v877_v37 }
 0x11d   : > { %v1315_v45 = vpop.eup %1314  ;;  %644 = vst [vmem:[%s1726_s28 + $0x10] sm:$0xff] %v628_v12  ;;  %v631_v53 = vmul.f32 %v1313_v41, %v1639_v27  ;;  %1340 = vpow2.f32 %v582_v10  ;;  %v592_v58 = vmul.f32 1.442695, %v561_v23  ;;  %v841_v17 = vmul.f32 %v1587_v49, %v812_v4 }
 0x11e   : > { %v1317_v44 = vpop.eup %1316  ;;  %963 = vst [vmem:[%s1733_s29 + $0x10] sm:$0xff] %v947_v43  ;;  %v950_v54 = vmul.f32 %v1315_v45, %v1646_v36  ;;  %1342 = vpow2.f32 %v901_v28  ;;  %v880_v16 = vsub.f32 0.0, %v1776_v26 }
 0x11f   : > { %v1319_v60 = vpop.eup %1318  ;;  %647 = vst [vmem:[%s1726_s28 + $0x28] sm:$0xff] %v631_v53  ;;  %v600_v61 = vadd.f32 1.0, %v1317_v44  ;;  %1344 = vpow2.f32 %v588_v38  ;;  %v1793_v29 = vadd.f32 %v1597_v52, %v841_v17 }
 0x120   : > { %v1321_v27 = vpop.eup %1320  ;;  %966 = vst [vmem:[%s1733_s29 + $0x28] sm:$0xff] %v950_v54  ;;  %v919_v5 = vadd.f32 1.0, %v1319_v60  ;;  %1346 = vpow2.f32 %v907_v13  ;;  %v911_v24 = vmul.f32 1.442695, %v880_v16 }
 0x121   : > { %v1323_v7 = vpop.eup %1322  ;;  %v630_v36 = vmul.f32 %v1321_v27, %v1653_v46  ;;  %1348 = vrcp.f32 %v600_v61  ;;  %v879_v40 = vsub.f32 0.0, %v1793_v29 }
 0x122   : > { %v1325_v15 = vpop.eup %1324  ;;  %v949_v59 = vmul.f32 %v1323_v7, %v1656_v47  ;;  %1350 = vrcp.f32 %v919_v5  ;;  %v1790_v47 = vadd.f32 %v1592_v50, %v522_v8 }
 0x123   : > { %v1327_v18 = vpop.eup %1326  ;;  %646 = vst [vmem:[%s1726_s28 + $0x20] sm:$0xff] %v630_v36  ;;  %v633_v21 = vmul.f32 %v1325_v15, %v1659_v51  ;;  %1352 = vpow2.f32 %v586_v1  ;;  %v909_v44 = vmul.f32 1.442695, %v879_v40 }
 0x124   : > { %v1329_v2 = vpop.eup %1328  ;;  %965 = vst [vmem:[%s1733_s29 + $0x20] sm:$0xff] %v949_v59  ;;  %v603_v46 = vadd.f32 1.0, %v1327_v18  ;;  %1354 = vpow2.f32 %v905_v6  ;;  %v560_v50 = vsub.f32 0.0, %v1790_v47 }
 0x125   : > { %v1331_v10 = vpop.eup %1330  ;;  %649 = vst [vmem:[%s1726_s28 + $0x38] sm:$0xff] %v633_v21  ;;  %v922_v48 = vadd.f32 1.0, %v1329_v2  ;;  %1356 = vpow2.f32 %v592_v58 }
 0x126   : > { %v1333_v22 = vpop.eup %1332  ;;  %1358 = vrcp.f32 %v603_v46  ;;  %v602_v49 = vadd.f32 1.0, %v1331_v10  ;;  %v590_v45 = vmul.f32 1.442695, %v560_v50 }
 0x127   : > { %v1335_v51 = vpop.eup %1334  ;;  %1360 = vrcp.f32 %v922_v48  ;;  %v921_v30 = vadd.f32 1.0, %v1333_v22 }
 0x128   : > { %v1337_v31 = vpop.eup %1336  ;;  %v952_v28 = vmul.f32 %v1335_v51, %v1667_v63  ;;  %1362 = vrcp.f32 %v602_v49 }
 0x129   : > { %v1339_v32 = vpop.eup %1338  ;;  %1364 = vrcp.f32 %v921_v30  ;;  %v605_v33 = vadd.f32 1.0, %v1337_v31 }
 0x12a   : > { %v1341_v12 = vpop.eup %1340  ;;  %968 = vst [vmem:[%s1733_s29 + $0x38] sm:$0xff] %v952_v28  ;;  %v924_v38 = vadd.f32 1.0, %v1339_v32  ;;  %1366 = vpow2.f32 %v911_v24 }
 0x12b   : > { %v1343_v52 = vpop.eup %1342  ;;  %1368 = vrcp.f32 %v605_v33  ;;  %v604_v41 = vadd.f32 1.0, %v1341_v12 }
 0x12c   : > { %v1345_v43 = vpop.eup %1344  ;;  %1370 = vrcp.f32 %v924_v38  ;;  %v923_v13 = vadd.f32 1.0, %v1343_v52 }
 0x12d   : > { %v1347_v63 = vpop.eup %1346  ;;  %1372 = vrcp.f32 %v604_v41  ;;  %v607_v37 = vadd.f32 1.0, %v1345_v43 }
 0x12e   : > { %v1349_v53 = vpop.eup %1348  ;;  %1374 = vrcp.f32 %v923_v13  ;;  %v926_v23 = vadd.f32 1.0, %v1347_v63 }
 0x12f   : > { %v1351_v54 = vpop.eup %1350  ;;  %v632_v55 = vmul.f32 %v1349_v53, %v1670_v0  ;;  %1376 = vrcp.f32 %v607_v37 }
 0x130   : > { %v1353_v60 = vpop.eup %1352  ;;  %v951_v61 = vmul.f32 %v1351_v54, %v1676_v11  ;;  %1378 = vrcp.f32 %v926_v23 }
 0x131   : > { %v1355_v1 = vpop.eup %1354  ;;  %648 = vst [vmem:[%s1726_s28 + $0x30] sm:$0xff] %v632_v55  ;;  %v606_v4 = vadd.f32 1.0, %v1353_v60  ;;  %1380 = vpow2.f32 %v590_v45 }
 0x132   : > { %v1357_v27 = vpop.eup %1356  ;;  %967 = vst [vmem:[%s1733_s29 + $0x30] sm:$0xff] %v951_v61  ;;  %v925_v5 = vadd.f32 1.0, %v1355_v1  ;;  %1382 = vpow2.f32 %v909_v44 }
 0x133   : > { %v1359_v6 = vpop.eup %1358  ;;  %1384 = vrcp.f32 %v606_v4  ;;  %v609_v7 = vadd.f32 1.0, %v1357_v27 }
 0x134   : > { %v1361_v0 = vpop.eup %1360  ;;  %v635_v36 = vmul.f32 %v1359_v6, %v1681_v19  ;;  %1386 = vrcp.f32 %v925_v5 }
 0x135   : > { %v1363_v11 = vpop.eup %1362  ;;  %v954_v58 = vmul.f32 %v1361_v0, %v1687_v34  ;;  %1388 = vrcp.f32 %v609_v7 }
 0x136   : > { %v1365_v8 = vpop.eup %1364  ;;  %651 = vst [vmem:[%s1726_s28 + $0x48] sm:$0xff] %v635_v36  ;;  %v634_v15 = vmul.f32 %v1363_v11, %v1691_v39 }
 0x137   : > { %v1367_v59 = vpop.eup %1366  ;;  %970 = vst [vmem:[%s1733_s29 + $0x48] sm:$0xff] %v954_v58  ;;  %v953_v16 = vmul.f32 %v1365_v8, %v1696_v56 }
 0x138   : > { %v1369_v17 = vpop.eup %1368  ;;  %650 = vst [vmem:[%s1726_s28 + $0x40] sm:$0xff] %v634_v15  ;;  %v928_v18 = vadd.f32 1.0, %v1367_v59 }
 0x139   : > { %v1371_v19 = vpop.eup %1370  ;;  %969 = vst [vmem:[%s1733_s29 + $0x40] sm:$0xff] %v953_v16  ;;  %v637_v34 = vmul.f32 %v1369_v17, %v1700_v62 }
 0x13a   : > { %v1373_v21 = vpop.eup %1372  ;;  %v956_v2 = vmul.f32 %v1371_v19, %v1705_v14  ;;  %1390 = vrcp.f32 %v928_v18 }
 0x13b   : > { %v1375_v39 = vpop.eup %1374  ;;  %653 = vst [vmem:[%s1726_s28 + $0x58] sm:$0xff] %v637_v34  ;;  %v636_v46 = vmul.f32 %v1373_v21, %v1710_v20 }
 0x13c   : > { %v1377_v56 = vpop.eup %1376  ;;  %972 = vst [vmem:[%s1733_s29 + $0x58] sm:$0xff] %v956_v2  ;;  %v955_v10 = vmul.f32 %v1375_v39, %v1717_v35 }
 0x13d   : > { %v1379_v48 = vpop.eup %1378  ;;  %652 = vst [vmem:[%s1726_s28 + $0x50] sm:$0xff] %v636_v46  ;;  %v639_v22 = vmul.f32 %v1377_v56, %v1720_v42 }
 0x13e   : > { %v1381_v62 = vpop.eup %1380  ;;  %971 = vst [vmem:[%s1733_s29 + $0x50] sm:$0xff] %v955_v10  ;;  %v958_v14 = vmul.f32 %v1379_v48, %v1737_v57 }
 0x13f   : > { %v1383_v49 = vpop.eup %1382  ;;  %655 = vst [vmem:[%s1726_s28 + $0x68] sm:$0xff] %v639_v22  ;;  %v608_v24 = vadd.f32 1.0, %v1381_v62 }
 0x140   : > { %v1385_v20 = vpop.eup %1384  ;;  %974 = vst [vmem:[%s1733_s29 + $0x68] sm:$0xff] %v958_v14  ;;  %v927_v51 = vadd.f32 1.0, %v1383_v49 }
 0x141   : > { %v1387_v30 = vpop.eup %1386  ;;  %v638_v35 = vmul.f32 %v1385_v20, %v1746_v9  ;;  %1392 = vrcp.f32 %v608_v24 }
 0x142   : > { %v1389_v42 = vpop.eup %1388  ;;  %v957_v31 = vmul.f32 %v1387_v30, %v1757_v3  ;;  %1394 = vrcp.f32 %v927_v51 }
 0x143   : > { %654 = vst [vmem:[%s1726_s28 + $0x60] sm:$0xff] %v638_v35  ;;  %v641_v57 = vmul.f32 %v1389_v42, %v1760_v25 }
 0x144   : > { %973 = vst [vmem:[%s1733_s29 + $0x60] sm:$0xff] %v957_v31 }
 0x145   : > { %657 = vst [vmem:[%s1726_s28 + $0x78] sm:$0xff] %v641_v57 }
 0x147   : > { %v1391_v28 = vpop.eup %1390 }
 0x148   : > { %v960_v32 = vmul.f32 %v1391_v28, %v1776_v26 }
 0x14a   : > { %976 = vst [vmem:[%s1733_s29 + $0x78] sm:$0xff] %v960_v32 }
 0x14e   : > { %v1393_v33 = vpop.eup %1392 }
 0x14f   : > { %v1395_v50 = vpop.eup %1394  ;;  %v640_v9 = vmul.f32 %v1393_v33, %v1790_v47 }
 0x150   : > { %v959_v12 = vmul.f32 %v1395_v50, %v1793_v29 }
 0x151   : > { %656 = vst [vmem:[%s1726_s28 + $0x70] sm:$0xff] %v640_v9 }
 0x152   : > { %975 = vst [vmem:[%s1733_s29 + $0x70] sm:$0xff] %v959_v12 }
 0x153 PF: > { %s19_s27 = sadd.s32 1, %s1402_s27  }
 0x154   : > { %p16_p4 = scmp.ge.s32.totalorder %s19_s27, 6  }
 0x156   :  { %18 = sbr.rel (!%p16_p4) target bundleno = 1 (0x1), region = 90 }

// kernel: csp_stage_forward.5
= control target key start
LH: loop header
LB: loop body
LE: loop exit
PB: predicated region body
PF: predicated region fallthrough
CT: control target
= control target key end

     0   :  { %s5729_s24 = smov 0   ;;  %s7880_s0 = inlined_call_operand.vmem [shape: f32[2,16,16,128], index: 0, kind: input, shape index: {}, may-alias: {0,7}]   ;;  %s7881_s1 = inlined_call_operand.vmem [shape: f32[128,128], index: 1, kind: input, shape index: {}]   ;;  %s7882_s2 = inlined_call_operand.vmem [shape: f32[1,128], index: 2, kind: input, shape index: {}]   ;;  %s7883_s3 = inlined_call_operand.vmem [shape: f32[1,128], index: 3, kind: input, shape index: {}]   ;;  %s7884_s4 = inlined_call_operand.vmem [shape: f32[9,128,128], index: 4, kind: input, shape index: {}]   ;;  %s7885_s5 = inlined_call_operand.vmem [shape: f32[1,128], index: 5, kind: input, shape index: {}]   ;;  %s7886_s6 = inlined_call_operand.vmem [shape: f32[1,128], index: 6, kind: input, shape index: {}]   ;;  %s7887_s7 = inlined_call_operand.vmem [shape: f32[2,16,16,128], index: 7, kind: output, shape index: {}, may-alias: {0,7}]  }
   0x1 LB: > { %s3988_s25 = sadd.s32 4294967295, %s5686_s24   ;;  %p3992_p0 = scmp.ge.s32.totalorder %s5686_s24, 1  ;;  %s5686_s24 = sphi %s5729_s24, %s17_s24  }
   0x2   : > { %p237_p1 = scmp.lt.s32.totalorder %s5686_s24, 3 }
   0x4   : > { %p238_p2 = pnand %p3992_p0, %p237_p1 }
   0x6   : > { %241 = sbr.rel (%p238_p2) target bundleno = 848 (0x350), region = 48 }
   0xb   : > { %v326_v0 = vld [vmem:[%s7881_s1 + $0x78] sm:$0xff]  ;;  %v325_v1 = vld [vmem:[%s7881_s1 + $0x70] sm:$0xff]  ;;  %p269_p3 = scmp.lt.s32.totalorder %s3988_s25, 1  ;;  %v324_v2 = vld [vmem:[%s7881_s1 + $0x68] sm:$0xff] }
   0xc   : > { %4613 = vmatprep.subr.mxu0 %v326_v0  ;;  %v323_v3 = vld [vmem:[%s7881_s1 + $0x60] sm:$0xff]  ;;  %v322_v4 = vld [vmem:[%s7881_s1 + $0x58] sm:$0xff]  ;;  %v321_v6 = vld [vmem:[%s7881_s1 + $0x50] sm:$0xff] }
   0xd   : > { %4614 = vmatpush3.msra.mxu0 %v326_v0  ;;  %s8062_s25 = smov (!%p269_p3, %s3988_s25), 1  ;;  %v320_v7 = vld [vmem:[%s7881_s1 + $0x48] sm:$0xff]  ;;  %v319_v8 = vld [vmem:[%s7881_s1 + $0x40] sm:$0xff]  ;;  %v318_v9 = vld [vmem:[%s7881_s1 + $0x38] sm:$0xff] }
   0xe   : > { %4615 = vmatprep.subr.mxu0 %v325_v1  ;;  %s4131_s11 = sshll.u32 %s8062_s25, 8  ;;  %v317_v10 = vld [vmem:[%s7881_s1 + $0x30] sm:$0xff]  ;;  %v316_v11 = vld [vmem:[%s7881_s1 + $0x28] sm:$0xff]  ;;  %v315_v12 = vld [vmem:[%s7881_s1 + $0x20] sm:$0xff] }
   0xf   : > { %4616 = vmatpush3.msra.mxu0 %v325_v1  ;;  %s5757_s14 = scalar_lea.vmem %s7880_s0, %s4131_s11  ;;  %v314_v13 = vld [vmem:[%s7881_s1 + $0x18] sm:$0xff]  ;;  %v313_v14 = vld [vmem:[%s7881_s1 + $0x10] sm:$0xff]  ;;  %v312_v15 = vld [vmem:[%s7881_s1 + $0x8] sm:$0xff]  ;;  %s7696_s13 = scalar_lea.vmem %s7887_s7, %s4131_s11 }
  0x10   : > { %4617 = vmatprep.subr.mxu0 %v324_v2  ;;  %v5763_v5 = vld [vmem:[%s5757_s14] sm:$0xff]  ;;  %v280_v17 = vld [vmem:[%s5757_s14 + $0x8] sm:$0xff]  ;;  %v5801_v18 = vld [vmem:[%s5757_s14 + $0x10] sm:$0xff] }
  0x11   : > { %4618 = vmatpush3.msra.mxu0 %v324_v2  ;;  %7919 = vst [vmem:[#allocation3_spill] sm:$0xff] %v5763_v5  ;;  %4645 = vmatprep.mubr.f32.mxu0 %v5763_v5  ;;  %v311_v16 = vld [vmem:[%s7881_s1] sm:$0xff]  ;;  %7920 = vst [vmem:[#allocation4_spill] sm:$0xff] %v5801_v18  ;;  %v5805_v19 = vld [vmem:[%s5757_s14 + $0x18] sm:$0xff] }
  0x12   : > { %4619 = vmatprep.subr.mxu0 %v323_v3  ;;  %7921 = vst [vmem:[#allocation5_spill] sm:$0xff] %v5805_v19  ;;  %v5808_v20 = vld [vmem:[%s5757_s14 + $0x20] sm:$0xff]  ;;  %v5813_v21 = vld [vmem:[%s5757_s14 + $0x28] sm:$0xff]  ;;  %v5816_v22 = vld [vmem:[%s5757_s14 + $0x30] sm:$0xff] }
  0x13   : > { %4620 = vmatpush3.msra.mxu0 %v323_v3  ;;  %7922 = vst [vmem:[#allocation6_spill] sm:$0xff] %v5808_v20  ;;  %7923 = vst [vmem:[#allocation7_spill] sm:$0xff] %v5813_v21  ;;  %v5821_v23 = vld [vmem:[%s5757_s14 + $0x38] sm:$0xff]  ;;  %v5824_v24 = vld [vmem:[%s5757_s14 + $0x40] sm:$0xff] }
  0x14   : > { %4621 = vmatprep.subr.mxu0 %v322_v4  ;;  %7924 = vst [vmem:[#allocation8_spill] sm:$0xff] %v5816_v22  ;;  %7925 = vst [vmem:[#allocation9_spill] sm:$0xff] %v5821_v23  ;;  %v5829_v25 = vld [vmem:[%s5757_s14 + $0x48] sm:$0xff]  ;;  %v5832_v26 = vld [vmem:[%s5757_s14 + $0x50] sm:$0xff] }
  0x15   : > { %4622 = vmatpush3.msra.mxu0 %v322_v4  ;;  %7926 = vst [vmem:[#allocation10_spill] sm:$0xff] %v5824_v24  ;;  %7927 = vst [vmem:[#allocation11_spill] sm:$0xff] %v5829_v25  ;;  %v5837_v27 = vld [vmem:[%s5757_s14 + $0x58] sm:$0xff]  ;;  %v5840_v28 = vld [vmem:[%s5757_s14 + $0x60] sm:$0xff] }
  0x16   : > { %4623 = vmatprep.subr.mxu0 %v321_v6  ;;  %7928 = vst [vmem:[#allocation12_spill] sm:$0xff] %v5832_v26  ;;  %7929 = vst [vmem:[#allocation13_spill] sm:$0xff] %v5837_v27  ;;  %v5845_v29 = vld [vmem:[%s5757_s14 + $0x68] sm:$0xff]  ;;  %v5848_v30 = vld [vmem:[%s5757_s14 + $0x70] sm:$0xff] }
  0x17   : > { %4624 = vmatpush3.msra.mxu0 %v321_v6  ;;  %7930 = vst [vmem:[#allocation14_spill] sm:$0xff] %v5840_v28  ;;  %7931 = vst [vmem:[#allocation15_spill] sm:$0xff] %v5845_v29  ;;  %v5853_v31 = vld [vmem:[%s5757_s14 + $0x78] sm:$0xff]  ;;  %v5856_v32 = vld [vmem:[%s5757_s14 + $0x80] sm:$0xff] }
  0x18   : > { %4625 = vmatprep.subr.mxu0 %v320_v7  ;;  %7932 = vst [vmem:[#allocation16_spill] sm:$0xff] %v5848_v30  ;;  %7933 = vst [vmem:[#allocation17_spill] sm:$0xff] %v5853_v31  ;;  %v5861_v33 = vld [vmem:[%s5757_s14 + $0x88] sm:$0xff]  ;;  %v5864_v34 = vld [vmem:[%s5757_s14 + $0x90] sm:$0xff] }
  0x19   : > { %4626 = vmatpush3.msra.mxu0 %v320_v7  ;;  %7934 = vst [vmem:[#allocation18_spill] sm:$0xff] %v5856_v32  ;;  %7935 = vst [vmem:[#allocation19_spill] sm:$0xff] %v5861_v33  ;;  %v5869_v35 = vld [vmem:[%s5757_s14 + $0x98] sm:$0xff]  ;;  %v5872_v36 = vld [vmem:[%s5757_s14 + $0xa0] sm:$0xff]  ;;  %v5688_v7 = vmov 0.0  }
  0x1a   : > { %4627 = vmatprep.subr.mxu0 %v319_v8  ;;  %7936 = vst [vmem:[#allocation20_spill] sm:$0xff] %v5864_v34  ;;  %7937 = vst [vmem:[#allocation21_spill] sm:$0xff] %v5869_v35  ;;  %v5877_v37 = vld [vmem:[%s5757_s14 + $0xa8] sm:$0xff]  ;;  %v5880_v38 = vld [vmem:[%s5757_s14 + $0xb0] sm:$0xff] }
  0x1b   : > { %4628 = vmatpush3.msra.mxu0 %v319_v8  ;;  %7938 = vst [vmem:[#allocation22_spill] sm:$0xff] %v5872_v36  ;;  %7939 = vst [vmem:[#allocation23_spill] sm:$0xff] %v5877_v37  ;;  %v5885_v39 = vld [vmem:[%s5757_s14 + $0xb8] sm:$0xff]  ;;  %v5888_v40 = vld [vmem:[%s5757_s14 + $0xc0] sm:$0xff] }
  0x1c   : > { %4629 = vmatprep.subr.mxu0 %v318_v9  ;;  %7940 = vst [vmem:[#allocation24_spill] sm:$0xff] %v5880_v38  ;;  %7941 = vst [vmem:[#allocation25_spill] sm:$0xff] %v5885_v39  ;;  %v5893_v41 = vld [vmem:[%s5757_s14 + $0xc8] sm:$0xff]  ;;  %v5896_v42 = vld [vmem:[%s5757_s14 + $0xd0] sm:$0xff] }
  0x1d   : > { %4630 = vmatpush3.msra.mxu0 %v318_v9  ;;  %7942 = vst [vmem:[#allocation26_spill] sm:$0xff] %v5888_v40  ;;  %7943 = vst [vmem:[#allocation27_spill] sm:$0xff] %v5893_v41  ;;  %v5901_v43 = vld [vmem:[%s5757_s14 + $0xd8] sm:$0xff]  ;;  %v5904_v44 = vld [vmem:[%s5757_s14 + $0xe0] sm:$0xff] }
  0x1e   : > { %4631 = vmatprep.subr.mxu0 %v317_v10  ;;  %7944 = vst [vmem:[#allocation28_spill] sm:$0xff] %v5896_v42  ;;  %7945 = vst [vmem:[#allocation29_spill] sm:$0xff] %v5901_v43  ;;  %v5909_v45 = vld [vmem:[%s5757_s14 + $0xe8] sm:$0xff]  ;;  %v5912_v46 = vld [vmem:[%s5757_s14 + $0xf0] sm:$0xff] }
  0x1f   : > { %4632 = vmatpush3.msra.mxu0 %v317_v10  ;;  %7946 = vst [vmem:[#allocation30_spill] sm:$0xff] %v5904_v44  ;;  %7947 = vst [vmem:[#allocation31_spill] sm:$0xff] %v5909_v45  ;;  %v5917_v47 = vld [vmem:[%s5757_s14 + $0xf8] sm:$0xff]  ;;  %v4013_v50 = vld [vmem:[%s7884_s4 + $0xf0] sm:$0xff] }
  0x20   : > { %4633 = vmatprep.subr.mxu0 %v316_v11  ;;  %7948 = vst [vmem:[#allocation32_spill] sm:$0xff] %v5912_v46  ;;  %7949 = vst [vmem:[#allocation33_spill] sm:$0xff] %v5917_v47  ;;  %v4014_v48 = vld [vmem:[%s7884_s4 + $0xf8] sm:$0xff]  ;;  %v955_v51 = vld [vmem:[%s7884_s4 + $0x70] sm:$0xff] }
  0x21   : > { %4634 = vmatpush3.msra.mxu0 %v316_v11  ;;  %v956_v49 = vld [vmem:[%s7884_s4 + $0x78] sm:$0xff]  ;;  %4693 = vmatprep.subr.mxu1 %v4014_v48  ;;  %v4012_v52 = vld [vmem:[%s7884_s4 + $0xe8] sm:$0xff]  ;;  %v4011_v54 = vld [vmem:[%s7884_s4 + $0xe0] sm:$0xff]  ;;  %826 = vst [vmem:[#allocation2 + $0x20] sm:$0xff] %v5688_v7 }
  0x22   : > { %4635 = vmatprep.subr.mxu0 %v315_v12  ;;  %4694 = vmatpush3.msra.mxu1 %v4014_v48  ;;  %v954_v53 = vld [vmem:[%s7884_s4 + $0x68] sm:$0xff]  ;;  %v953_v55 = vld [vmem:[%s7884_s4 + $0x60] sm:$0xff]  ;;  %v4010_v56 = vld [vmem:[%s7884_s4 + $0xd8] sm:$0xff]  ;;  %827 = vst [vmem:[#allocation2 + $0x28] sm:$0x3] %v5688_v7 }
  0x23   : > { %4636 = vmatpush3.msra.mxu0 %v315_v12  ;;  %4695 = vmatprep.subr.mxu1 %v4013_v50  ;;  %v952_v57 = vld [vmem:[%s7884_s4 + $0x58] sm:$0xff]  ;;  %v4009_v58 = vld [vmem:[%s7884_s4 + $0xd0] sm:$0xff]  ;;  %v4008_v60 = vld [vmem:[%s7884_s4 + $0xc8] sm:$0xff]  ;;  %822 = vst [vmem:[#allocation2] sm:$0xff] %v5688_v7 }
  0x24   : > { %4637 = vmatprep.subr.mxu0 %v314_v13  ;;  %4696 = vmatpush3.msra.mxu1 %v4013_v50  ;;  %v951_v59 = vld [vmem:[%s7884_s4 + $0x50] sm:$0xff]  ;;  %v950_v61 = vld [vmem:[%s7884_s4 + $0x48] sm:$0xff]  ;;  %v4007_v62 = vld [vmem:[%s7884_s4 + $0xc0] sm:$0xff]  ;;  %823 = vst [vmem:[#allocation2 + $0x8] sm:$0xff] %v5688_v7 }
  0x25   : > { %4638 = vmatpush3.msra.mxu0 %v314_v13  ;;  %4697 = vmatprep.subr.mxu1 %v4012_v52  ;;  %v949_v63 = vld [vmem:[%s7884_s4 + $0x40] sm:$0xff]  ;;  %v4006_v0 = vld [vmem:[%s7884_s4 + $0xb8] sm:$0xff]  ;;  %v4005_v2 = vld [vmem:[%s7884_s4 + $0xb0] sm:$0xff]  ;;  %824 = vst [vmem:[#allocation2 + $0x10] sm:$0x3] %v5688_v7 }
  0x26   : > { %4639 = vmatprep.subr.mxu0 %v313_v14  ;;  %4698 = vmatpush3.msra.mxu1 %v4012_v52  ;;  %v948_v1 = vld [vmem:[%s7884_s4 + $0x38] sm:$0xff]  ;;  %v947_v3 = vld [vmem:[%s7884_s4 + $0x30] sm:$0xff]  ;;  %v4004_v4 = vld [vmem:[%s7884_s4 + $0xa8] sm:$0xff]  ;;  %825 = vst [vmem:[#allocation2 + $0x18] sm:$0xff] %v5688_v7 }
  0x27   : > { %4640 = vmatpush3.msra.mxu0 %v313_v14  ;;  %4699 = vmatprep.subr.mxu1 %v4011_v54  ;;  %v946_v6 = vld [vmem:[%s7884_s4 + $0x28] sm:$0xff]  ;;  %828 = vst [vmem:[#allocation2 + $0x30] sm:$0xff] %v5688_v7  ;;  %829 = vst [vmem:[#allocation2 + $0x38] sm:$0xff] %v5688_v7  ;;  %v4003_v8 = vld [vmem:[%s7884_s4 + $0xa0] sm:$0xff] }
  0x28   : > { %4641 = vmatprep.subr.mxu0 %v312_v15  ;;  %4700 = vmatpush3.msra.mxu1 %v4011_v54  ;;  %830 = vst [vmem:[#allocation2 + $0x40] sm:$0x3] %v5688_v7  ;;  %831 = vst [vmem:[#allocation2 + $0x48] sm:$0xff] %v5688_v7  ;;  %v945_v9 = vld [vmem:[%s7884_s4 + $0x20] sm:$0xff]  ;;  %v4002_v10 = vld [vmem:[%s7884_s4 + $0x98] sm:$0xff] }
  0x29   : > { %4642 = vmatpush3.msra.mxu0 %v312_v15  ;;  %4701 = vmatprep.subr.mxu1 %v4010_v56  ;;  %832 = vst [vmem:[#allocation2 + $0x50] sm:$0xff] %v5688_v7  ;;  %833 = vst [vmem:[#allocation2 + $0x58] sm:$0x3] %v5688_v7  ;;  %v944_v11 = vld [vmem:[%s7884_s4 + $0x18] sm:$0xff]  ;;  %v4001_v12 = vld [vmem:[%s7884_s4 + $0x90] sm:$0xff] }
  0x2a   : > { %4643 = vmatprep.subr.mxu0 %v311_v16  ;;  %4702 = vmatpush3.msra.mxu1 %v4010_v56  ;;  %834 = vst [vmem:[#allocation2 + $0x60] sm:$0xff] %v5688_v7  ;;  %835 = vst [vmem:[#allocation2 + $0x68] sm:$0xff] %v5688_v7  ;;  %v943_v13 = vld [vmem:[%s7884_s4 + $0x10] sm:$0xff]  ;;  %v4000_v14 = vld [vmem:[%s7884_s4 + $0x88] sm:$0xff] }
  0x2b   : > { %4644 = vmatpush3.msra.mxu0 %v311_v16  ;;  %4703 = vmatprep.subr.mxu1 %v4009_v58  ;;  %836 = vst [vmem:[#allocation2 + $0x70] sm:$0x3] %v5688_v7  ;;  %837 = vst [vmem:[#allocation2 + $0x78] sm:$0xff] %v5688_v7  ;;  %v942_v15 = vld [vmem:[%s7884_s4 + $0x8] sm:$0xff]  ;;  %v3999_v16 = vld [vmem:[%s7884_s4 + $0x80] sm:$0xff] }
  0x2c   : > { %4646 = vmatmul.mubr.f32.vlgmr.msra.gmra.mxu0 %v280_v17  ;;  %4773 = vmatprep.subr.mxu0 %v956_v49  ;;  %838 = vst [vmem:[#allocation2 + $0x80] sm:$0xff] %v5688_v7  ;;  %839 = vst [vmem:[#allocation2 + $0x88] sm:$0x3] %v5688_v7  ;;  %v941_v17 = vld [vmem:[%s7884_s4] sm:$0xff]  ;;  %v4030_v50 = vld [vmem:[%s7884_s4 + $0x178] sm:$0xff] }
  0x2d   : > { %4648 = vmatprep.mubr.f32.mxu0 %v5801_v18  ;;  %4774 = vmatpush3.msra.mxu0 %v956_v49  ;;  %840 = vst [vmem:[#allocation2 + $0x90] sm:$0xff] %v5688_v7  ;;  %841 = vst [vmem:[#allocation2 + $0x98] sm:$0xff] %v5688_v7  ;;  %v957_v48 = vld [vmem:[#allocation2 + $0x1] sm:$0xff]  ;;  %v958_v49 = vld [vmem:[#allocation2 + $0x9] sm:$0xff] }
  0x2e   : > { %4775 = vmatprep.subr.mxu0 %v955_v51  ;;  %4704 = vmatpush3.msra.mxu1 %v4009_v58  ;;  %842 = vst [vmem:[#allocation2 + $0xa0] sm:$0x3] %v5688_v7  ;;  %843 = vst [vmem:[#allocation2 + $0xa8] sm:$0xff] %v5688_v7  ;;  %v4028_v52 = vld [vmem:[%s7884_s4 + $0x168] sm:$0xff]  ;;  %v4026_v54 = vld [vmem:[%s7884_s4 + $0x158] sm:$0xff] }
  0x2f   : > { %4776 = vmatpush3.msra.mxu0 %v955_v51  ;;  %4705 = vmatprep.subr.mxu1 %v4008_v60  ;;  %844 = vst [vmem:[#allocation2 + $0xb0] sm:$0xff] %v5688_v7  ;;  %845 = vst [vmem:[#allocation2 + $0xb8] sm:$0x3] %v5688_v7  ;;  %v4029_v51 = vld [vmem:[%s7884_s4 + $0x170] sm:$0xff]  ;;  %v4024_v58 = vld [vmem:[%s7884_s4 + $0x148] sm:$0xff] }
  0x30   : > { %4649 = vmatmul.mubr.f32.gmra.mxu0 %v5805_v19  ;;  %4777 = vmatprep.subr.mxu0 %v954_v53  ;;  %846 = vst [vmem:[#allocation2 + $0xc0] sm:$0xff] %v5688_v7  ;;  %847 = vst [vmem:[#allocation2 + $0xc8] sm:$0xff] %v5688_v7  ;;  %v4025_v56 = vld [vmem:[%s7884_s4 + $0x150] sm:$0xff] }
  0x31   : > { %4651 = vmatprep.mubr.f32.mxu0 %v5808_v20  ;;  %4778 = vmatpush3.msra.mxu0 %v954_v53  ;;  %848 = vst [vmem:[#allocation2 + $0xd0] sm:$0x3] %v5688_v7  ;;  %849 = vst [vmem:[#allocation2 + $0xd8] sm:$0xff] %v5688_v7  ;;  %v4027_v53 = vld [vmem:[%s7884_s4 + $0x160] sm:$0xff] }
  0x32   : > { %4779 = vmatprep.subr.mxu0 %v953_v55  ;;  %4706 = vmatpush3.msra.mxu1 %v4008_v60  ;;  %850 = vst [vmem:[#allocation2 + $0xe0] sm:$0xff] %v5688_v7  ;;  %851 = vst [vmem:[#allocation2 + $0xe8] sm:$0x3] %v5688_v7  ;;  %v4023_v60 = vld [vmem:[%s7884_s4 + $0x140] sm:$0xff] }
  0x33   : > { %4780 = vmatpush3.msra.mxu0 %v953_v55  ;;  %4707 = vmatprep.subr.mxu1 %v4007_v62  ;;  %852 = vst [vmem:[#allocation2 + $0xf0] sm:$0xff] %v5688_v7  ;;  %853 = vst [vmem:[#allocation2 + $0xf8] sm:$0xff] %v5688_v7  ;;  %v4046_v55 = vld [vmem:[%s7884_s4 + $0x1f8] sm:$0xff] }
  0x34   : > { %4652 = vmatmul.mubr.f32.gmra.mxu0 %v5813_v21  ;;  %4781 = vmatprep.subr.mxu0 %v952_v57  ;;  %854 = vst [vmem:[#allocation2 + $0x100] sm:$0x3] %v5688_v7  ;;  %855 = vst [vmem:[#allocation2 + $0x108] sm:$0xff] %v5688_v7 }
  0x35   : > { %4654 = vmatprep.mubr.f32.mxu0 %v5816_v22  ;;  %4782 = vmatpush3.msra.mxu0 %v952_v57  ;;  %856 = vst [vmem:[#allocation2 + $0x110] sm:$0xff] %v5688_v7  ;;  %857 = vst [vmem:[#allocation2 + $0x118] sm:$0x3] %v5688_v7  ;;  %v4045_v57 = vld [vmem:[%s7884_s4 + $0x1f0] sm:$0xff] }
  0x36   : > { %4783 = vmatprep.subr.mxu0 %v951_v59  ;;  %4708 = vmatpush3.msra.mxu1 %v4007_v62  ;;  %858 = vst [vmem:[#allocation2 + $0x120] sm:$0xff] %v5688_v7  ;;  %859 = vst [vmem:[#allocation2 + $0x128] sm:$0xff] %v5688_v7  ;;  %v4022_v62 = vld [vmem:[%s7884_s4 + $0x138] sm:$0xff] }
  0x37   : > { %4784 = vmatpush3.msra.mxu0 %v951_v59  ;;  %4709 = vmatprep.subr.mxu1 %v4006_v0  ;;  %860 = vst [vmem:[#allocation2 + $0x130] sm:$0x3] %v5688_v7  ;;  %861 = vst [vmem:[#allocation2 + $0x138] sm:$0xff] %v5688_v7  ;;  %v4044_v59 = vld [vmem:[%s7884_s4 + $0x1e8] sm:$0xff] }
  0x38   : > { %4655 = vmatmul.mubr.f32.gmra.mxu0 %v5821_v23  ;;  %4785 = vmatprep.subr.mxu0 %v950_v61  ;;  %862 = vst [vmem:[#allocation2 + $0x140] sm:$0xff] %v5688_v7  ;;  %863 = vst [vmem:[#allocation2 + $0x148] sm:$0x3] %v5688_v7 }
  0x39   : > { %4657 = vmatprep.mubr.f32.mxu0 %v5824_v24  ;;  %4786 = vmatpush3.msra.mxu0 %v950_v61  ;;  %864 = vst [vmem:[#allocation2 + $0x150] sm:$0xff] %v5688_v7  ;;  %865 = vst [vmem:[#allocation2 + $0x158] sm:$0xff] %v5688_v7  ;;  %v4043_v61 = vld [vmem:[%s7884_s4 + $0x1e0] sm:$0xff] }
  0x3a   : > { %4787 = vmatprep.subr.mxu0 %v949_v63  ;;  %4710 = vmatpush3.msra.mxu1 %v4006_v0  ;;  %866 = vst [vmem:[#allocation2 + $0x160] sm:$0x3] %v5688_v7  ;;  %867 = vst [vmem:[#allocation2 + $0x168] sm:$0xff] %v5688_v7  ;;  %v4021_v0 = vld [vmem:[%s7884_s4 + $0x130] sm:$0xff] }
  0x3b   : > { %4788 = vmatpush3.msra.mxu0 %v949_v63  ;;  %4711 = vmatprep.subr.mxu1 %v4005_v2  ;;  %868 = vst [vmem:[#allocation2 + $0x170] sm:$0xff] %v5688_v7  ;;  %869 = vst [vmem:[#allocation2 + $0x178] sm:$0x3] %v5688_v7  ;;  %v4042_v63 = vld [vmem:[%s7884_s4 + $0x1d8] sm:$0xff] }
  0x3c   : > { %4658 = vmatmul.mubr.f32.gmra.mxu0 %v5829_v25  ;;  %4789 = vmatprep.subr.mxu0 %v948_v1  ;;  %870 = vst [vmem:[#allocation2 + $0x180] sm:$0xff] %v5688_v7  ;;  %871 = vst [vmem:[#allocation2 + $0x188] sm:$0xff] %v5688_v7 }
  0x3d   : > { %4660 = vmatprep.mubr.f32.mxu0 %v5832_v26  ;;  %4790 = vmatpush3.msra.mxu0 %v948_v1  ;;  %872 = vst [vmem:[#allocation2 + $0x190] sm:$0x3] %v5688_v7  ;;  %873 = vst [vmem:[#allocation2 + $0x198] sm:$0xff] %v5688_v7  ;;  %v4041_v1 = vld [vmem:[%s7884_s4 + $0x1d0] sm:$0xff] }
  0x3e   : > { %4791 = vmatprep.subr.mxu0 %v947_v3  ;;  %4712 = vmatpush3.msra.mxu1 %v4005_v2  ;;  %874 = vst [vmem:[#allocation2 + $0x1a0] sm:$0xff] %v5688_v7  ;;  %875 = vst [vmem:[#allocation2 + $0x1a8] sm:$0x3] %v5688_v7  ;;  %v4020_v2 = vld [vmem:[%s7884_s4 + $0x128] sm:$0xff] }
  0x3f   : > { %4792 = vmatpush3.msra.mxu0 %v947_v3  ;;  %4713 = vmatprep.subr.mxu1 %v4004_v4  ;;  %v4040_v3 = vld [vmem:[%s7884_s4 + $0x1c8] sm:$0xff] }
  0x40   : > { %4661 = vmatmul.mubr.f32.gmra.mxu0 %v5837_v27  ;;  %4793 = vmatprep.subr.mxu0 %v946_v6 }
  0x41   : > { %4663 = vmatprep.mubr.f32.mxu0 %v5840_v28  ;;  %4714 = vmatpush3.msra.mxu1 %v4004_v4  ;;  %v4019_v4 = vld [vmem:[%s7884_s4 + $0x120] sm:$0xff] }
  0x42   : > { %4794 = vmatpush3.msra.mxu0 %v946_v6  ;;  %4715 = vmatprep.subr.mxu1 %v4003_v8  ;;  %v4039_v6 = vld [vmem:[%s7884_s4 + $0x1c0] sm:$0xff] }
  0x43   : > { %4795 = vmatprep.subr.mxu0 %v945_v9  ;;  %4716 = vmatpush3.msra.mxu1 %v4003_v8  ;;  %v4038_v8 = vld [vmem:[%s7884_s4 + $0x1b8] sm:$0xff] }
  0x44   : > { %4664 = vmatmul.mubr.f32.gmra.mxu0 %v5845_v29  ;;  %4717 = vmatprep.subr.mxu1 %v4002_v10 }
  0x45   : > { %4666 = vmatprep.mubr.f32.mxu0 %v5848_v30  ;;  %4796 = vmatpush3.msra.mxu0 %v945_v9  ;;  %v4037_v9 = vld [vmem:[%s7884_s4 + $0x1b0] sm:$0xff] }
  0x46   : > { %4797 = vmatprep.subr.mxu0 %v944_v11  ;;  %4718 = vmatpush3.msra.mxu1 %v4002_v10  ;;  %v4017_v10 = vld [vmem:[%s7884_s4 + $0x110] sm:$0xff] }
  0x47   : > { %4798 = vmatpush3.msra.mxu0 %v944_v11  ;;  %4719 = vmatprep.subr.mxu1 %v4001_v12  ;;  %v4036_v11 = vld [vmem:[%s7884_s4 + $0x1a8] sm:$0xff] }
  0x48   : > { %4667 = vmatmul.mubr.f32.gmra.mxu0 %v5853_v31  ;;  %4799 = vmatprep.subr.mxu0 %v943_v13 }
  0x49   : > { %4669 = vmatprep.mubr.f32.mxu0 %v5856_v32  ;;  %4720 = vmatpush3.msra.mxu1 %v4001_v12  ;;  %v4016_v12 = vld [vmem:[%s7884_s4 + $0x108] sm:$0xff] }
  0x4a   : > { %4800 = vmatpush3.msra.mxu0 %v943_v13  ;;  %4721 = vmatprep.subr.mxu1 %v4000_v14  ;;  %v4035_v13 = vld [vmem:[%s7884_s4 + $0x1a0] sm:$0xff] }
  0x4b   : > { %4801 = vmatprep.subr.mxu0 %v942_v15  ;;  %4722 = vmatpush3.msra.mxu1 %v4000_v14  ;;  %v4015_v14 = vld [vmem:[%s7884_s4 + $0x100] sm:$0xff] }
  0x4c   : > { %4670 = vmatmul.mubr.f32.gmra.mxu0 %v5861_v33  ;;  %4723 = vmatprep.subr.mxu1 %v3999_v16 }
  0x4d   : > { %4672 = vmatprep.mubr.f32.mxu0 %v5864_v34  ;;  %4802 = vmatpush3.msra.mxu0 %v942_v15  ;;  %v4034_v15 = vld [vmem:[%s7884_s4 + $0x198] sm:$0xff] }
  0x4e   : > { %4803 = vmatprep.subr.mxu0 %v941_v17  ;;  %4724 = vmatpush3.msra.mxu1 %v3999_v16  ;;  %v4033_v16 = vld [vmem:[%s7884_s4 + $0x190] sm:$0xff] }
  0x4f   : > { %4725 = vmatprep.mubr.f32.mxu1 %v957_v48  ;;  %4804 = vmatpush3.msra.mxu0 %v941_v17  ;;  %v4032_v17 = vld [vmem:[%s7884_s4 + $0x188] sm:$0xff]  ;;  %v4031_v48 = vld [vmem:[%s7884_s4 + $0x180] sm:$0xff] }
  0x50   : > { %4673 = vmatmul.mubr.f32.gmra.mxu0 %v5869_v35  ;;  %4726 = vmatmul.mubr.f32.vlgmr.msra.gmra.mxu1 %v958_v49  ;;  %v6171_v49 = vld [vmem:[%s7884_s4 + $0x278] sm:$0xff] }
  0x51   : > { %4675 = vmatprep.mubr.f32.mxu0 %v5872_v36  ;;  %4853 = vmatprep.subr.mxu1 %v4030_v50 }
  0x52   : > { %4854 = vmatpush3.msra.mxu1 %v4030_v50  ;;  %4933 = vmatprep.subr.mxu0 %v4046_v55  ;;  %v6177_v50 = vld [vmem:[%s7882_s2] ss:$0 sm:$0xff] }
  0x53   : > { %4855 = vmatprep.subr.mxu1 %v4029_v51 }
  0x54   : > { %4676 = vmatmul.mubr.f32.gmra.mxu0 %v5877_v37  ;;  %4856 = vmatpush3.msra.mxu1 %v4029_v51  ;;  %v6182_v51 = vld [vmem:[%s7883_s3] ss:$0 sm:$0xff] }
  0x55   : > { %4678 = vmatprep.mubr.f32.mxu0 %v5880_v38  ;;  %4857 = vmatprep.subr.mxu1 %v4028_v52 }
  0x56   : > { %4858 = vmatpush3.msra.mxu1 %v4028_v52 }
  0x57   : > { %4859 = vmatprep.subr.mxu1 %v4027_v53 }
  0x58   : > { %4679 = vmatmul.mubr.f32.gmra.mxu0 %v5885_v39  ;;  %4860 = vmatpush3.msra.mxu1 %v4027_v53 }
  0x59   : > { %4681 = vmatprep.mubr.f32.mxu0 %v5888_v40  ;;  %4861 = vmatprep.subr.mxu1 %v4026_v54 }
  0x5a   : > { %4862 = vmatpush3.msra.mxu1 %v4026_v54 }
  0x5b   : > { %4863 = vmatprep.subr.mxu1 %v4025_v56 }
  0x5c   : > { %4682 = vmatmul.mubr.f32.gmra.mxu0 %v5893_v41  ;;  %4864 = vmatpush3.msra.mxu1 %v4025_v56 }
  0x5d   : > { %4684 = vmatprep.mubr.f32.mxu0 %v5896_v42  ;;  %4865 = vmatprep.subr.mxu1 %v4024_v58 }
  0x5e   : > { %4866 = vmatpush3.msra.mxu1 %v4024_v58 }
  0x5f   : > { %4867 = vmatprep.subr.mxu1 %v4023_v60 }
  0x60   : > { %4685 = vmatmul.mubr.f32.gmra.mxu0 %v5901_v43  ;;  %4868 = vmatpush3.msra.mxu1 %v4023_v60 }
  0x61   : > { %4687 = vmatprep.mubr.f32.mxu0 %v5904_v44  ;;  %4869 = vmatprep.subr.mxu1 %v4022_v62 }
  0x62   : > { %4870 = vmatpush3.msra.mxu1 %v4022_v62 }
  0x63   : > { %4871 = vmatprep.subr.mxu1 %v4021_v0 }
  0x64   : > { %4688 = vmatmul.mubr.f32.gmra.mxu0 %v5909_v45  ;;  %4872 = vmatpush3.msra.mxu1 %v4021_v0 }
  0x65   : > { %4690 = vmatprep.mubr.f32.mxu0 %v5912_v46  ;;  %4873 = vmatprep.subr.mxu1 %v4020_v2 }
  0x66   : > { %4874 = vmatpush3.msra.mxu1 %v4020_v2 }
  0x67   : > { %4875 = vmatprep.subr.mxu1 %v4019_v4 }
  0x68   : > { %4691 = vmatmul.mubr.f32.gmra.mxu0 %v5917_v47  ;;  %4876 = vmatpush3.msra.mxu1 %v4019_v4 }
  0x69   : > { %4805 = vmatprep.mubr.f32.mxu0 %v5688_v7 }
  0x6c   : > { %4806 = vmatmul.mubr.f32.vlgmr.msra.gmra.mxu0 %v5688_v7  ;;  %v4018_v7 = vld [vmem:[%s7884_s4 + $0x118] sm:$0xff] }
  0x6d   : > { %4934 = vmatpush3.msra.mxu0 %v4046_v55  ;;  %4877 = vmatprep.subr.mxu1 %v4018_v7 }
  0x6e   : > { %4935 = vmatprep.subr.mxu0 %v4045_v57  ;;  %4878 = vmatpush3.msra.mxu1 %v4018_v7 }
  0x6f   : > { %4936 = vmatpush3.msra.mxu0 %v4045_v57  ;;  %4879 = vmatprep.subr.mxu1 %v4017_v10 }
  0x70   : > { %4937 = vmatprep.subr.mxu0 %v4044_v59  ;;  %4880 = vmatpush3.msra.mxu1 %v4017_v10 }
  0x71   : > { %4938 = vmatpush3.msra.mxu0 %v4044_v59  ;;  %4881 = vmatprep.subr.mxu1 %v4016_v12 }
  0x72   : > { %4939 = vmatprep.subr.mxu0 %v4043_v61  ;;  %4882 = vmatpush3.msra.mxu1 %v4016_v12 }
  0x73   : > { %4940 = vmatpush3.msra.mxu0 %v4043_v61  ;;  %4883 = vmatprep.subr.mxu1 %v4015_v14 }
  0x74   : > { %4941 = vmatprep.subr.mxu0 %v4042_v63  ;;  %4884 = vmatpush3.msra.mxu1 %v4015_v14 }
  0x75   : > { %4942 = vmatpush3.msra.mxu0 %v4042_v63  ;;  %5013 = vmatprep.subr.mxu1 %v6171_v49 }
  0x76   : > { %4943 = vmatprep.subr.mxu0 %v4041_v1 }
  0x77   : > { %4944 = vmatpush3.msra.mxu0 %v4041_v1 }
  0x78   : > { %4945 = vmatprep.subr.mxu0 %v4040_v3 }
  0x79   : > { %4946 = vmatpush3.msra.mxu0 %v4040_v3 }
  0x7a   : > { %4947 = vmatprep.subr.mxu0 %v4039_v6 }
  0x7b   : > { %4948 = vmatpush3.msra.mxu0 %v4039_v6 }
  0x7c   : > { %4949 = vmatprep.subr.mxu0 %v4038_v8 }
  0x7d   : > { %4950 = vmatpush3.msra.mxu0 %v4038_v8 }
  0x7e   : > { %4951 = vmatprep.subr.mxu0 %v4037_v9 }
  0x7f   : > { %4952 = vmatpush3.msra.mxu0 %v4037_v9 }
  0x80   : > { %4953 = vmatprep.subr.mxu0 %v4036_v11 }
  0x81   : > { %4954 = vmatpush3.msra.mxu0 %v4036_v11 }
  0x82   : > { %4955 = vmatprep.subr.mxu0 %v4035_v13 }
  0x83   : > { %4956 = vmatpush3.msra.mxu0 %v4035_v13 }
  0x84   : > { %4957 = vmatprep.subr.mxu0 %v4034_v15 }
  0x85   : > { %4958 = vmatpush3.msra.mxu0 %v4034_v15 }
  0x86   : > { %4959 = vmatprep.subr.mxu0 %v4033_v16 }
  0x87   : > { %4960 = vmatpush3.msra.mxu0 %v4033_v16 }
  0x88   : > { %4961 = vmatprep.subr.mxu0 %v4032_v17 }
  0x89   : > { %4962 = vmatpush3.msra.mxu0 %v4032_v17 }
  0x8a   : > { %4963 = vmatprep.subr.mxu0 %v4031_v48 }
  0x8b   : > { %4964 = vmatpush3.msra.mxu0 %v4031_v48 }
  0xec   : > { %v4647_v52 = vpop.f32.mrf.mxu0 }
  0xed   : > { %v561_v53 = vmul.f32 %v4647_v52, %v6177_v50 }
  0xee   : > { %v395_v54 = vpop.f32.mrf.mxu0 }
  0xef   : > { %v6186_v55 = vadd.f32 %v6182_v51, %v561_v53  ;;  %v560_v56 = vmul.f32 %v6177_v50, %v395_v54 }
  0xf0   : > { %v4650_v57 = vpop.f32.mrf.mxu0 }
  0xf1   : > { %v631_v58 = vsub.f32 0.0, %v6186_v55  ;;  %v6191_v59 = vadd.f32 %v6182_v51, %v560_v56  ;;  %v563_v60 = vmul.f32 %v4650_v57, %v6177_v50 }
  0xf2   : > { %v405_v61 = vpop.f32.mrf.mxu0 }
  0xf3   : > { %v664_v62 = vmul.f32 1.442695, %v631_v58  ;;  %v630_v63 = vsub.f32 0.0, %v6191_v59  ;;  %v6196_v0 = vadd.f32 %v6182_v51, %v563_v60  ;;  %v562_v1 = vmul.f32 %v6177_v50, %v405_v61 }
  0xf4   : > { %v4653_v2 = vpop.f32.mrf.mxu0 }
  0xf5   : > { %5422 = vpow2.f32 %v664_v62  ;;  %v662_v3 = vmul.f32 1.442695, %v630_v63  ;;  %v633_v4 = vsub.f32 0.0, %v6196_v0  ;;  %v6201_v6 = vadd.f32 %v6182_v51, %v562_v1  ;;  %v6227_v1 = vld [vmem:[%s7884_s4 + $0x2f8] sm:$0xff] }
  0xf6   : > { %v565_v7 = vmul.f32 %v4653_v2, %v6177_v50  ;;  %v415_v8 = vpop.f32.mrf.mxu0  ;;  %5093 = vmatprep.subr.mxu0 %v6227_v1 }
  0xf7   : > { %5424 = vpow2.f32 %v662_v3  ;;  %v668_v9 = vmul.f32 1.442695, %v633_v4  ;;  %v632_v10 = vsub.f32 0.0, %v6201_v6  ;;  %v564_v11 = vmul.f32 %v6177_v50, %v415_v8 }
  0xf8   : > { %v6207_v12 = vadd.f32 %v6182_v51, %v565_v7  ;;  %v4656_v13 = vpop.f32.mrf.mxu0 }
  0xf9   : > { %5426 = vpow2.f32 %v668_v9  ;;  %v666_v14 = vmul.f32 1.442695, %v632_v10  ;;  %v6210_v15 = vadd.f32 %v6182_v51, %v564_v11  ;;  %v567_v16 = vmul.f32 %v4656_v13, %v6177_v50 }
  0xfa   : > { %v635_v17 = vsub.f32 0.0, %v6207_v12  ;;  %v425_v48 = vpop.f32.mrf.mxu0 }
  0xfb   : > { %5428 = vpow2.f32 %v666_v14  ;;  %v634_v52 = vsub.f32 0.0, %v6210_v15  ;;  %v6216_v53 = vadd.f32 %v6182_v51, %v567_v16  ;;  %v566_v54 = vmul.f32 %v6177_v50, %v425_v48 }
  0xfc   : > { %v672_v56 = vmul.f32 1.442695, %v635_v17  ;;  %v4659_v57 = vpop.f32.mrf.mxu0 }
  0xfd   : > { %v670_v58 = vmul.f32 1.442695, %v634_v52  ;;  %v637_v60 = vsub.f32 0.0, %v6216_v53  ;;  %v6221_v61 = vadd.f32 %v6182_v51, %v566_v54  ;;  %v569_v62 = vmul.f32 %v4659_v57, %v6177_v50 }
  0xfe   : > { %5430 = vpow2.f32 %v672_v56  ;;  %v435_v63 = vpop.f32.mrf.mxu0 }
  0xff   : > { %5432 = vpow2.f32 %v670_v58  ;;  %v676_v2 = vmul.f32 1.442695, %v637_v60  ;;  %v636_v3 = vsub.f32 0.0, %v6221_v61  ;;  %v6231_v4 = vadd.f32 %v6182_v51, %v569_v62 }
 0x100   : > { %v568_v7 = vmul.f32 %v6177_v50, %v435_v63  ;;  %v4662_v8 = vpop.f32.mrf.mxu0 }
 0x101   : > { %5434 = vpow2.f32 %v676_v2  ;;  %v674_v9 = vmul.f32 1.442695, %v636_v3  ;;  %v639_v10 = vsub.f32 0.0, %v6231_v4  ;;  %v571_v11 = vmul.f32 %v4662_v8, %v6177_v50 }
 0x102   : > { %v5423_v13 = vpop.eup %5422  ;;  %v6238_v14 = vadd.f32 %v6182_v51, %v568_v7  ;;  %v445_v16 = vpop.f32.mrf.mxu0 }
 0x103   : > { %v727_v17 = vadd.f32 1.0, %v5423_v13  ;;  %5436 = vpow2.f32 %v674_v9  ;;  %v680_v48 = vmul.f32 1.442695, %v639_v10  ;;  %v6241_v52 = vadd.f32 %v6182_v51, %v571_v11 }
 0x104   : > { %v5425_v54 = vpop.eup %5424  ;;  %v638_v56 = vsub.f32 0.0, %v6238_v14  ;;  %v570_v57 = vmul.f32 %v6177_v50, %v445_v16  ;;  %v4665_v58 = vpop.f32.mrf.mxu0 }
 0x105   : > { %5438 = vrcp.f32 %v727_v17  ;;  %v726_v60 = vadd.f32 1.0, %v5425_v54  ;;  %v641_v62 = vsub.f32 0.0, %v6241_v52  ;;  %v573_v63 = vmul.f32 %v4665_v58, %v6177_v50 }
 0x106   : > { %v5427_v2 = vpop.eup %5426  ;;  %5440 = vpow2.f32 %v680_v48  ;;  %v678_v3 = vmul.f32 1.442695, %v638_v56  ;;  %v6248_v7 = vadd.f32 %v6182_v51, %v570_v57  ;;  %v455_v8 = vpop.f32.mrf.mxu0 }
 0x107   : > { %5442 = vrcp.f32 %v726_v60  ;;  %v729_v9 = vadd.f32 1.0, %v5427_v2  ;;  %v684_v10 = vmul.f32 1.442695, %v641_v62  ;;  %v6251_v11 = vadd.f32 %v6182_v51, %v573_v63 }
 0x108   : > { %v5429_v13 = vpop.eup %5428  ;;  %5444 = vpow2.f32 %v678_v3  ;;  %v640_v16 = vsub.f32 0.0, %v6248_v7  ;;  %v572_v17 = vmul.f32 %v6177_v50, %v455_v8  ;;  %v4668_v54 = vpop.f32.mrf.mxu0 }
 0x109   : > { %5446 = vrcp.f32 %v729_v9  ;;  %v728_v48 = vadd.f32 1.0, %v5429_v13  ;;  %v643_v56 = vsub.f32 0.0, %v6251_v11  ;;  %v575_v57 = vmul.f32 %v4668_v54, %v6177_v50 }
 0x10a   : > { %5448 = vpow2.f32 %v684_v10  ;;  %v682_v58 = vmul.f32 1.442695, %v640_v16  ;;  %v6258_v60 = vadd.f32 %v6182_v51, %v572_v17  ;;  %v465_v62 = vpop.f32.mrf.mxu0 }
 0x10b   : > { %v5431_v63 = vpop.eup %5430  ;;  %5450 = vrcp.f32 %v728_v48  ;;  %v688_v2 = vmul.f32 1.442695, %v643_v56  ;;  %v6261_v3 = vadd.f32 %v6182_v51, %v575_v57  ;;  %v574_v8 = vmul.f32 %v6177_v50, %v465_v62 }
 0x10c   : > { %v5433_v9 = vpop.eup %5432  ;;  %v731_v13 = vadd.f32 1.0, %v5431_v63  ;;  %5452 = vpow2.f32 %v682_v58  ;;  %v642_v46 = vsub.f32 0.0, %v6258_v60  ;;  %v4671_v54 = vpop.f32.mrf.mxu0 }
 0x10d   : > { %v730_v10 = vadd.f32 1.0, %v5433_v9  ;;  %5454 = vpow2.f32 %v688_v2  ;;  %v645_v16 = vsub.f32 0.0, %v6261_v3  ;;  %v6267_v17 = vadd.f32 %v6182_v51, %v574_v8 }
 0x10e   : > { %v5435_v48 = vpop.eup %5434  ;;  %5456 = vrcp.f32 %v731_v13  ;;  %v686_v56 = vmul.f32 1.442695, %v642_v46  ;;  %v577_v57 = vmul.f32 %v4671_v54, %v6177_v50  ;;  %v475_v47 = vpop.f32.mrf.mxu0 }
 0x10f   : > { %5458 = vrcp.f32 %v730_v10  ;;  %v733_v62 = vadd.f32 1.0, %v5435_v48  ;;  %v692_v63 = vmul.f32 1.442695, %v645_v16  ;;  %v644_v58 = vsub.f32 0.0, %v6267_v17 }
 0x110   : > { %v5437_v44 = vpop.eup %5436  ;;  %5460 = vpow2.f32 %v686_v56  ;;  %v6272_v2 = vadd.f32 %v6182_v51, %v577_v57  ;;  %v576_v9 = vmul.f32 %v6177_v50, %v475_v47  ;;  %v4674_v8 = vpop.f32.mrf.mxu0 }
 0x111   : > { %5462 = vrcp.f32 %v733_v62  ;;  %v732_v45 = vadd.f32 1.0, %v5437_v44  ;;  %v690_v13 = vmul.f32 1.442695, %v644_v58  ;;  %v579_v46 = vmul.f32 %v4674_v8, %v6177_v50 }
 0x112   : > { %v5439_v54 = vpop.eup %5438  ;;  %5464 = vpow2.f32 %v692_v63  ;;  %v647_v10 = vsub.f32 0.0, %v6272_v2  ;;  %v6278_v16 = vadd.f32 %v6182_v51, %v576_v9  ;;  %v485_v48 = vpop.f32.mrf.mxu0 }
 0x113   : > { %v5441_v56 = vpop.eup %5440  ;;  %v791_v57 = vmul.f32 %v5439_v54, %v6186_v55  ;;  %5466 = vrcp.f32 %v732_v45  ;;  %v6282_v47 = vadd.f32 %v6182_v51, %v579_v46  ;;  %v578_v44 = vmul.f32 %v6177_v50, %v485_v48 }
 0x114   : > { %v5443_v62 = vpop.eup %5442  ;;  %v735_v58 = vadd.f32 1.0, %v5441_v56  ;;  %5468 = vpow2.f32 %v690_v13  ;;  %v696_v8 = vmul.f32 1.442695, %v647_v10  ;;  %v646_v63 = vsub.f32 0.0, %v6278_v16  ;;  %v4677_v42 = vpop.f32.mrf.mxu0 }
 0x115   : > { %v5445_v43 = vpop.eup %5444  ;;  %878 = vst [vmem:[#allocation2 + $0x21] sm:$0xff] %v791_v57  ;;  %v790_v9 = vmul.f32 %v5443_v62, %v6191_v59  ;;  %v649_v40 = vsub.f32 0.0, %v6282_v47  ;;  %v6289_v45 = vadd.f32 %v6182_v51, %v578_v44  ;;  %v581_v55 = vmul.f32 %v4677_v42, %v6177_v50 }
 0x116   : > { %v5447_v46 = vpop.eup %5446  ;;  %5470 = vrcp.f32 %v735_v58  ;;  %v734_v54 = vadd.f32 1.0, %v5445_v43  ;;  %v694_v48 = vmul.f32 1.442695, %v646_v63  ;;  %v495_v13 = vpop.f32.mrf.mxu0 }
 0x117   : > { %v5449_v10 = vpop.eup %5448  ;;  %877 = vst [vmem:[#allocation2 + $0x19] sm:$0xff] %v790_v9  ;;  %v793_v56 = vmul.f32 %v5447_v46, %v6196_v0  ;;  %5472 = vpow2.f32 %v696_v8  ;;  %v700_v41 = vmul.f32 1.442695, %v649_v40  ;;  %v648_v59 = vsub.f32 0.0, %v6289_v45  ;;  %4728 = vmatprep.mubr.f32.mxu1 %v790_v9 }
 0x118   : > { %v5451_v62 = vpop.eup %5450  ;;  %5474 = vrcp.f32 %v734_v54  ;;  %v737_v44 = vadd.f32 1.0, %v5449_v10  ;;  %v6295_v38 = vadd.f32 %v6182_v51, %v581_v55  ;;  %v580_v42 = vmul.f32 %v6177_v50, %v495_v13  ;;  %v4680_v43 = vpop.f32.mrf.mxu0  ;;  %4729 = vmatmul.mubr.f32.gmra.mxu1 %v791_v57 }
 0x119   : > { %v5453_v58 = vpop.eup %5452  ;;  %880 = vst [vmem:[#allocation2 + $0x39] sm:$0xff] %v793_v56  ;;  %v792_v63 = vmul.f32 %v5451_v62, %v6201_v6  ;;  %5476 = vpow2.f32 %v694_v48  ;;  %v698_v0 = vmul.f32 1.442695, %v648_v59  ;;  %v583_v40 = vmul.f32 %v4680_v43, %v6177_v50 }
 0x11a   : > { %v5455_v8 = vpop.eup %5454  ;;  %5478 = vrcp.f32 %v737_v44  ;;  %v736_v9 = vadd.f32 1.0, %v5453_v58  ;;  %v651_v46 = vsub.f32 0.0, %v6295_v38  ;;  %v6302_v55 = vadd.f32 %v6182_v51, %v580_v42  ;;  %v505_v54 = vpop.f32.mrf.mxu0 }
 0x11b   : > { %v5457_v13 = vpop.eup %5456  ;;  %879 = vst [vmem:[#allocation2 + $0x31] sm:$0xff] %v792_v63  ;;  %v739_v57 = vadd.f32 1.0, %v5455_v8  ;;  %5480 = vpow2.f32 %v700_v41  ;;  %v6305_v10 = vadd.f32 %v6182_v51, %v583_v40  ;;  %v582_v6 = vmul.f32 %v6177_v50, %v505_v54  ;;  %4731 = vmatprep.mubr.f32.mxu1 %v792_v63 }
 0x11c   : > { %v5459_v48 = vpop.eup %5458  ;;  %v795_v59 = vmul.f32 %v5457_v13, %v6207_v12  ;;  %5482 = vrcp.f32 %v736_v9  ;;  %v704_v62 = vmul.f32 1.442695, %v651_v46  ;;  %v650_v44 = vsub.f32 0.0, %v6302_v55  ;;  %v4683_v42 = vpop.f32.mrf.mxu0  ;;  %4732 = vmatmul.mubr.f32.gmra.mxu1 %v793_v56 }
 0x11d   : > { %v5461_v43 = vpop.eup %5460  ;;  %v794_v58 = vmul.f32 %v5459_v48, %v6210_v15  ;;  %5484 = vrcp.f32 %v739_v57  ;;  %v653_v41 = vsub.f32 0.0, %v6305_v10  ;;  %v6313_v40 = vadd.f32 %v6182_v51, %v582_v6 }
 0x11e   : > { %v5463_v8 = vpop.eup %5462  ;;  %882 = vst [vmem:[#allocation2 + $0x51] sm:$0xff] %v795_v59  ;;  %v738_v63 = vadd.f32 1.0, %v5461_v43  ;;  %5486 = vpow2.f32 %v698_v0  ;;  %v702_v12 = vmul.f32 1.442695, %v650_v44  ;;  %v585_v9 = vmul.f32 %v4683_v42, %v6177_v50  ;;  %v515_v46 = vpop.f32.mrf.mxu0  ;;  %v6316_v54 = vld [vmem:[#allocation2 + $0x18] sm:$0xff]  ;;  %v6318_v56 = vld [vmem:[#allocation2 + $0x20] sm:$0xff] }
 0x11f   : > { %v5465_v13 = vpop.eup %5464  ;;  %881 = vst [vmem:[#allocation2 + $0x49] sm:$0xff] %v794_v58  ;;  %v797_v15 = vmul.f32 %v5463_v8, %v6216_v53  ;;  %5488 = vpow2.f32 %v704_v62  ;;  %v708_v57 = vmul.f32 1.442695, %v653_v41  ;;  %v652_v6 = vsub.f32 0.0, %v6313_v40  ;;  %4808 = vmatprep.mubr.f32.mxu0 %v6316_v54  ;;  %4734 = vmatprep.mubr.f32.mxu1 %v794_v58 }
 0x120   : > { %v5467_v0 = vpop.eup %5466  ;;  %5490 = vrcp.f32 %v738_v63  ;;  %v741_v48 = vadd.f32 1.0, %v5465_v13  ;;  %v6324_v44 = vadd.f32 %v6182_v51, %v585_v9  ;;  %v584_v42 = vmul.f32 %v6177_v50, %v515_v46  ;;  %v4686_v43 = vpop.f32.mrf.mxu0  ;;  %4809 = vmatmul.mubr.f32.gmra.mxu0 %v6318_v56  ;;  %4735 = vmatmul.mubr.f32.gmra.mxu1 %v795_v59 }
 0x121   : > { %v5469_v53 = vpop.eup %5468  ;;  %884 = vst [vmem:[#allocation2 + $0x69] sm:$0xff] %v797_v15  ;;  %v796_v62 = vmul.f32 %v5467_v0, %v6221_v61  ;;  %5492 = vpow2.f32 %v702_v12  ;;  %v706_v41 = vmul.f32 1.442695, %v652_v6  ;;  %v587_v58 = vmul.f32 %v4686_v43, %v6177_v50 }
 0x122   : > { %5494 = vrcp.f32 %v741_v48  ;;  %v740_v8 = vadd.f32 1.0, %v5469_v53  ;;  %v655_v63 = vsub.f32 0.0, %v6324_v44  ;;  %v6332_v9 = vadd.f32 %v6182_v51, %v584_v42  ;;  %v525_v46 = vpop.f32.mrf.mxu0  ;;  %v6334_v13 = vld [vmem:[#allocation2 + $0x30] sm:$0xff]  ;;  %v6336_v39 = vld [vmem:[#allocation2 + $0x38] sm:$0xff] }
 0x123   : > { %v5471_v59 = vpop.eup %5470  ;;  %883 = vst [vmem:[#allocation2 + $0x61] sm:$0xff] %v796_v62  ;;  %5496 = vpow2.f32 %v708_v57  ;;  %v6339_v61 = vadd.f32 %v6182_v51, %v587_v58  ;;  %v586_v12 = vmul.f32 %v6177_v50, %v525_v46  ;;  %4811 = vmatprep.mubr.f32.mxu0 %v6334_v13  ;;  %4737 = vmatprep.mubr.f32.mxu1 %v796_v62 }
 0x124   : > { %v5473_v6 = vpop.eup %5472  ;;  %v799_v0 = vmul.f32 %v5471_v59, %v6231_v4  ;;  %5498 = vrcp.f32 %v740_v8  ;;  %v712_v48 = vmul.f32 1.442695, %v655_v63  ;;  %v654_v42 = vsub.f32 0.0, %v6332_v9  ;;  %v4689_v43 = vpop.f32.mrf.mxu0  ;;  %4812 = vmatmul.mubr.f32.gmra.mxu0 %v6336_v39  ;;  %4738 = vmatmul.mubr.f32.gmra.mxu1 %v797_v15 }
 0x125   : > { %v5475_v57 = vpop.eup %5474  ;;  %v743_v53 = vadd.f32 1.0, %v5473_v6  ;;  %5500 = vpow2.f32 %v706_v41  ;;  %v657_v58 = vsub.f32 0.0, %v6339_v61  ;;  %v6348_v46 = vadd.f32 %v6182_v51, %v586_v12 }
 0x126   : > { %v5477_v62 = vpop.eup %5476  ;;  %886 = vst [vmem:[#allocation2 + $0x81] sm:$0xff] %v799_v0  ;;  %v798_v4 = vmul.f32 %v5475_v57, %v6238_v14  ;;  %5502 = vpow2.f32 %v712_v48  ;;  %v710_v8 = vmul.f32 1.442695, %v654_v42  ;;  %v589_v63 = vmul.f32 %v4689_v43, %v6177_v50  ;;  %v535_v59 = vpop.f32.mrf.mxu0  ;;  %v6352_v36 = vld [vmem:[#allocation2 + $0x48] sm:$0xff]  ;;  %v6354_v15 = vld [vmem:[#allocation2 + $0x50] sm:$0xff] }
 0x127   : > { %v5479_v6 = vpop.eup %5478  ;;  %5504 = vrcp.f32 %v743_v53  ;;  %v742_v41 = vadd.f32 1.0, %v5477_v62  ;;  %v716_v37 = vmul.f32 1.442695, %v657_v58  ;;  %v656_v12 = vsub.f32 0.0, %v6348_v46  ;;  %4814 = vmatprep.mubr.f32.mxu0 %v6352_v36 }
 0x128   : > { %v5481_v34 = vpop.eup %5480  ;;  %885 = vst [vmem:[#allocation2 + $0x79] sm:$0xff] %v798_v4  ;;  %v801_v14 = vmul.f32 %v5479_v6, %v6241_v52  ;;  %5506 = vpow2.f32 %v710_v8  ;;  %v6360_v48 = vadd.f32 %v6182_v51, %v589_v63  ;;  %v588_v42 = vmul.f32 %v6177_v50, %v535_v59  ;;  %4815 = vmatmul.mubr.f32.gmra.mxu0 %v6354_v15  ;;  %v4692_v43 = vpop.f32.mrf.mxu0 }
 0x129   : > { %4740 = vmatprep.mubr.f32.mxu1 %v798_v4  ;;  %v5483_v57 = vpop.eup %5482  ;;  %5508 = vrcp.f32 %v742_v41  ;;  %v745_v53 = vadd.f32 1.0, %v5481_v34  ;;  %v714_v58 = vmul.f32 1.442695, %v656_v12  ;;  %v591_v62 = vmul.f32 %v4692_v43, %v6177_v50 }
 0x12a   : > { %4741 = vmatmul.mubr.f32.gmra.mxu1 %v799_v0  ;;  %v5485_v35 = vpop.eup %5484  ;;  %888 = vst [vmem:[#allocation2 + $0x99] sm:$0xff] %v801_v14  ;;  %v800_v52 = vmul.f32 %v5483_v57, %v6248_v7  ;;  %5510 = vpow2.f32 %v716_v37  ;;  %v659_v8 = vsub.f32 0.0, %v6360_v48  ;;  %v6368_v63 = vadd.f32 %v6182_v51, %v588_v42  ;;  %v6370_v59 = vld [vmem:[#allocation2 + $0x60] sm:$0xff]  ;;  %v6372_v4 = vld [vmem:[#allocation2 + $0x68] sm:$0xff]  ;;  %v545_v6 = vpop.f32.mrf.mxu0 }
 0x12b   : > { %v5487_v34 = vpop.eup %5486  ;;  %v803_v0 = vmul.f32 %v5485_v35, %v6251_v11  ;;  %5512 = vrcp.f32 %v745_v53  ;;  %4817 = vmatprep.mubr.f32.mxu0 %v6370_v59  ;;  %v6377_v41 = vadd.f32 %v6182_v51, %v591_v62  ;;  %v590_v37 = vmul.f32 %v6177_v50, %v545_v6 }
 0x12c   : > { %v5489_v7 = vpop.eup %5488  ;;  %887 = vst [vmem:[#allocation2 + $0x91] sm:$0xff] %v800_v52  ;;  %v744_v12 = vadd.f32 1.0, %v5487_v34  ;;  %5514 = vpow2.f32 %v714_v58  ;;  %v720_v42 = vmul.f32 1.442695, %v659_v8  ;;  %v658_v43 = vsub.f32 0.0, %v6368_v63  ;;  %4818 = vmatmul.mubr.f32.gmra.mxu0 %v6372_v4  ;;  %4743 = vmatprep.mubr.f32.mxu1 %v800_v52 }
 0x12d   : > { %v5491_v57 = vpop.eup %5490  ;;  %890 = vst [vmem:[#allocation2 + $0xb1] sm:$0xff] %v803_v0  ;;  %v747_v35 = vadd.f32 1.0, %v5489_v7  ;;  %v661_v11 = vsub.f32 0.0, %v6377_v41  ;;  %v6384_v53 = vadd.f32 %v6182_v51, %v590_v37 }
 0x12e   : > { %4744 = vmatmul.mubr.f32.gmra.mxu1 %v801_v14  ;;  %v5493_v50 = vpop.eup %5492  ;;  %v802_v62 = vmul.f32 %v5491_v57, %v6258_v60  ;;  %5516 = vrcp.f32 %v744_v12  ;;  %v718_v58 = vmul.f32 1.442695, %v658_v43 }
 0x12f   : > { %v5495_v8 = vpop.eup %5494  ;;  %5518 = vrcp.f32 %v747_v35  ;;  %v746_v6 = vadd.f32 1.0, %v5493_v50  ;;  %v6387_v34 = vld [vmem:[#allocation2 + $0x78] sm:$0xff]  ;;  %v6389_v52 = vld [vmem:[#allocation2 + $0x80] sm:$0xff]  ;;  %v660_v7 = vsub.f32 0.0, %v6384_v53  ;;  %v724_v51 = vmul.f32 1.442695, %v661_v11 }
 0x130   : > { %v5497_v14 = vpop.eup %5496  ;;  %889 = vst [vmem:[#allocation2 + $0xa9] sm:$0xff] %v802_v62  ;;  %v805_v32 = vmul.f32 %v5495_v8, %v6261_v3  ;;  %5520 = vpow2.f32 %v720_v42  ;;  %4820 = vmatprep.mubr.f32.mxu0 %v6387_v34  ;;  %4746 = vmatprep.mubr.f32.mxu1 %v802_v62 }
 0x131   : > { %v5499_v60 = vpop.eup %5498  ;;  %5522 = vrcp.f32 %v746_v6  ;;  %v749_v37 = vadd.f32 1.0, %v5497_v14  ;;  %4821 = vmatmul.mubr.f32.gmra.mxu0 %v6389_v52  ;;  %v722_v50 = vmul.f32 1.442695, %v660_v7 }
 0x132   : > { %4747 = vmatmul.mubr.f32.gmra.mxu1 %v803_v0  ;;  %v5501_v12 = vpop.eup %5500  ;;  %892 = vst [vmem:[#allocation2 + $0xc9] sm:$0xff] %v805_v32  ;;  %v804_v43 = vmul.f32 %v5499_v60, %v6267_v17  ;;  %5524 = vpow2.f32 %v718_v58 }
 0x133   : > { %v5503_v57 = vpop.eup %5502  ;;  %5526 = vrcp.f32 %v749_v37  ;;  %v748_v35 = vadd.f32 1.0, %v5501_v12  ;;  %v6396_v3 = vld [vmem:[#allocation2 + $0x90] sm:$0xff]  ;;  %v6398_v42 = vld [vmem:[#allocation2 + $0x98] sm:$0xff] }
 0x134   : > { %v5505_v11 = vpop.eup %5504  ;;  %891 = vst [vmem:[#allocation2 + $0xc1] sm:$0xff] %v804_v43  ;;  %v751_v62 = vadd.f32 1.0, %v5503_v57  ;;  %4823 = vmatprep.mubr.f32.mxu0 %v6396_v3  ;;  %4749 = vmatprep.mubr.f32.mxu1 %v804_v43  ;;  %5528 = vpow2.f32 %v724_v51 }
 0x135   : > { %v5507_v0 = vpop.eup %5506  ;;  %v807_v8 = vmul.f32 %v5505_v11, %v6272_v2  ;;  %5530 = vrcp.f32 %v748_v35  ;;  %4824 = vmatmul.mubr.f32.gmra.mxu0 %v6398_v42 }
 0x136   : > { %4750 = vmatmul.mubr.f32.gmra.mxu1 %v805_v32  ;;  %v5509_v17 = vpop.eup %5508  ;;  %5532 = vrcp.f32 %v751_v62  ;;  %v750_v58 = vadd.f32 1.0, %v5507_v0 }
 0x137   : > { %v5511_v6 = vpop.eup %5510  ;;  %894 = vst [vmem:[#allocation2 + $0xe1] sm:$0xff] %v807_v8  ;;  %v806_v7 = vmul.f32 %v5509_v17, %v6278_v16  ;;  %v6404_v14 = vld [vmem:[#allocation2 + $0xa8] sm:$0xff]  ;;  %v6406_v60 = vld [vmem:[#allocation2 + $0xb0] sm:$0xff]  ;;  %5534 = vpow2.f32 %v722_v50 }
 0x138   : > { %v5513_v51 = vpop.eup %5512  ;;  %5536 = vrcp.f32 %v750_v58  ;;  %v753_v37 = vadd.f32 1.0, %v5511_v6  ;;  %4826 = vmatprep.mubr.f32.mxu0 %v6404_v14 }
 0x139   : > { %v5515_v2 = vpop.eup %5514  ;;  %893 = vst [vmem:[#allocation2 + $0xd9] sm:$0xff] %v806_v7  ;;  %v809_v32 = vmul.f32 %v5513_v51, %v6282_v47  ;;  %4827 = vmatmul.mubr.f32.gmra.mxu0 %v6406_v60  ;;  %4752 = vmatprep.mubr.f32.mxu1 %v806_v7 }
 0x13a   : > { %5538 = vrcp.f32 %v753_v37  ;;  %v752_v12 = vadd.f32 1.0, %v5515_v2  ;;  %4753 = vmatmul.mubr.f32.gmra.mxu1 %v807_v8 }
 0x13b   : > { %v5517_v16 = vpop.eup %5516  ;;  %896 = vst [vmem:[#allocation2 + $0xf9] sm:$0xff] %v809_v32  ;;  %v6411_v43 = vld [vmem:[#allocation2 + $0xc0] sm:$0xff]  ;;  %v6413_v57 = vld [vmem:[#allocation2 + $0xc8] sm:$0xff] }
 0x13c   : > { %v5519_v35 = vpop.eup %5518  ;;  %v808_v50 = vmul.f32 %v5517_v16, %v6289_v45  ;;  %5540 = vrcp.f32 %v752_v12  ;;  %4829 = vmatprep.mubr.f32.mxu0 %v6411_v43 }
 0x13d   : > { %v5521_v11 = vpop.eup %5520  ;;  %v811_v47 = vmul.f32 %v5519_v35, %v6295_v38  ;;  %4830 = vmatmul.mubr.f32.gmra.mxu0 %v6413_v57 }
 0x13e   : > { %v5523_v62 = vpop.eup %5522  ;;  %895 = vst [vmem:[#allocation2 + $0xf1] sm:$0xff] %v808_v50  ;;  %v755_v0 = vadd.f32 1.0, %v5521_v11  ;;  %4755 = vmatprep.mubr.f32.mxu1 %v808_v50 }
 0x13f   : > { %v5525_v8 = vpop.eup %5524  ;;  %898 = vst [vmem:[#allocation2 + $0x111] sm:$0xff] %v811_v47  ;;  %v810_v17 = vmul.f32 %v5523_v62, %v6302_v55  ;;  %4756 = vmatmul.mubr.f32.gmra.mxu1 %v809_v32 }
 0x140   : > { %v5527_v58 = vpop.eup %5526  ;;  %5542 = vrcp.f32 %v755_v0  ;;  %v754_v45 = vadd.f32 1.0, %v5525_v8  ;;  %v6420_v6 = vld [vmem:[#allocation2 + $0xd8] sm:$0xff]  ;;  %v6422_v7 = vld [vmem:[#allocation2 + $0xe0] sm:$0xff] }
 0x141   : > { %v5529_v51 = vpop.eup %5528  ;;  %897 = vst [vmem:[#allocation2 + $0x109] sm:$0xff] %v810_v17  ;;  %v813_v38 = vmul.f32 %v5527_v58, %v6305_v10  ;;  %4832 = vmatprep.mubr.f32.mxu0 %v6420_v6  ;;  %4758 = vmatprep.mubr.f32.mxu1 %v810_v17 }
 0x142   : > { %v5531_v37 = vpop.eup %5530  ;;  %5544 = vrcp.f32 %v754_v45  ;;  %4833 = vmatmul.mubr.f32.gmra.mxu0 %v6422_v7  ;;  %v757_v55 = vadd.f32 1.0, %v5529_v51 }
 0x143   : > { %v5533_v2 = vpop.eup %5532  ;;  %900 = vst [vmem:[#allocation2 + $0x129] sm:$0xff] %v813_v38  ;;  %v812_v32 = vmul.f32 %v5531_v37, %v6313_v40  ;;  %4759 = vmatmul.mubr.f32.gmra.mxu1 %v811_v47 }
 0x144   : > { %v5535_v12 = vpop.eup %5534  ;;  %v815_v16 = vmul.f32 %v5533_v2, %v6324_v44  ;;  %5546 = vrcp.f32 %v757_v55  ;;  %v1456_v2 = vld [vmem:[#allocation2 + $0x2] sm:$0xff] }
 0x145   : > { %v5537_v35 = vpop.eup %5536  ;;  %899 = vst [vmem:[#allocation2 + $0x121] sm:$0xff] %v812_v32  ;;  %v6429_v10 = vld [vmem:[#allocation2 + $0xf0] sm:$0xff]  ;;  %v6431_v50 = vld [vmem:[#allocation2 + $0xf8] sm:$0xff]  ;;  %4761 = vmatprep.mubr.f32.mxu1 %v812_v32  ;;  %v756_v11 = vadd.f32 1.0, %v5535_v12 }
 0x146   : > { %902 = vst [vmem:[#allocation2 + $0x141] sm:$0xff] %v815_v16  ;;  %v814_v62 = vmul.f32 %v5537_v35, %v6332_v9  ;;  %4835 = vmatprep.mubr.f32.mxu0 %v6429_v10 }
 0x147   : > { %v5539_v0 = vpop.eup %5538  ;;  %4836 = vmatmul.mubr.f32.gmra.mxu0 %v6431_v50  ;;  %4762 = vmatmul.mubr.f32.gmra.mxu1 %v813_v38  ;;  %5548 = vrcp.f32 %v756_v11  ;;  %v6474_v11 = vld [vmem:[#allocation2 + $0x1a] sm:$0xff] }
 0x148   : > { %901 = vst [vmem:[#allocation2 + $0x139] sm:$0xff] %v814_v62  ;;  %v817_v40 = vmul.f32 %v5539_v0, %v6339_v61  ;;  %v6437_v44 = vld [vmem:[#allocation2 + $0x108] sm:$0xff]  ;;  %v6439_v47 = vld [vmem:[#allocation2 + $0x110] sm:$0xff]  ;;  %4764 = vmatprep.mubr.f32.mxu1 %v814_v62 }
 0x149   : > { %v5541_v8 = vpop.eup %5540  ;;  %4838 = vmatprep.mubr.f32.mxu0 %v6437_v44 }
 0x14a   : > { %904 = vst [vmem:[#allocation2 + $0x159] sm:$0xff] %v817_v40  ;;  %v816_v9 = vmul.f32 %v5541_v8, %v6348_v46  ;;  %v6484_v8 = vld [vmem:[#allocation2 + $0x22] sm:$0xff] }
 0x14b   : > { %4839 = vmatmul.mubr.f32.gmra.mxu0 %v6439_v47  ;;  %4765 = vmatmul.mubr.f32.gmra.mxu1 %v815_v16  ;;  %v1457_v16 = vld [vmem:[#allocation2 + $0xa] sm:$0xff] }
 0x14c   : > { %903 = vst [vmem:[#allocation2 + $0x151] sm:$0xff] %v816_v9  ;;  %v6444_v17 = vld [vmem:[#allocation2 + $0x120] sm:$0xff]  ;;  %v6446_v58 = vld [vmem:[#allocation2 + $0x128] sm:$0xff]  ;;  %4767 = vmatprep.mubr.f32.mxu1 %v816_v9 }
 0x14d   : > { %v5543_v61 = vpop.eup %5542  ;;  %4841 = vmatprep.mubr.f32.mxu0 %v6444_v17  ;;  %v4060_v9 = vld [vmem:[%s7884_s4 + $0x268] sm:$0xff] }
 0x14e   : > { %v819_v45 = vmul.f32 %v5543_v61, %v6360_v48 }
 0x14f   : > { %v5545_v51 = vpop.eup %5544  ;;  %4842 = vmatmul.mubr.f32.gmra.mxu0 %v6446_v58  ;;  %v6451_v38 = vld [vmem:[#allocation2 + $0x138] sm:$0xff]  ;;  %4768 = vmatmul.mubr.f32.gmra.mxu1 %v817_v40  ;;  %v6455_v37 = vld [vmem:[#allocation2 + $0x140] sm:$0xff]  ;;  %v4807_v40 = vpop.f32.mrf.mxu0 }
 0x150   : > { %906 = vst [vmem:[#allocation2 + $0x171] sm:$0xff] %v819_v45  ;;  %v818_v46 = vmul.f32 %v5545_v51, %v6368_v63  ;;  %4844 = vmatprep.mubr.f32.mxu0 %v6451_v38  ;;  %v4059_v51 = vld [vmem:[%s7884_s4 + $0x260] sm:$0xff] }
 0x151   : > { %v5547_v55 = vpop.eup %5546 }
 0x152   : > { %905 = vst [vmem:[#allocation2 + $0x169] sm:$0xff] %v818_v46  ;;  %4770 = vmatprep.mubr.f32.mxu1 %v818_v46  ;;  %v6458_v32 = vmul.f32 %v5547_v55, %v6377_v41  ;;  %v4061_v41 = vld [vmem:[%s7884_s4 + $0x270] sm:$0xff] }
 0x153   : > { %4845 = vmatmul.mubr.f32.gmra.mxu0 %v6455_v37  ;;  %v6461_v48 = vld [vmem:[#allocation2 + $0x150] sm:$0xff]  ;;  %4771 = vmatmul.mubr.f32.gmra.mxu1 %v819_v45  ;;  %v6464_v63 = vld [vmem:[#allocation2 + $0x158] sm:$0xff] }
 0x154   : > { %v5549_v12 = vpop.eup %5548  ;;  %4847 = vmatprep.mubr.f32.mxu0 %v6461_v48  ;;  %4885 = vmatprep.mubr.f32.mxu1 %v1456_v2  ;;  %908 = vst [vmem:[#allocation2 + $0x189] sm:$0xff] %v6458_v32  ;;  %v6497_v45 = vld [vmem:[#allocation2 + $0x3a] sm:$0xff]  ;;  %v6504_v46 = vld [vmem:[#allocation2 + $0x4a] sm:$0xff]  ;;  %v6512_v55 = vld [vmem:[#allocation2 + $0x52] sm:$0xff] }
 0x155   : > { %v6468_v35 = vmul.f32 %v5549_v12, %v6384_v53  ;;  %v4727_v53 = vpop.f32.mrf.mxu1  ;;  %v6519_v2 = vld [vmem:[#allocation2 + $0x62] sm:$0xff]  ;;  %v6533_v12 = vld [vmem:[#allocation2 + $0x7a] sm:$0xff] }
 0x156   : > { %v6489_v61 = vadd.f32 %v4807_v40, %v4727_v53  ;;  %v6554_v53 = vld [vmem:[#allocation2 + $0x9a] sm:$0xff]  ;;  %v6561_v40 = vld [vmem:[#allocation2 + $0xaa] sm:$0xff] }
 0x157   : > { %4848 = vmatmul.mubr.f32.gmra.mxu0 %v6464_v63  ;;  %4886 = vmatmul.mubr.f32.vlgmr.msra.gmra.mxu1 %v1457_v16  ;;  %907 = vst [vmem:[#allocation2 + $0x181] sm:$0xff] %v6468_v35  ;;  %v6540_v16 = vld [vmem:[#allocation2 + $0x82] sm:$0xff] }
 0x158   : > { %5014 = vmatpush3.msra.mxu1 %v6171_v49  ;;  %4888 = vmatprep.mubr.f32.mxu1 %v6474_v11  ;;  %v6493_v49 = vld [vmem:[#allocation2 + $0x32] sm:$0xff] }
 0x159   : > { %v6479_v62 = vld [vmem:[#allocation2 + $0x168] sm:$0xff]  ;;  %v6481_v0 = vld [vmem:[#allocation2 + $0x170] sm:$0xff]  ;;  %5015 = vmatprep.subr.mxu1 %v4061_v41 }
 0x15a   : > { %4850 = vmatprep.mubr.f32.mxu0 %v6479_v62  ;;  %5016 = vmatpush3.msra.mxu1 %v4061_v41  ;;  %v6547_v41 = vld [vmem:[#allocation2 + $0x92] sm:$0xff] }
 0x15b   : > { %4851 = vmatmul.mubr.f32.gmra.mxu0 %v6481_v0  ;;  %4889 = vmatmul.mubr.f32.gmra.mxu1 %v6484_v8 }
 0x15c   : > { %4965 = vmatprep.mubr.f32.mxu0 %v6316_v54  ;;  %4891 = vmatprep.mubr.f32.mxu1 %v6493_v49  ;;  %v4077_v54 = vld [vmem:[%s7884_s4 + $0x2f0] sm:$0xff] }
 0x15d   : > { %5017 = vmatprep.subr.mxu1 %v4060_v9 }
 0x15e   : > { %5018 = vmatpush3.msra.mxu1 %v4060_v9  ;;  %v6568_v9 = vld [vmem:[#allocation2 + $0xb2] sm:$0xff] }
 0x15f   : > { %4966 = vmatmul.mubr.f32.vlgmr.msra.gmra.mxu0 %v6318_v56  ;;  %4892 = vmatmul.mubr.f32.gmra.mxu1 %v6497_v45  ;;  %v4058_v56 = vld [vmem:[%s7884_s4 + $0x258] sm:$0xff] }
 0x160   : > { %4968 = vmatprep.mubr.f32.mxu0 %v6334_v13  ;;  %4894 = vmatprep.mubr.f32.mxu1 %v6504_v46  ;;  %v4076_v13 = vld [vmem:[%s7884_s4 + $0x2e8] sm:$0xff] }
 0x161   : > { %5019 = vmatprep.subr.mxu1 %v4059_v51  ;;  %5094 = vmatpush3.msra.mxu0 %v6227_v1  ;;  %v6526_v1 = vld [vmem:[#allocation2 + $0x6a] sm:$0xff] }
 0x162   : > { %5020 = vmatpush3.msra.mxu1 %v4059_v51  ;;  %5095 = vmatprep.subr.mxu0 %v4077_v54  ;;  %v6575_v51 = vld [vmem:[#allocation2 + $0xc2] sm:$0xff] }
 0x163   : > { %4969 = vmatmul.mubr.f32.gmra.mxu0 %v6336_v39  ;;  %4895 = vmatmul.mubr.f32.gmra.mxu1 %v6512_v55  ;;  %v4057_v39 = vld [vmem:[%s7884_s4 + $0x250] sm:$0xff] }
 0x164   : > { %4971 = vmatprep.mubr.f32.mxu0 %v6352_v36  ;;  %4897 = vmatprep.mubr.f32.mxu1 %v6519_v2  ;;  %v4075_v36 = vld [vmem:[%s7884_s4 + $0x2e0] sm:$0xff] }
 0x165   : > { %5021 = vmatprep.subr.mxu1 %v4058_v56  ;;  %5096 = vmatpush3.msra.mxu0 %v4077_v54  ;;  %v6582_v54 = vld [vmem:[#allocation2 + $0xca] sm:$0xff] }
 0x166   : > { %5022 = vmatpush3.msra.mxu1 %v4058_v56  ;;  %5097 = vmatprep.subr.mxu0 %v4076_v13  ;;  %v6589_v56 = vld [vmem:[#allocation2 + $0xda] sm:$0xff] }
 0x167   : > { %4972 = vmatmul.mubr.f32.gmra.mxu0 %v6354_v15  ;;  %4898 = vmatmul.mubr.f32.gmra.mxu1 %v6526_v1  ;;  %v4056_v15 = vld [vmem:[%s7884_s4 + $0x248] sm:$0xff] }
 0x168   : > { %4974 = vmatprep.mubr.f32.mxu0 %v6370_v59  ;;  %4900 = vmatprep.mubr.f32.mxu1 %v6533_v12  ;;  %v4074_v59 = vld [vmem:[%s7884_s4 + $0x2d8] sm:$0xff] }
 0x169   : > { %5023 = vmatprep.subr.mxu1 %v4057_v39  ;;  %5098 = vmatpush3.msra.mxu0 %v4076_v13  ;;  %v6596_v13 = vld [vmem:[#allocation2 + $0xe2] sm:$0xff] }
 0x16a   : > { %5024 = vmatpush3.msra.mxu1 %v4057_v39  ;;  %5099 = vmatprep.subr.mxu0 %v4075_v36  ;;  %v6603_v39 = vld [vmem:[#allocation2 + $0xf2] sm:$0xff] }
 0x16b   : > { %4975 = vmatmul.mubr.f32.gmra.mxu0 %v6372_v4  ;;  %4901 = vmatmul.mubr.f32.gmra.mxu1 %v6540_v16  ;;  %v4055_v4 = vld [vmem:[%s7884_s4 + $0x240] sm:$0xff] }
 0x16c   : > { %4977 = vmatprep.mubr.f32.mxu0 %v6387_v34  ;;  %4903 = vmatprep.mubr.f32.mxu1 %v6547_v41  ;;  %v4073_v34 = vld [vmem:[%s7884_s4 + $0x2d0] sm:$0xff] }
 0x16d   : > { %5025 = vmatprep.subr.mxu1 %v4056_v15  ;;  %5100 = vmatpush3.msra.mxu0 %v4075_v36  ;;  %v6610_v36 = vld [vmem:[#allocation2 + $0xfa] sm:$0xff] }
 0x16e   : > { %5026 = vmatpush3.msra.mxu1 %v4056_v15  ;;  %5101 = vmatprep.subr.mxu0 %v4074_v59  ;;  %v6617_v15 = vld [vmem:[#allocation2 + $0x10a] sm:$0xff] }
 0x16f   : > { %4978 = vmatmul.mubr.f32.gmra.mxu0 %v6389_v52  ;;  %4904 = vmatmul.mubr.f32.gmra.mxu1 %v6554_v53  ;;  %v4054_v52 = vld [vmem:[%s7884_s4 + $0x238] sm:$0xff] }
 0x170   : > { %4980 = vmatprep.mubr.f32.mxu0 %v6396_v3  ;;  %4906 = vmatprep.mubr.f32.mxu1 %v6561_v40  ;;  %v4072_v3 = vld [vmem:[%s7884_s4 + $0x2c8] sm:$0xff] }
 0x171   : > { %5027 = vmatprep.subr.mxu1 %v4055_v4  ;;  %5102 = vmatpush3.msra.mxu0 %v4074_v59  ;;  %v6624_v59 = vld [vmem:[#allocation2 + $0x112] sm:$0xff] }
 0x172   : > { %5028 = vmatpush3.msra.mxu1 %v4055_v4  ;;  %5103 = vmatprep.subr.mxu0 %v4073_v34  ;;  %v6631_v4 = vld [vmem:[#allocation2 + $0x122] sm:$0xff] }
 0x173   : > { %4981 = vmatmul.mubr.f32.gmra.mxu0 %v6398_v42  ;;  %4907 = vmatmul.mubr.f32.gmra.mxu1 %v6568_v9  ;;  %v4053_v42 = vld [vmem:[%s7884_s4 + $0x230] sm:$0xff] }
 0x174   : > { %4983 = vmatprep.mubr.f32.mxu0 %v6404_v14  ;;  %4909 = vmatprep.mubr.f32.mxu1 %v6575_v51  ;;  %v4071_v14 = vld [vmem:[%s7884_s4 + $0x2c0] sm:$0xff] }
 0x175   : > { %5029 = vmatprep.subr.mxu1 %v4054_v52  ;;  %5104 = vmatpush3.msra.mxu0 %v4073_v34  ;;  %v6638_v34 = vld [vmem:[#allocation2 + $0x12a] sm:$0xff] }
 0x176   : > { %5030 = vmatpush3.msra.mxu1 %v4054_v52  ;;  %5105 = vmatprep.subr.mxu0 %v4072_v3  ;;  %v6645_v52 = vld [vmem:[#allocation2 + $0x13a] sm:$0xff] }
 0x177   : > { %4984 = vmatmul.mubr.f32.gmra.mxu0 %v6406_v60  ;;  %4910 = vmatmul.mubr.f32.gmra.mxu1 %v6582_v54  ;;  %v4052_v60 = vld [vmem:[%s7884_s4 + $0x228] sm:$0xff] }
 0x178   : > { %4986 = vmatprep.mubr.f32.mxu0 %v6411_v43  ;;  %4912 = vmatprep.mubr.f32.mxu1 %v6589_v56  ;;  %v4070_v43 = vld [vmem:[%s7884_s4 + $0x2b8] sm:$0xff] }
 0x179   : > { %5031 = vmatprep.subr.mxu1 %v4053_v42  ;;  %5106 = vmatpush3.msra.mxu0 %v4072_v3  ;;  %v6652_v3 = vld [vmem:[#allocation2 + $0x142] sm:$0xff] }
 0x17a   : > { %5032 = vmatpush3.msra.mxu1 %v4053_v42  ;;  %5107 = vmatprep.subr.mxu0 %v4071_v14  ;;  %v6659_v42 = vld [vmem:[#allocation2 + $0x152] sm:$0xff] }
 0x17b   : > { %4987 = vmatmul.mubr.f32.gmra.mxu0 %v6413_v57  ;;  %4913 = vmatmul.mubr.f32.gmra.mxu1 %v6596_v13  ;;  %v4051_v57 = vld [vmem:[%s7884_s4 + $0x220] sm:$0xff] }
 0x17c   : > { %4989 = vmatprep.mubr.f32.mxu0 %v6420_v6  ;;  %4915 = vmatprep.mubr.f32.mxu1 %v6603_v39  ;;  %v4069_v6 = vld [vmem:[%s7884_s4 + $0x2b0] sm:$0xff] }
 0x17d   : > { %5033 = vmatprep.subr.mxu1 %v4052_v60  ;;  %5108 = vmatpush3.msra.mxu0 %v4071_v14  ;;  %v6666_v14 = vld [vmem:[#allocation2 + $0x15a] sm:$0xff] }
 0x17e   : > { %5034 = vmatpush3.msra.mxu1 %v4052_v60  ;;  %5109 = vmatprep.subr.mxu0 %v4070_v43  ;;  %v6673_v60 = vld [vmem:[#allocation2 + $0x16a] sm:$0xff] }
 0x17f   : > { %4990 = vmatmul.mubr.f32.gmra.mxu0 %v6422_v7  ;;  %4916 = vmatmul.mubr.f32.gmra.mxu1 %v6610_v36  ;;  %v4050_v7 = vld [vmem:[%s7884_s4 + $0x218] sm:$0xff] }
 0x180   : > { %4992 = vmatprep.mubr.f32.mxu0 %v6429_v10  ;;  %4918 = vmatprep.mubr.f32.mxu1 %v6617_v15  ;;  %v4068_v10 = vld [vmem:[%s7884_s4 + $0x2a8] sm:$0xff] }
 0x181   : > { %5035 = vmatprep.subr.mxu1 %v4051_v57  ;;  %5110 = vmatpush3.msra.mxu0 %v4070_v43  ;;  %v6680_v43 = vld [vmem:[#allocation2 + $0x172] sm:$0xff] }
 0x182   : > { %5036 = vmatpush3.msra.mxu1 %v4051_v57  ;;  %5111 = vmatprep.subr.mxu0 %v4069_v6  ;;  %v2068_v57 = vld [vmem:[#allocation2 + $0x19] sm:$0xff] }
 0x183   : > { %4993 = vmatmul.mubr.f32.gmra.mxu0 %v6431_v50  ;;  %4919 = vmatmul.mubr.f32.gmra.mxu1 %v6624_v59  ;;  %v4049_v50 = vld [vmem:[%s7884_s4 + $0x210] sm:$0xff] }
 0x184   : > { %4995 = vmatprep.mubr.f32.mxu0 %v6437_v44  ;;  %4921 = vmatprep.mubr.f32.mxu1 %v6631_v4  ;;  %v4067_v44 = vld [vmem:[%s7884_s4 + $0x2a0] sm:$0xff] }
 0x185   : > { %5037 = vmatprep.subr.mxu1 %v4050_v7  ;;  %5112 = vmatpush3.msra.mxu0 %v4069_v6  ;;  %v4063_v6 = vld [vmem:[%s7884_s4 + $0x280] sm:$0xff] }
 0x186   : > { %5038 = vmatpush3.msra.mxu1 %v4050_v7  ;;  %5113 = vmatprep.subr.mxu0 %v4068_v10  ;;  %v6694_v7 = vld [vmem:[#allocation2 + $0x180] sm:$0xff] }
 0x187   : > { %4996 = vmatmul.mubr.f32.gmra.mxu0 %v6439_v47  ;;  %4922 = vmatmul.mubr.f32.gmra.mxu1 %v6638_v34  ;;  %v4048_v47 = vld [vmem:[%s7884_s4 + $0x208] sm:$0xff] }
 0x188   : > { %4998 = vmatprep.mubr.f32.mxu0 %v6444_v17  ;;  %4924 = vmatprep.mubr.f32.mxu1 %v6645_v52  ;;  %v4066_v17 = vld [vmem:[%s7884_s4 + $0x298] sm:$0xff] }
 0x189   : > { %5039 = vmatprep.subr.mxu1 %v4049_v50  ;;  %5114 = vmatpush3.msra.mxu0 %v4068_v10  ;;  %v2069_v10 = vld [vmem:[#allocation2 + $0x21] sm:$0xff] }
 0x18a   : > { %5040 = vmatpush3.msra.mxu1 %v4049_v50  ;;  %5115 = vmatprep.subr.mxu0 %v4067_v44  ;;  %v4093_v50 = vld [vmem:[%s7884_s4 + $0x370] sm:$0xff] }
 0x18b   : > { %4999 = vmatmul.mubr.f32.gmra.mxu0 %v6446_v58  ;;  %4925 = vmatmul.mubr.f32.gmra.mxu1 %v6652_v3  ;;  %v4047_v58 = vld [vmem:[%s7884_s4 + $0x200] sm:$0xff] }
 0x18c   : > { %5001 = vmatprep.mubr.f32.mxu0 %v6451_v38  ;;  %4927 = vmatprep.mubr.f32.mxu1 %v6659_v42  ;;  %v4065_v38 = vld [vmem:[%s7884_s4 + $0x290] sm:$0xff] }
 0x18d   : > { %5041 = vmatprep.subr.mxu1 %v4048_v47  ;;  %5116 = vmatpush3.msra.mxu0 %v4067_v44  ;;  %v6708_v44 = vld [vmem:[#allocation2 + $0x31] sm:$0xff] }
 0x18e   : > { %5042 = vmatpush3.msra.mxu1 %v4048_v47  ;;  %5117 = vmatprep.subr.mxu0 %v4066_v17  ;;  %v6717_v47 = vld [vmem:[#allocation2 + $0x39] sm:$0xff] }
 0x18f   : > { %5002 = vmatmul.mubr.f32.gmra.mxu0 %v6455_v37  ;;  %4928 = vmatmul.mubr.f32.gmra.mxu1 %v6666_v14  ;;  %v4064_v37 = vld [vmem:[%s7884_s4 + $0x288] sm:$0xff] }
 0x190   : > { %5004 = vmatprep.mubr.f32.mxu0 %v6461_v48  ;;  %4930 = vmatprep.mubr.f32.mxu1 %v6673_v60  ;;  %v4094_v48 = vld [vmem:[%s7884_s4 + $0x378] sm:$0xff] }
 0x191   : > { %5118 = vmatpush3.msra.mxu0 %v4066_v17  ;;  %5043 = vmatprep.subr.mxu1 %v4047_v58  ;;  %v4091_v17 = vld [vmem:[%s7884_s4 + $0x360] sm:$0xff] }
 0x192   : > { %5119 = vmatprep.subr.mxu0 %v4065_v38  ;;  %5044 = vmatpush3.msra.mxu1 %v4047_v58  ;;  %v6723_v58 = vld [vmem:[#allocation2 + $0x49] sm:$0xff] }
 0x193   : > { %5005 = vmatmul.mubr.f32.gmra.mxu0 %v6464_v63  ;;  %4931 = vmatmul.mubr.f32.gmra.mxu1 %v6680_v43  ;;  %v6699_v63 = vld [vmem:[%s7884_s4 + $0x3f8] sm:$0xff] }
 0x194   : > { %5007 = vmatprep.mubr.f32.mxu0 %v6479_v62  ;;  %5120 = vmatpush3.msra.mxu0 %v4065_v38  ;;  %v6703_v62 = vld [vmem:[#allocation2 + $0x188] sm:$0xff]  ;;  %v4090_v38 = vld [vmem:[%s7884_s4 + $0x358] sm:$0xff] }
 0x195   : > { %5121 = vmatprep.subr.mxu0 %v4064_v37  ;;  %5045 = vmatprep.mubr.f32.mxu1 %v2068_v57  ;;  %v4087_v57 = vld [vmem:[%s7884_s4 + $0x340] sm:$0xff] }
 0x196   : > { %5122 = vmatpush3.msra.mxu0 %v4064_v37  ;;  %5173 = vmatprep.subr.mxu1 %v4094_v48  ;;  %v4089_v37 = vld [vmem:[%s7884_s4 + $0x350] sm:$0xff] }
 0x197   : > { %5008 = vmatmul.mubr.f32.gmra.mxu0 %v6481_v0  ;;  %5123 = vmatprep.subr.mxu0 %v4063_v6  ;;  %v4092_v0 = vld [vmem:[%s7884_s4 + $0x368] sm:$0xff] }
 0x198   : > { %5010 = vmatprep.mubr.f32.mxu0 %v6694_v7  ;;  %5124 = vmatpush3.msra.mxu0 %v4063_v6  ;;  %v6751_v6 = vld [vmem:[#allocation2 + $0x79] sm:$0xff] }
 0x199   : > { %5046 = vmatmul.mubr.f32.vlgmr.msra.gmra.mxu1 %v2069_v10  ;;  %5253 = vmatprep.subr.mxu0 %v6699_v63  ;;  %v4085_v10 = vld [vmem:[%s7884_s4 + $0x330] sm:$0xff] }
 0x19a   : > { %5174 = vmatpush3.msra.mxu1 %v4094_v48  ;;  %5048 = vmatprep.mubr.f32.mxu1 %v6708_v44  ;;  %v6737_v48 = vld [vmem:[#allocation2 + $0x61] sm:$0xff] }
 0x19b   : > { %5011 = vmatmul.mubr.f32.gmra.mxu0 %v6703_v62  ;;  %5175 = vmatprep.subr.mxu1 %v4093_v50 }
 0x19c   : > { %5125 = vmatprep.mubr.f32.mxu0 %v6474_v11  ;;  %5176 = vmatpush3.msra.mxu1 %v4093_v50  ;;  %v6731_v11 = vld [vmem:[#allocation2 + $0x51] sm:$0xff] }
 0x19d   : > { %5049 = vmatmul.mubr.f32.gmra.mxu1 %v6717_v47  ;;  %5177 = vmatprep.subr.mxu1 %v4092_v0  ;;  %v6765_v50 = vld [vmem:[#allocation2 + $0x91] sm:$0xff] }
 0x19e   : > { %5051 = vmatprep.mubr.f32.mxu1 %v6723_v58  ;;  %5178 = vmatpush3.msra.mxu1 %v4092_v0  ;;  %v6777_v0 = vld [vmem:[#allocation2 + $0xa9] sm:$0xff] }
 0x19f   : > { %5126 = vmatmul.mubr.f32.vlgmr.msra.gmra.mxu0 %v6484_v8  ;;  %5179 = vmatprep.subr.mxu1 %v4091_v17  ;;  %v4088_v8 = vld [vmem:[%s7884_s4 + $0x348] sm:$0xff] }
 0x1a0   : > { %5128 = vmatprep.mubr.f32.mxu0 %v6493_v49  ;;  %5180 = vmatpush3.msra.mxu1 %v4091_v17  ;;  %v6745_v49 = vld [vmem:[#allocation2 + $0x69] sm:$0xff] }
 0x1a1   : > { %5052 = vmatmul.mubr.f32.gmra.mxu1 %v6731_v11  ;;  %5181 = vmatprep.subr.mxu1 %v4090_v38  ;;  %v4108_v17 = vld [vmem:[%s7884_s4 + $0x3e8] sm:$0xff] }
 0x1a2   : > { %5054 = vmatprep.mubr.f32.mxu1 %v6737_v48  ;;  %5182 = vmatpush3.msra.mxu1 %v4090_v38  ;;  %v6794_v38 = vld [vmem:[#allocation2 + $0xc1] sm:$0xff] }
 0x1a3   : > { %5129 = vmatmul.mubr.f32.gmra.mxu0 %v6497_v45  ;;  %5183 = vmatprep.subr.mxu1 %v4089_v37  ;;  %v4086_v45 = vld [vmem:[%s7884_s4 + $0x338] sm:$0xff] }
 0x1a4   : > { %5131 = vmatprep.mubr.f32.mxu0 %v6504_v46  ;;  %5184 = vmatpush3.msra.mxu1 %v4089_v37  ;;  %v6759_v46 = vld [vmem:[#allocation2 + $0x81] sm:$0xff] }
 0x1a5   : > { %5055 = vmatmul.mubr.f32.gmra.mxu1 %v6745_v49  ;;  %5185 = vmatprep.subr.mxu1 %v4088_v8  ;;  %v4083_v37 = vld [vmem:[%s7884_s4 + $0x320] sm:$0xff] }
 0x1a6   : > { %5057 = vmatprep.mubr.f32.mxu1 %v6751_v6  ;;  %5186 = vmatpush3.msra.mxu1 %v4088_v8  ;;  %v6808_v8 = vld [vmem:[#allocation2 + $0xd9] sm:$0xff] }
 0x1a7   : > { %5132 = vmatmul.mubr.f32.gmra.mxu0 %v6512_v55  ;;  %5187 = vmatprep.subr.mxu1 %v4087_v57  ;;  %v4109_v55 = vld [vmem:[%s7884_s4 + $0x3f0] sm:$0xff] }
 0x1a8   : > { %5134 = vmatprep.mubr.f32.mxu0 %v6519_v2  ;;  %5188 = vmatpush3.msra.mxu1 %v4087_v57  ;;  %v6773_v2 = vld [vmem:[#allocation2 + $0x99] sm:$0xff]  ;;  %v6819_v57 = vld [vmem:[#allocation2 + $0xf1] sm:$0xff] }
 0x1a9   : > { %5058 = vmatmul.mubr.f32.gmra.mxu1 %v6759_v46  ;;  %5189 = vmatprep.subr.mxu1 %v4086_v45 }
 0x1aa   : > { %5060 = vmatprep.mubr.f32.mxu1 %v6765_v50  ;;  %5190 = vmatpush3.msra.mxu1 %v4086_v45  ;;  %v4104_v45 = vld [vmem:[%s7884_s4 + $0x3c8] sm:$0xff] }
 0x1ab   : > { %5135 = vmatmul.mubr.f32.gmra.mxu0 %v6526_v1  ;;  %5191 = vmatprep.subr.mxu1 %v4085_v10  ;;  %v4107_v1 = vld [vmem:[%s7884_s4 + $0x3e0] sm:$0xff] }
 0x1ac   : > { %5137 = vmatprep.mubr.f32.mxu0 %v6533_v12  ;;  %5254 = vmatpush3.msra.mxu0 %v6699_v63  ;;  %v6788_v12 = vld [vmem:[#allocation2 + $0xb1] sm:$0xff]  ;;  %v4084_v63 = vld [vmem:[%s7884_s4 + $0x328] sm:$0xff] }
 0x1ad   : > { %5061 = vmatmul.mubr.f32.gmra.mxu1 %v6773_v2  ;;  %5255 = vmatprep.subr.mxu0 %v4109_v55 }
 0x1ae   : > { %5063 = vmatprep.mubr.f32.mxu1 %v6777_v0  ;;  %5256 = vmatpush3.msra.mxu0 %v4109_v55  ;;  %v6836_v55 = vld [vmem:[#allocation2 + $0x109] sm:$0xff] }
 0x1af   : > { %5138 = vmatmul.mubr.f32.gmra.mxu0 %v6540_v16  ;;  %5192 = vmatpush3.msra.mxu1 %v4085_v10  ;;  %v4106_v16 = vld [vmem:[%s7884_s4 + $0x3d8] sm:$0xff] }
 0x1b0   : > { %5140 = vmatprep.mubr.f32.mxu0 %v6547_v41  ;;  %5257 = vmatprep.subr.mxu0 %v4108_v17  ;;  %v6802_v41 = vld [vmem:[#allocation2 + $0xc9] sm:$0xff]  ;;  %v4082_v10 = vld [vmem:[%s7884_s4 + $0x318] sm:$0xff] }
 0x1b1   : > { %5064 = vmatmul.mubr.f32.gmra.mxu1 %v6788_v12  ;;  %5258 = vmatpush3.msra.mxu0 %v4108_v17  ;;  %v4081_v17 = vld [vmem:[%s7884_s4 + $0x310] sm:$0xff] }
 0x1b2   : > { %5066 = vmatprep.mubr.f32.mxu1 %v6794_v38  ;;  %5259 = vmatprep.subr.mxu0 %v4107_v1 }
 0x1b3   : > { %5141 = vmatmul.mubr.f32.gmra.mxu0 %v6554_v53  ;;  %5193 = vmatprep.subr.mxu1 %v4084_v63  ;;  %v4105_v53 = vld [vmem:[%s7884_s4 + $0x3d0] sm:$0xff] }
 0x1b4   : > { %5143 = vmatprep.mubr.f32.mxu0 %v6561_v40  ;;  %5260 = vmatpush3.msra.mxu0 %v4107_v1  ;;  %v6816_v40 = vld [vmem:[#allocation2 + $0xe1] sm:$0xff] }
 0x1b5   : > { %5067 = vmatmul.mubr.f32.gmra.mxu1 %v6802_v41  ;;  %5261 = vmatprep.subr.mxu0 %v4106_v16  ;;  %v6850_v1 = vld [vmem:[#allocation2 + $0x121] sm:$0xff] }
 0x1b6   : > { %5069 = vmatprep.mubr.f32.mxu1 %v6808_v8  ;;  %5194 = vmatpush3.msra.mxu1 %v4084_v63  ;;  %v6861_v63 = vld [vmem:[#allocation2 + $0x139] sm:$0xff] }
 0x1b7   : > { %5144 = vmatmul.mubr.f32.gmra.mxu0 %v6568_v9  ;;  %5195 = vmatprep.subr.mxu1 %v4083_v37  ;;  %v4103_v9 = vld [vmem:[%s7884_s4 + $0x3c0] sm:$0xff] }
 0x1b8   : > { %5146 = vmatprep.mubr.f32.mxu0 %v6575_v51  ;;  %5262 = vmatpush3.msra.mxu0 %v4106_v16  ;;  %v6830_v51 = vld [vmem:[#allocation2 + $0xf9] sm:$0xff]  ;;  %v4100_v16 = vld [vmem:[%s7884_s4 + $0x3a8] sm:$0xff] }
 0x1b9   : > { %5070 = vmatmul.mubr.f32.gmra.mxu1 %v6816_v40  ;;  %5263 = vmatprep.subr.mxu0 %v4105_v53 }
 0x1ba   : > { %5072 = vmatprep.mubr.f32.mxu1 %v6819_v57  ;;  %5264 = vmatpush3.msra.mxu0 %v4105_v53  ;;  %v6878_v53 = vld [vmem:[#allocation2 + $0x151] sm:$0xff] }
 0x1bb   : > { %5147 = vmatmul.mubr.f32.gmra.mxu0 %v6582_v54  ;;  %5196 = vmatpush3.msra.mxu1 %v4083_v37  ;;  %v4102_v54 = vld [vmem:[%s7884_s4 + $0x3b8] sm:$0xff]  ;;  %v4080_v37 = vld [vmem:[%s7884_s4 + $0x308] sm:$0xff] }
 0x1bc   : > { %5149 = vmatprep.mubr.f32.mxu0 %v6589_v56  ;;  %5265 = vmatprep.subr.mxu0 %v4104_v45  ;;  %v6844_v56 = vld [vmem:[#allocation2 + $0x111] sm:$0xff] }
 0x1bd   : > { %5073 = vmatmul.mubr.f32.gmra.mxu1 %v6830_v51  ;;  %5266 = vmatpush3.msra.mxu0 %v4104_v45  ;;  %v4079_v45 = vld [vmem:[%s7884_s4 + $0x300] sm:$0xff] }
 0x1be   : > { %5075 = vmatprep.mubr.f32.mxu1 %v6836_v55  ;;  %5267 = vmatprep.subr.mxu0 %v4103_v9 }
 0x1bf   : > { %5150 = vmatmul.mubr.f32.gmra.mxu0 %v6596_v13  ;;  %5197 = vmatprep.subr.mxu1 %v4082_v10  ;;  %v4101_v13 = vld [vmem:[%s7884_s4 + $0x3b0] sm:$0xff] }
 0x1c0   : > { %5152 = vmatprep.mubr.f32.mxu0 %v6603_v39  ;;  %5268 = vmatpush3.msra.mxu0 %v4103_v9  ;;  %v6858_v39 = vld [vmem:[#allocation2 + $0x129] sm:$0xff] }
 0x1c1   : > { %5076 = vmatmul.mubr.f32.gmra.mxu1 %v6844_v56  ;;  %5269 = vmatprep.subr.mxu0 %v4102_v54  ;;  %v6892_v9 = vld [vmem:[#allocation2 + $0x169] sm:$0xff] }
 0x1c2   : > { %5078 = vmatprep.mubr.f32.mxu1 %v6850_v1  ;;  %5198 = vmatpush3.msra.mxu1 %v4082_v10  ;;  %v4096_v10 = vld [vmem:[%s7884_s4 + $0x388] sm:$0xff] }
 0x1c3   : > { %5153 = vmatmul.mubr.f32.gmra.mxu0 %v6610_v36  ;;  %5199 = vmatprep.subr.mxu1 %v4081_v17  ;;  %v4099_v36 = vld [vmem:[%s7884_s4 + $0x3a0] sm:$0xff] }
 0x1c4   : > { %5155 = vmatprep.mubr.f32.mxu0 %v6617_v15  ;;  %5270 = vmatpush3.msra.mxu0 %v4102_v54  ;;  %v6872_v15 = vld [vmem:[#allocation2 + $0x141] sm:$0xff]  ;;  %v2681_v54 = vld [vmem:[#allocation2 + $0x30] sm:$0xff] }
 0x1c5   : > { %5079 = vmatmul.mubr.f32.gmra.mxu1 %v6858_v39  ;;  %5271 = vmatprep.subr.mxu0 %v4101_v13 }
 0x1c6   : > { %5081 = vmatprep.mubr.f32.mxu1 %v6861_v63  ;;  %5272 = vmatpush3.msra.mxu0 %v4101_v13  ;;  %v2683_v13 = vld [vmem:[#allocation2 + $0x48] sm:$0xff] }
 0x1c7   : > { %5156 = vmatmul.mubr.f32.gmra.mxu0 %v6624_v59  ;;  %5200 = vmatpush3.msra.mxu1 %v4081_v17  ;;  %v4098_v59 = vld [vmem:[%s7884_s4 + $0x398] sm:$0xff]  ;;  %v4125_v17 = vld [vmem:[%s7884_s4 + $0x470] sm:$0xff] }
 0x1c8   : > { %5158 = vmatprep.mubr.f32.mxu0 %v6631_v4  ;;  %5273 = vmatprep.subr.mxu0 %v4100_v16  ;;  %v6886_v4 = vld [vmem:[#allocation2 + $0x159] sm:$0xff] }
 0x1c9   : > { %5082 = vmatmul.mubr.f32.gmra.mxu1 %v6872_v15  ;;  %5274 = vmatpush3.msra.mxu0 %v4100_v16  ;;  %v6925_v16 = vld [vmem:[#allocation2 + $0x18a] sm:$0xff] }
 0x1ca   : > { %5084 = vmatprep.mubr.f32.mxu1 %v6878_v53  ;;  %5275 = vmatprep.subr.mxu0 %v4099_v36 }
 0x1cb   : > { %5159 = vmatmul.mubr.f32.gmra.mxu0 %v6638_v34  ;;  %5201 = vmatprep.subr.mxu1 %v4080_v37  ;;  %v4097_v34 = vld [vmem:[%s7884_s4 + $0x390] sm:$0xff] }
 0x1cc   : > { %5161 = vmatprep.mubr.f32.mxu0 %v6645_v52  ;;  %5276 = vmatpush3.msra.mxu0 %v4099_v36  ;;  %v6900_v52 = vld [vmem:[#allocation2 + $0x171] sm:$0xff] }
 0x1cd   : > { %5085 = vmatmul.mubr.f32.gmra.mxu1 %v6886_v4  ;;  %5277 = vmatprep.subr.mxu0 %v4098_v59 }
 0x1ce   : > { %5087 = vmatprep.mubr.f32.mxu1 %v6892_v9  ;;  %5202 = vmatpush3.msra.mxu1 %v4080_v37  ;;  %v2684_v37 = vld [vmem:[#allocation2 + $0x50] sm:$0xff] }
 0x1cf   : > { %5162 = vmatmul.mubr.f32.gmra.mxu0 %v6652_v3  ;;  %5203 = vmatprep.subr.mxu1 %v4079_v45  ;;  %v4095_v3 = vld [vmem:[%s7884_s4 + $0x380] sm:$0xff] }
 0x1d0   : > { %5164 = vmatprep.mubr.f32.mxu0 %v6659_v42  ;;  %5278 = vmatpush3.msra.mxu0 %v4098_v59  ;;  %v4126_v42 = vld [vmem:[%s7884_s4 + $0x478] sm:$0xff] }
 0x1d1   : > { %5088 = vmatmul.mubr.f32.gmra.mxu1 %v6900_v52  ;;  %5279 = vmatprep.subr.mxu0 %v4097_v34 }
 0x1d2   : > { %5090 = vmatprep.mubr.f32.mxu1 %v6468_v35  ;;  %5280 = vmatpush3.msra.mxu0 %v4097_v34  ;;  %v6916_v35 = vpop.f32.mrf.mxu1  ;;  %v2685_v34 = vld [vmem:[#allocation2 + $0x60] sm:$0xff] }
 0x1d3   : > { %5165 = vmatmul.mubr.f32.gmra.mxu0 %v6666_v14  ;;  %5204 = vmatpush3.msra.mxu1 %v4079_v45  ;;  %v6919_v14 = vld [vmem:[#allocation2 + $0x182] sm:$0xff] }
 0x1d4   : > { %5167 = vmatprep.mubr.f32.mxu0 %v6673_v60  ;;  %5281 = vmatprep.subr.mxu0 %v4096_v10  ;;  %v2682_v60 = vld [vmem:[#allocation2 + $0x38] sm:$0xff]  ;;  %v4123_v45 = vld [vmem:[%s7884_s4 + $0x460] sm:$0xff] }
 0x1d5   : > { %5091 = vmatmul.mubr.f32.gmra.mxu1 %v6458_v32  ;;  %5282 = vmatpush3.msra.mxu0 %v4096_v10  ;;  %v6935_v10 = vpop.f32.mrf.mxu0 }
 0x1d6   : > { %5205 = vmatprep.mubr.f32.mxu1 %v2681_v54  ;;  %5283 = vmatprep.subr.mxu0 %v4095_v3  ;;  %v2686_v54 = vld [vmem:[#allocation2 + $0x68] sm:$0xff] }
 0x1d7   : > { %5168 = vmatmul.mubr.f32.gmra.mxu0 %v6680_v43  ;;  %5333 = vmatprep.subr.mxu1 %v4126_v42  ;;  %v4124_v43 = vld [vmem:[%s7884_s4 + $0x468] sm:$0xff] }
 0x1d8   : > { %5170 = vmatprep.mubr.f32.mxu0 %v6919_v14  ;;  %5284 = vmatpush3.msra.mxu0 %v4095_v3  ;;  %v4730_v32 = vpop.f32.mrf.mxu1 }
 0x1d9   : > { %5206 = vmatmul.mubr.f32.vlgmr.msra.gmra.mxu1 %v2682_v60 }
 0x1da   : > { %5334 = vmatpush3.msra.mxu1 %v4126_v42  ;;  %5208 = vmatprep.mubr.f32.mxu1 %v2683_v13  ;;  %v1082_v36 = vpop.f32.mrf.mxu1  ;;  %v4122_v42 = vld [vmem:[%s7884_s4 + $0x458] sm:$0xff] }
 0x1db   : > { %5171 = vmatmul.mubr.f32.gmra.mxu0 %v6925_v16  ;;  %5335 = vmatprep.subr.mxu1 %v4125_v17 }
 0x1dc   : > { %5285 = vmatprep.mubr.f32.mxu0 %v6708_v44  ;;  %5336 = vmatpush3.msra.mxu1 %v4125_v17  ;;  %v4733_v59 = vpop.f32.mrf.mxu1  ;;  %v4121_v17 = vld [vmem:[%s7884_s4 + $0x450] sm:$0xff] }
 0x1dd   : > { %5209 = vmatmul.mubr.f32.gmra.mxu1 %v2684_v37  ;;  %5337 = vmatprep.subr.mxu1 %v4124_v43 }
 0x1de   : > { %5211 = vmatprep.mubr.f32.mxu1 %v2685_v34  ;;  %5338 = vmatpush3.msra.mxu1 %v4124_v43  ;;  %v1092_v3 = vpop.f32.mrf.mxu1  ;;  %v2687_v43 = vld [vmem:[#allocation2 + $0x78] sm:$0xff] }
 0x1df   : > { %5286 = vmatmul.mubr.f32.vlgmr.msra.gmra.mxu0 %v6717_v47  ;;  %5339 = vmatprep.subr.mxu1 %v4123_v45  ;;  %v4120_v47 = vld [vmem:[%s7884_s4 + $0x448] sm:$0xff] }
 0x1e0   : > { %5288 = vmatprep.mubr.f32.mxu0 %v6723_v58  ;;  %v4810_v44 = vpop.f32.mrf.mxu0  ;;  %v4736_v60 = vpop.f32.mrf.mxu1  ;;  %5340 = vmatpush3.msra.mxu1 %v4123_v45  ;;  %v2688_v45 = vld [vmem:[#allocation2 + $0x80] sm:$0xff] }
 0x1e1   : > { %v6945_v13 = vadd.f32 %v4810_v44, %v4730_v32  ;;  %5212 = vmatmul.mubr.f32.gmra.mxu1 %v2686_v54  ;;  %5341 = vmatprep.subr.mxu1 %v4122_v42  ;;  %v4119_v54 = vld [vmem:[%s7884_s4 + $0x440] sm:$0xff] }
 0x1e2   : > { %v1307_v37 = vpop.f32.mrf.mxu0  ;;  %5214 = vmatprep.mubr.f32.mxu1 %v2687_v43  ;;  %v1102_v34 = vpop.f32.mrf.mxu1  ;;  %5342 = vmatpush3.msra.mxu1 %v4122_v42  ;;  %v2689_v43 = vld [vmem:[#allocation2 + $0x90] sm:$0xff] }
 0x1e3   : > { %5289 = vmatmul.mubr.f32.gmra.mxu0 %v6731_v11  ;;  %v6951_v58 = vadd.f32 %v1307_v37, %v1082_v36  ;;  %5343 = vmatprep.subr.mxu1 %v4121_v17  ;;  %v4117_v37 = vld [vmem:[%s7884_s4 + $0x430] sm:$0xff] }
 0x1e4   : > { %5291 = vmatprep.mubr.f32.mxu0 %v6737_v48  ;;  %v4813_v32 = vpop.f32.mrf.mxu0  ;;  %v4739_v44 = vpop.f32.mrf.mxu1  ;;  %5344 = vmatpush3.msra.mxu1 %v4121_v17  ;;  %v4118_v48 = vld [vmem:[%s7884_s4 + $0x438] sm:$0xff] }
 0x1e5   : > { %v6957_v42 = vadd.f32 %v4813_v32, %v4733_v59  ;;  %5215 = vmatmul.mubr.f32.gmra.mxu1 %v2688_v45  ;;  %5345 = vmatprep.subr.mxu1 %v4120_v47  ;;  %v2690_v17 = vld [vmem:[#allocation2 + $0x98] sm:$0xff] }
 0x1e6   : > { %v1317_v33 = vpop.f32.mrf.mxu0  ;;  %5217 = vmatprep.mubr.f32.mxu1 %v2689_v43  ;;  %v1112_v11 = vpop.f32.mrf.mxu1  ;;  %5346 = vmatpush3.msra.mxu1 %v4120_v47  ;;  %v2691_v47 = vld [vmem:[#allocation2 + $0xa8] sm:$0xff] }
 0x1e7   : > { %5292 = vmatmul.mubr.f32.gmra.mxu0 %v6745_v49  ;;  %v6963_v36 = vadd.f32 %v1317_v33, %v1092_v3  ;;  %5347 = vmatprep.subr.mxu1 %v4119_v54  ;;  %v4116_v33 = vld [vmem:[%s7884_s4 + $0x428] sm:$0xff] }
 0x1e8   : > { %5294 = vmatprep.mubr.f32.mxu0 %v6751_v6  ;;  %v4816_v59 = vpop.f32.mrf.mxu0  ;;  %5348 = vmatpush3.msra.mxu1 %v4119_v54  ;;  %v4115_v54 = vld [vmem:[%s7884_s4 + $0x420] sm:$0xff] }
 0x1e9   : > { %v6969_v32 = vadd.f32 %v4816_v59, %v4736_v60  ;;  %5218 = vmatmul.mubr.f32.gmra.mxu1 %v2690_v17  ;;  %5349 = vmatprep.subr.mxu1 %v4118_v48  ;;  %v2692_v60 = vld [vmem:[#allocation2 + $0xb0] sm:$0xff]  ;;  %v2693_v59 = vld [vmem:[#allocation2 + $0xc0] sm:$0xff] }
 0x1ea   : > { %v4742_v45 = vpop.f32.mrf.mxu1  ;;  %v1327_v43 = vpop.f32.mrf.mxu0  ;;  %5220 = vmatprep.mubr.f32.mxu1 %v2691_v47  ;;  %5350 = vmatpush3.msra.mxu1 %v4118_v48  ;;  %v4113_v47 = vld [vmem:[%s7884_s4 + $0x410] sm:$0xff] }
 0x1eb   : > { %5295 = vmatmul.mubr.f32.gmra.mxu0 %v6759_v46  ;;  %v6975_v49 = vadd.f32 %v1327_v43, %v1102_v34  ;;  %5351 = vmatprep.subr.mxu1 %v4117_v37 }
 0x1ec   : > { %v1122_v6 = vpop.f32.mrf.mxu1  ;;  %5297 = vmatprep.mubr.f32.mxu0 %v6765_v50  ;;  %v4819_v3 = vpop.f32.mrf.mxu0  ;;  %5352 = vmatpush3.msra.mxu1 %v4117_v37  ;;  %v4114_v50 = vld [vmem:[%s7884_s4 + $0x418] sm:$0xff] }
 0x1ed   : > { %v6981_v48 = vadd.f32 %v4819_v3, %v4739_v44  ;;  %5221 = vmatmul.mubr.f32.gmra.mxu1 %v2692_v60  ;;  %5353 = vmatprep.subr.mxu1 %v4116_v33  ;;  %v2694_v44 = vld [vmem:[#allocation2 + $0xc8] sm:$0xff] }
 0x1ee   : > { %v4745_v17 = vpop.f32.mrf.mxu1  ;;  %v1337_v46 = vpop.f32.mrf.mxu0  ;;  %5223 = vmatprep.mubr.f32.mxu1 %v2693_v59  ;;  %5354 = vmatpush3.msra.mxu1 %v4116_v33  ;;  %v2695_v33 = vld [vmem:[#allocation2 + $0xd8] sm:$0xff]  ;;  %v2696_v59 = vld [vmem:[#allocation2 + $0xe0] sm:$0xff] }
 0x1ef   : > { %5298 = vmatmul.mubr.f32.gmra.mxu0 %v6773_v2  ;;  %v6987_v34 = vadd.f32 %v1337_v46, %v1112_v11  ;;  %5355 = vmatprep.subr.mxu1 %v4115_v54  ;;  %v4112_v2 = vld [vmem:[%s7884_s4 + $0x408] sm:$0xff] }
 0x1f0   : > { %v1132_v37 = vpop.f32.mrf.mxu1  ;;  %5300 = vmatprep.mubr.f32.mxu0 %v6777_v0  ;;  %5356 = vmatpush3.msra.mxu1 %v4115_v54 }
 0x1f1   : > { %v4822_v43 = vpop.f32.mrf.mxu0  ;;  %5224 = vmatmul.mubr.f32.gmra.mxu1 %v2694_v44  ;;  %5357 = vmatprep.subr.mxu1 %v4114_v50 }
 0x1f2   : > { %v4748_v3 = vpop.f32.mrf.mxu1  ;;  %v6993_v60 = vadd.f32 %v4822_v43, %v4742_v45  ;;  %5226 = vmatprep.mubr.f32.mxu1 %v2695_v33  ;;  %5358 = vmatpush3.msra.mxu1 %v4114_v50  ;;  %v4111_v45 = vld [vmem:[%s7884_s4 + $0x400] sm:$0xff]  ;;  %v2697_v50 = vld [vmem:[#allocation2 + $0xf0] sm:$0xff] }
 0x1f3   : > { %5301 = vmatmul.mubr.f32.gmra.mxu0 %v6788_v12  ;;  %v1347_v0 = vpop.f32.mrf.mxu0  ;;  %5359 = vmatprep.subr.mxu1 %v4113_v47 }
 0x1f4   : > { %v1142_v11 = vpop.f32.mrf.mxu1  ;;  %5303 = vmatprep.mubr.f32.mxu0 %v6794_v38  ;;  %v7000_v54 = vadd.f32 %v1347_v0, %v1122_v6  ;;  %5360 = vmatpush3.msra.mxu1 %v4113_v47  ;;  %v2698_v47 = vld [vmem:[#allocation2 + $0xf8] sm:$0xff]  ;;  %v2699_v0 = vld [vmem:[#allocation2 + $0x108] sm:$0xff] }
 0x1f5   : > { %v4825_v46 = vpop.f32.mrf.mxu0  ;;  %5227 = vmatmul.mubr.f32.gmra.mxu1 %v2696_v59  ;;  %5361 = vmatprep.subr.mxu1 %v4112_v2 }
 0x1f6   : > { %v4751_v44 = vpop.f32.mrf.mxu1  ;;  %v7005_v43 = vadd.f32 %v4825_v46, %v4745_v17  ;;  %5229 = vmatprep.mubr.f32.mxu1 %v2697_v50  ;;  %5362 = vmatpush3.msra.mxu1 %v4112_v2  ;;  %v2700_v46 = vld [vmem:[#allocation2 + $0x110] sm:$0xff]  ;;  %v2701_v50 = vld [vmem:[#allocation2 + $0x120] sm:$0xff] }
 0x1f7   : > { %5304 = vmatmul.mubr.f32.gmra.mxu0 %v6802_v41  ;;  %v1357_v12 = vpop.f32.mrf.mxu0  ;;  %5363 = vmatprep.subr.mxu1 %v4111_v45 }
 0x1f8   : > { %v1152_v38 = vpop.f32.mrf.mxu1  ;;  %5306 = vmatprep.mubr.f32.mxu0 %v6808_v8  ;;  %v7009_v6 = vadd.f32 %v1357_v12, %v1132_v37  ;;  %5364 = vmatpush3.msra.mxu1 %v4111_v45 }
 0x1f9   : > { %v4828_v33 = vpop.f32.mrf.mxu0  ;;  %5230 = vmatmul.mubr.f32.gmra.mxu1 %v2698_v47  ;;  %v2702_v47 = vld [vmem:[#allocation2 + $0x128] sm:$0xff] }
 0x1fa   : > { %v7011_v59 = vadd.f32 %v4828_v33, %v4748_v3  ;;  %5232 = vmatprep.mubr.f32.mxu1 %v2699_v0  ;;  %v4754_v17 = vpop.f32.mrf.mxu1 }
 0x1fb   : > { %5307 = vmatmul.mubr.f32.gmra.mxu0 %v6816_v40  ;;  %v1367_v2 = vpop.f32.mrf.mxu0 }
 0x1fc   : > { %5309 = vmatprep.mubr.f32.mxu0 %v6819_v57  ;;  %v7015_v41 = vadd.f32 %v1367_v2, %v1142_v11  ;;  %v1162_v8 = vpop.f32.mrf.mxu1  ;;  %v2703_v57 = vld [vmem:[#allocation2 + $0x138] sm:$0xff]  ;;  %v2704_v2 = vld [vmem:[#allocation2 + $0x140] sm:$0xff] }
 0x1fd   : > { %v4831_v37 = vpop.f32.mrf.mxu0  ;;  %5233 = vmatmul.mubr.f32.gmra.mxu1 %v2700_v46 }
 0x1fe   : > { %v7017_v45 = vadd.f32 %v4831_v37, %v4751_v44  ;;  %5235 = vmatprep.mubr.f32.mxu1 %v2701_v50 }
 0x1ff   : > { %5310 = vmatmul.mubr.f32.gmra.mxu0 %v6830_v51  ;;  %v1377_v3 = vpop.f32.mrf.mxu0  ;;  %v4757_v12 = vpop.f32.mrf.mxu1 }
 0x200   : > { %5312 = vmatprep.mubr.f32.mxu0 %v6836_v55  ;;  %v7021_v40 = vadd.f32 %v1377_v3, %v1152_v38  ;;  %v2705_v55 = vld [vmem:[#allocation2 + $0x150] sm:$0xff] }
 0x201   : > { %5236 = vmatmul.mubr.f32.gmra.mxu1 %v2702_v47  ;;  %v1172_v11 = vpop.f32.mrf.mxu1 }
 0x202   : > { %v4834_v33 = vpop.f32.mrf.mxu0  ;;  %5238 = vmatprep.mubr.f32.mxu1 %v2703_v57 }
 0x203   : > { %v7023_v0 = vadd.f32 %v4834_v33, %v4754_v17  ;;  %5313 = vmatmul.mubr.f32.gmra.mxu0 %v6844_v56  ;;  %v4760_v44 = vpop.f32.mrf.mxu1  ;;  %v2706_v56 = vld [vmem:[#allocation2 + $0x158] sm:$0xff] }
 0x204   : > { %5315 = vmatprep.mubr.f32.mxu0 %v6850_v1  ;;  %v1387_v51 = vpop.f32.mrf.mxu0  ;;  %v2707_v1 = vld [vmem:[#allocation2 + $0x168] sm:$0xff] }
 0x205   : > { %v7027_v46 = vadd.f32 %v1387_v51, %v1162_v8  ;;  %5239 = vmatmul.mubr.f32.gmra.mxu1 %v2704_v2  ;;  %v1182_v38 = vpop.f32.mrf.mxu1 }
 0x206   : > { %5241 = vmatprep.mubr.f32.mxu1 %v2705_v55 }
 0x207   : > { %v4837_v37 = vpop.f32.mrf.mxu0  ;;  %5316 = vmatmul.mubr.f32.gmra.mxu0 %v6858_v39  ;;  %v4763_v50 = vpop.f32.mrf.mxu1  ;;  %v2708_v39 = vld [vmem:[#allocation2 + $0x170] sm:$0xff] }
 0x208   : > { %v7030_v3 = vadd.f32 %v4837_v37, %v4757_v12  ;;  %5318 = vmatprep.mubr.f32.mxu0 %v6861_v63 }
 0x209   : > { %v1397_v17 = vpop.f32.mrf.mxu0  ;;  %5242 = vmatmul.mubr.f32.gmra.mxu1 %v2706_v56  ;;  %v1192_v47 = vpop.f32.mrf.mxu1  ;;  %v5678_v56 = vld [vmem:[#allocation2] sm:$0xff] }
 0x20a   : > { %v7033_v57 = vadd.f32 %v1397_v17, %v1172_v11  ;;  %5244 = vmatprep.mubr.f32.mxu1 %v2707_v1 }
 0x20b   : > { %v4840_v8 = vpop.f32.mrf.mxu0  ;;  %5319 = vmatmul.mubr.f32.gmra.mxu0 %v6872_v15  ;;  %v4766_v33 = vpop.f32.mrf.mxu1 }
 0x20c   : > { %v7036_v51 = vadd.f32 %v4840_v8, %v4760_v44  ;;  %5321 = vmatprep.mubr.f32.mxu0 %v6878_v53 }
 0x20d   : > { %v1407_v12 = vpop.f32.mrf.mxu0  ;;  %5245 = vmatmul.mubr.f32.gmra.mxu1 %v2708_v39  ;;  %v1202_v63 = vpop.f32.mrf.mxu1 }
 0x20e   : > { %v7039_v2 = vadd.f32 %v1407_v12, %v1182_v38  ;;  %5247 = vmatprep.mubr.f32.mxu1 %v6694_v7  ;;  %v3015_v7 = vld [vmem:[#allocation2 + $0x181] sm:$0xff] }
 0x20f   : > { %v4843_v55 = vpop.f32.mrf.mxu0  ;;  %5322 = vmatmul.mubr.f32.gmra.mxu0 %v6886_v4  ;;  %v4769_v11 = vpop.f32.mrf.mxu1 }
 0x210   : > { %v7043_v37 = vadd.f32 %v4843_v55, %v4763_v50  ;;  %5324 = vmatprep.mubr.f32.mxu0 %v6892_v9  ;;  %v3017_v50 = vld [vmem:[#allocation2 + $0x199] sm:$0xff] }
 0x211   : > { %v1417_v15 = vpop.f32.mrf.mxu0  ;;  %5248 = vmatmul.mubr.f32.gmra.mxu1 %v6703_v62  ;;  %v1212_v53 = vpop.f32.mrf.mxu1  ;;  %v3293_v9 = vld [vmem:[#allocation2 + $0x32] sm:$0xff]  ;;  %v3016_v62 = vld [vmem:[#allocation2 + $0x189] sm:$0xff] }
 0x212   : > { %v7047_v44 = vadd.f32 %v1417_v15, %v1192_v47  ;;  %5250 = vmatprep.mubr.f32.mxu1 %v5678_v56  ;;  %v3294_v15 = vld [vmem:[#allocation2 + $0x3a] sm:$0xff] }
 0x213   : > { %v4846_v38 = vpop.f32.mrf.mxu0  ;;  %5325 = vmatmul.mubr.f32.gmra.mxu0 %v6900_v52  ;;  %v4772_v17 = vpop.f32.mrf.mxu1  ;;  %v3018_v52 = vld [vmem:[#allocation2 + $0x1a1] sm:$0xff] }
 0x214   : > { %v7050_v1 = vadd.f32 %v4846_v38, %v4766_v33  ;;  %5327 = vmatprep.mubr.f32.mxu0 %v3015_v7 }
 0x215   : > { %v1427_v4 = vpop.f32.mrf.mxu0  ;;  %5251 = vmatmul.mubr.f32.gmra.mxu1 %v5678_v56  ;;  %v1222_v8 = vpop.f32.mrf.mxu1  ;;  %v3295_v56 = vld [vmem:[#allocation2 + $0x4a] sm:$0xff] }
 0x216   : > { %v7052_v39 = vadd.f32 %v1427_v4, %v1202_v63  ;;  %5365 = vmatprep.mubr.f32.mxu1 %v3293_v9 }
 0x217   : > { %v4849_v47 = vpop.f32.mrf.mxu0  ;;  %5328 = vmatmul.mubr.f32.gmra.mxu0 %v3016_v62  ;;  %v4887_v12 = vpop.f32.mrf.mxu1  ;;  %v3296_v62 = vld [vmem:[#allocation2 + $0x52] sm:$0xff] }
 0x218   : > { %v7054_v55 = vadd.f32 %v4849_v47, %v4769_v11  ;;  %5330 = vmatprep.mubr.f32.mxu0 %v3017_v50  ;;  %v1731_v33 = vadd.f32 %v4887_v12, %v6489_v61  ;;  %v3297_v47 = vld [vmem:[#allocation2 + $0x62] sm:$0xff]  ;;  %v1298_v12 = vadd.f32 %v6935_v10, %v6916_v35 }
 0x219   : > { %v1437_v38 = vpop.f32.mrf.mxu0  ;;  %5366 = vmatmul.mubr.f32.vlgmr.msra.gmra.mxu1 %v3294_v15  ;;  %v1571_v7 = vpop.f32.mrf.mxu1 }
 0x21a   : > { %v7057_v30 = vadd.f32 %v1437_v38, %v1212_v53  ;;  %5368 = vmatprep.mubr.f32.mxu1 %v3295_v56 }
 0x21b   : > { %v4852_v63 = vpop.f32.mrf.mxu0  ;;  %5331 = vmatmul.mubr.f32.gmra.mxu0 %v3018_v52  ;;  %v4890_v4 = vpop.f32.mrf.mxu1 }
 0x21c   : > { %v7059_v9 = vadd.f32 %v4852_v63, %v4772_v17  ;;  %v1733_v11 = vadd.f32 %v4890_v4, %v6945_v13  ;;  %v1730_v17 = vadd.f32 %v1571_v7, %v1298_v12  ;;  %v3298_v63 = vld [vmem:[#allocation2 + $0x6a] sm:$0xff] }
 0x21d   : > { %v1447_v50 = vpop.f32.mrf.mxu0  ;;  %5369 = vmatmul.mubr.f32.gmra.mxu1 %v3296_v62  ;;  %v1581_v61 = vpop.f32.mrf.mxu1  ;;  %v3299_v62 = vld [vmem:[#allocation2 + $0x7a] sm:$0xff] }
 0x21e   : > { %v7064_v15 = vadd.f32 %v1447_v50, %v1222_v8  ;;  %5371 = vmatprep.mubr.f32.mxu1 %v3297_v47  ;;  %v1732_v53 = vadd.f32 %v1581_v61, %v6951_v58  ;;  %v3300_v50 = vld [vmem:[#allocation2 + $0x82] sm:$0xff] }
 0x21f   : > { %v4967_v38 = vpop.f32.mrf.mxu0  ;;  %v4893_v52 = vpop.f32.mrf.mxu1 }
 0x220   : > { %v7067_v56 = vadd.f32 %v4967_v38, %v1731_v33  ;;  %v1735_v13 = vadd.f32 %v4893_v52, %v6957_v42  ;;  %v3301_v42 = vld [vmem:[#allocation2 + $0x92] sm:$0xff] }
 0x221   : > { %v1877_v4 = vpop.f32.mrf.mxu0  ;;  %5372 = vmatmul.mubr.f32.gmra.mxu1 %v3298_v63  ;;  %v1591_v31 = vpop.f32.mrf.mxu1 }
 0x222   : > { %v7070_v28 = vadd.f32 %v1877_v4, %v1730_v17  ;;  %5374 = vmatprep.mubr.f32.mxu1 %v3299_v62  ;;  %v1734_v35 = vadd.f32 %v1591_v31, %v6963_v36  ;;  %v3302_v36 = vld [vmem:[#allocation2 + $0x9a] sm:$0xff] }
 0x223   : > { %v4970_v10 = vpop.f32.mrf.mxu0  ;;  %v4896_v8 = vpop.f32.mrf.mxu1 }
 0x224   : > { %v7073_v58 = vadd.f32 %v4970_v10, %v1733_v11  ;;  %v1737_v33 = vadd.f32 %v4896_v8, %v6969_v32  ;;  %v3303_v32 = vld [vmem:[#allocation2 + $0xaa] sm:$0xff] }
 0x225   : > { %v1887_v7 = vpop.f32.mrf.mxu0  ;;  %5375 = vmatmul.mubr.f32.gmra.mxu1 %v3300_v50  ;;  %v1601_v47 = vpop.f32.mrf.mxu1 }
 0x226   : > { %v7076_v61 = vadd.f32 %v1887_v7, %v1732_v53  ;;  %5377 = vmatprep.mubr.f32.mxu1 %v3301_v42  ;;  %v1736_v12 = vadd.f32 %v1601_v47, %v6975_v49 }
 0x227   : > { %v4973_v38 = vpop.f32.mrf.mxu0  ;;  %v4899_v52 = vpop.f32.mrf.mxu1 }
 0x228   : > { %v7079_v17 = vadd.f32 %v4973_v38, %v1735_v13  ;;  %v1739_v31 = vadd.f32 %v4899_v52, %v6981_v48  ;;  %v3304_v13 = vld [vmem:[#allocation2 + $0xb2] sm:$0xff]  ;;  %v3305_v48 = vld [vmem:[#allocation2 + $0xc2] sm:$0xff] }
 0x229   : > { %v1897_v11 = vpop.f32.mrf.mxu0  ;;  %5378 = vmatmul.mubr.f32.gmra.mxu1 %v3302_v36  ;;  %v1611_v63 = vpop.f32.mrf.mxu1 }
 0x22a   : > { %v7082_v4 = vadd.f32 %v1897_v11, %v1734_v35  ;;  %5380 = vmatprep.mubr.f32.mxu1 %v3303_v32  ;;  %v1738_v53 = vadd.f32 %v1611_v63, %v6987_v34 }
 0x22b   : > { %v4976_v62 = vpop.f32.mrf.mxu0  ;;  %v4902_v10 = vpop.f32.mrf.mxu1 }
 0x22c   : > { %v7085_v8 = vadd.f32 %v4976_v62, %v1737_v33  ;;  %v1741_v49 = vadd.f32 %v4902_v10, %v6993_v60  ;;  %v3306_v33 = vld [vmem:[#allocation2 + $0xca] sm:$0xff]  ;;  %v3307_v60 = vld [vmem:[#allocation2 + $0xda] sm:$0xff] }
 0x22d   : > { %v1907_v50 = vpop.f32.mrf.mxu0  ;;  %5381 = vmatmul.mubr.f32.gmra.mxu1 %v3304_v13  ;;  %v1621_v7 = vpop.f32.mrf.mxu1 }
 0x22e   : > { %v7088_v42 = vadd.f32 %v1907_v50, %v1736_v12  ;;  %5383 = vmatprep.mubr.f32.mxu1 %v3305_v48  ;;  %v1740_v35 = vadd.f32 %v1621_v7, %v7000_v54 }
 0x22f   : > { %v4979_v47 = vpop.f32.mrf.mxu0  ;;  %v4905_v38 = vpop.f32.mrf.mxu1 }
 0x230   : > { %v7091_v52 = vadd.f32 %v4979_v47, %v1739_v31  ;;  %v1743_v34 = vadd.f32 %v4905_v38, %v7005_v43  ;;  %v3308_v31 = vld [vmem:[#allocation2 + $0xe2] sm:$0xff]  ;;  %v3309_v43 = vld [vmem:[#allocation2 + $0xf2] sm:$0xff] }
 0x231   : > { %v1917_v36 = vpop.f32.mrf.mxu0  ;;  %5384 = vmatmul.mubr.f32.gmra.mxu1 %v3306_v33  ;;  %v1631_v11 = vpop.f32.mrf.mxu1 }
 0x232   : > { %v7094_v32 = vadd.f32 %v1917_v36, %v1738_v53  ;;  %5386 = vmatprep.mubr.f32.mxu1 %v3307_v60  ;;  %v1742_v12 = vadd.f32 %v1631_v11, %v7009_v6 }
 0x233   : > { %v4982_v63 = vpop.f32.mrf.mxu0  ;;  %v4908_v62 = vpop.f32.mrf.mxu1 }
 0x234   : > { %v7097_v10 = vadd.f32 %v4982_v63, %v1741_v49  ;;  %v1745_v54 = vadd.f32 %v4908_v62, %v7011_v59  ;;  %v3310_v49 = vld [vmem:[#allocation2 + $0xfa] sm:$0xff]  ;;  %v3311_v59 = vld [vmem:[#allocation2 + $0x10a] sm:$0xff] }
 0x235   : > { %v1927_v13 = vpop.f32.mrf.mxu0  ;;  %5387 = vmatmul.mubr.f32.gmra.mxu1 %v3308_v31  ;;  %v1641_v50 = vpop.f32.mrf.mxu1 }
 0x236   : > { %v7100_v48 = vadd.f32 %v1927_v13, %v1740_v35  ;;  %5389 = vmatprep.mubr.f32.mxu1 %v3309_v43  ;;  %v1744_v53 = vadd.f32 %v1641_v50, %v7015_v41 }
 0x237   : > { %v4985_v7 = vpop.f32.mrf.mxu0  ;;  %v4911_v47 = vpop.f32.mrf.mxu1 }
 0x238   : > { %v7103_v38 = vadd.f32 %v4985_v7, %v1743_v34  ;;  %v1747_v6 = vadd.f32 %v4911_v47, %v7017_v45  ;;  %v3312_v34 = vld [vmem:[#allocation2 + $0x112] sm:$0xff]  ;;  %v3313_v45 = vld [vmem:[#allocation2 + $0x122] sm:$0xff] }
 0x239   : > { %v1937_v33 = vpop.f32.mrf.mxu0  ;;  %5390 = vmatmul.mubr.f32.gmra.mxu1 %v3310_v49  ;;  %v1651_v36 = vpop.f32.mrf.mxu1 }
 0x23a   : > { %v7106_v60 = vadd.f32 %v1937_v33, %v1742_v12  ;;  %5392 = vmatprep.mubr.f32.mxu1 %v3311_v59  ;;  %v1746_v35 = vadd.f32 %v1651_v36, %v7021_v40 }
 0x23b   : > { %v4988_v11 = vpop.f32.mrf.mxu0  ;;  %v4914_v63 = vpop.f32.mrf.mxu1 }
 0x23c   : > { %v7109_v62 = vadd.f32 %v4988_v11, %v1745_v54  ;;  %v1749_v41 = vadd.f32 %v4914_v63, %v7023_v0  ;;  %v3314_v54 = vld [vmem:[#allocation2 + $0x12a] sm:$0xff]  ;;  %v3315_v0 = vld [vmem:[#allocation2 + $0x13a] sm:$0xff] }
 0x23d   : > { %v1947_v31 = vpop.f32.mrf.mxu0  ;;  %5393 = vmatmul.mubr.f32.gmra.mxu1 %v3312_v34  ;;  %v1661_v13 = vpop.f32.mrf.mxu1 }
 0x23e   : > { %v7112_v43 = vadd.f32 %v1947_v31, %v1744_v53  ;;  %5395 = vmatprep.mubr.f32.mxu1 %v3313_v45  ;;  %v1748_v12 = vadd.f32 %v1661_v13, %v7027_v46 }
 0x23f   : > { %v4991_v50 = vpop.f32.mrf.mxu0  ;;  %v4917_v7 = vpop.f32.mrf.mxu1 }
 0x240   : > { %v7115_v47 = vadd.f32 %v4991_v50, %v1747_v6  ;;  %v1751_v40 = vadd.f32 %v4917_v7, %v7030_v3  ;;  %v3316_v6 = vld [vmem:[#allocation2 + $0x142] sm:$0xff]  ;;  %v3317_v3 = vld [vmem:[#allocation2 + $0x152] sm:$0xff] }
 0x241   : > { %v1957_v49 = vpop.f32.mrf.mxu0  ;;  %5396 = vmatmul.mubr.f32.gmra.mxu1 %v3314_v54  ;;  %v1671_v33 = vpop.f32.mrf.mxu1 }
 0x242   : > { %v7118_v59 = vadd.f32 %v1957_v49, %v1746_v35  ;;  %5398 = vmatprep.mubr.f32.mxu1 %v3315_v0  ;;  %v1750_v53 = vadd.f32 %v1671_v33, %v7033_v57 }
 0x243   : > { %v4994_v36 = vpop.f32.mrf.mxu0  ;;  %v4920_v11 = vpop.f32.mrf.mxu1 }
 0x244   : > { %v7121_v63 = vadd.f32 %v4994_v36, %v1749_v41  ;;  %v1753_v46 = vadd.f32 %v4920_v11, %v7036_v51  ;;  %v3318_v41 = vld [vmem:[#allocation2 + $0x15a] sm:$0xff]  ;;  %v3319_v51 = vld [vmem:[#allocation2 + $0x16a] sm:$0xff] }
 0x245   : > { %v1967_v34 = vpop.f32.mrf.mxu0  ;;  %5399 = vmatmul.mubr.f32.gmra.mxu1 %v3316_v6  ;;  %v1681_v31 = vpop.f32.mrf.mxu1 }
 0x246   : > { %v7124_v45 = vadd.f32 %v1967_v34, %v1748_v12  ;;  %5401 = vmatprep.mubr.f32.mxu1 %v3317_v3  ;;  %v1752_v35 = vadd.f32 %v1681_v31, %v7039_v2 }
 0x247   : > { %v4997_v13 = vpop.f32.mrf.mxu0  ;;  %v4923_v50 = vpop.f32.mrf.mxu1 }
 0x248   : > { %v7127_v7 = vadd.f32 %v4997_v13, %v1751_v40  ;;  %v1755_v57 = vadd.f32 %v4923_v50, %v7043_v37  ;;  %v3320_v40 = vld [vmem:[#allocation2 + $0x172] sm:$0xff]  ;;  %v3323_v13 = vld [vmem:[#allocation2 + $0x19a] sm:$0xff] }
 0x249   : > { %v1977_v54 = vpop.f32.mrf.mxu0  ;;  %5402 = vmatmul.mubr.f32.gmra.mxu1 %v3318_v41  ;;  %v1691_v49 = vpop.f32.mrf.mxu1 }
 0x24a   : > { %v7130_v0 = vadd.f32 %v1977_v54, %v1750_v53  ;;  %5404 = vmatprep.mubr.f32.mxu1 %v3319_v51  ;;  %v1754_v12 = vadd.f32 %v1691_v49, %v7047_v44  ;;  %v3324_v54 = vld [vmem:[#allocation2 + $0x1a2] sm:$0xff] }
 0x24b   : > { %v5000_v33 = vpop.f32.mrf.mxu0  ;;  %v4926_v36 = vpop.f32.mrf.mxu1 }
 0x24c   : > { %v7133_v11 = vadd.f32 %v5000_v33, %v1753_v46  ;;  %v1757_v2 = vadd.f32 %v4926_v36, %v7050_v1 }
 0x24d   : > { %v1987_v6 = vpop.f32.mrf.mxu0  ;;  %5405 = vmatmul.mubr.f32.gmra.mxu1 %v3320_v40  ;;  %v1701_v37 = vpop.f32.mrf.mxu1 }
 0x24e   : > { %v7136_v34 = vadd.f32 %v1987_v6, %v1752_v35  ;;  %5407 = vmatprep.mubr.f32.mxu1 %v6919_v14  ;;  %v1756_v53 = vadd.f32 %v1701_v37, %v7052_v39 }
 0x24f   : > { %v5003_v3 = vpop.f32.mrf.mxu0  ;;  %v4929_v31 = vpop.f32.mrf.mxu1 }
 0x250   : > { %v7140_v44 = vadd.f32 %v5003_v3, %v1755_v57  ;;  %v1759_v46 = vadd.f32 %v4929_v31, %v7054_v55 }
 0x251   : > { %v1997_v50 = vpop.f32.mrf.mxu0  ;;  %5408 = vmatmul.mubr.f32.gmra.mxu1 %v6925_v16  ;;  %v1711_v1 = vpop.f32.mrf.mxu1 }
 0x252   : > { %v7144_v41 = vadd.f32 %v1997_v50, %v1754_v12  ;;  %v1758_v35 = vadd.f32 %v1711_v1, %v7057_v30  ;;  %5410 = vmatprep.mubr.f32.mxu1 %v3323_v13 }
 0x253   : > { %v5006_v14 = vpop.f32.mrf.mxu0  ;;  %v4932_v51 = vpop.f32.mrf.mxu1 }
 0x254   : > { %v7147_v39 = vadd.f32 %v5006_v14, %v1757_v2  ;;  %v1761_v49 = vadd.f32 %v4932_v51, %v7059_v9 }
 0x255   : > { %v2007_v57 = vpop.f32.mrf.mxu0  ;;  %5411 = vmatmul.mubr.f32.gmra.mxu1 %v3324_v54  ;;  %v1721_v33 = vpop.f32.mrf.mxu1 }
 0x256   : > { %v7150_v55 = vadd.f32 %v2007_v57, %v1756_v53  ;;  %v1760_v16 = vadd.f32 %v1721_v33, %v7064_v15 }
 0x257   : > { %v5009_v36 = vpop.f32.mrf.mxu0 }
 0x258   : > { %v7153_v12 = vadd.f32 %v5009_v36, %v1759_v46 }
 0x259   : > { %v2017_v40 = vpop.f32.mrf.mxu0  ;;  %v5047_v30 = vpop.f32.mrf.mxu1 }
 0x25a   : > { %v7155_v6 = vadd.f32 %v2017_v40, %v1758_v35  ;;  %v7158_v37 = vadd.f32 %v5047_v30, %v7067_v56 }
 0x25b   : > { %v5012_v2 = vpop.f32.mrf.mxu0  ;;  %v2183_v3 = vpop.f32.mrf.mxu1 }
 0x25c   : > { %v7160_v9 = vadd.f32 %v5012_v2, %v1761_v49  ;;  %v7163_v31 = vadd.f32 %v2183_v3, %v7070_v28 }
 0x25d   : > { %v2027_v53 = vpop.f32.mrf.mxu0  ;;  %v5050_v13 = vpop.f32.mrf.mxu1 }
 0x25e   : > { %v7165_v15 = vadd.f32 %v2027_v53, %v1760_v16  ;;  %v7168_v46 = vadd.f32 %v5050_v13, %v7073_v58 }
 0x25f   : > { %v7170_v50 = vpop.f32.mrf.mxu0  ;;  %v2193_v1 = vpop.f32.mrf.mxu1 }
 0x260   : > { %v7173_v56 = vadd.f32 %v2193_v1, %v7076_v61 }
 0x261   : > { %v7175_v35 = vpop.f32.mrf.mxu0  ;;  %v5053_v54 = vpop.f32.mrf.mxu1 }
 0x262   : > { %v7178_v14 = vadd.f32 %v5053_v54, %v7079_v17 }
 0x263   : > { %v7180_v28 = vpop.f32.mrf.mxu0  ;;  %v2203_v51 = vpop.f32.mrf.mxu1 }
 0x264   : > { %v7183_v49 = vadd.f32 %v2203_v51, %v7082_v4 }
 0x265   : > { %v7185_v58 = vpop.f32.mrf.mxu0  ;;  %v5056_v57 = vpop.f32.mrf.mxu1 }
 0x266   : > { %v7188_v33 = vadd.f32 %v5056_v57, %v7085_v8 }
 0x267   : > { %v7190_v61 = vpop.f32.mrf.mxu0  ;;  %v2213_v16 = vpop.f32.mrf.mxu1 }
 0x268   : > { %v7193_v36 = vadd.f32 %v2213_v16, %v7088_v42 }
 0x269   : > { %v7195_v17 = vpop.f32.mrf.mxu0  ;;  %v5059_v40 = vpop.f32.mrf.mxu1 }
 0x26a   : > { %v7198_v30 = vadd.f32 %v5059_v40, %v7091_v52 }
 0x26b   : > { %v7200_v4 = vpop.f32.mrf.mxu0  ;;  %v2223_v2 = vpop.f32.mrf.mxu1 }
 0x26c   : > { %v7203_v3 = vadd.f32 %v2223_v2, %v7094_v32 }
 0x26d   : > { %v7205_v8 = vpop.f32.mrf.mxu0  ;;  %v5062_v53 = vpop.f32.mrf.mxu1 }
 0x26e   : > { %v7208_v13 = vadd.f32 %v5062_v53, %v7097_v10 }
 0x26f   : > { %v7210_v42 = vpop.f32.mrf.mxu0  ;;  %v2233_v1 = vpop.f32.mrf.mxu1 }
 0x270   : > { %v7213_v54 = vadd.f32 %v2233_v1, %v7100_v48 }
 0x271   : > { %v7215_v52 = vpop.f32.mrf.mxu0  ;;  %v5065_v51 = vpop.f32.mrf.mxu1 }
 0x272   : > { %v7218_v57 = vadd.f32 %v5065_v51, %v7103_v38 }
 0x273   : > { %v7220_v32 = vpop.f32.mrf.mxu0  ;;  %v2243_v16 = vpop.f32.mrf.mxu1 }
 0x274   : > { %v7223_v40 = vadd.f32 %v2243_v16, %v7106_v60 }
 0x275   : > { %v7225_v10 = vpop.f32.mrf.mxu0  ;;  %v5068_v2 = vpop.f32.mrf.mxu1 }
 0x276   : > { %v7228_v53 = vadd.f32 %v5068_v2, %v7109_v62 }
 0x277   : > { %v7230_v48 = vpop.f32.mrf.mxu0  ;;  %v2253_v1 = vpop.f32.mrf.mxu1 }
 0x278   : > { %v7233_v29 = vadd.f32 %v2253_v1, %v7112_v43 }
 0x279   : > { %v7235_v38 = vpop.f32.mrf.mxu0  ;;  %v5071_v51 = vpop.f32.mrf.mxu1 }
 0x27a   : > { %v7238_v26 = vadd.f32 %v5071_v51, %v7115_v47 }
 0x27b   : > { %v7240_v60 = vpop.f32.mrf.mxu0  ;;  %v2263_v16 = vpop.f32.mrf.mxu1 }
 0x27c   : > { %v7243_v27 = vadd.f32 %v2263_v16, %v7118_v59 }
 0x27d   : > { %v7245_v62 = vpop.f32.mrf.mxu0  ;;  %v5074_v2 = vpop.f32.mrf.mxu1 }
 0x27e   : > { %v7248_v24 = vadd.f32 %v5074_v2, %v7121_v63 }
 0x27f   : > { %v7250_v43 = vpop.f32.mrf.mxu0  ;;  %v2273_v1 = vpop.f32.mrf.mxu1 }
 0x280   : > { %v7253_v25 = vadd.f32 %v2273_v1, %v7124_v45 }
 0x281   : > { %v7255_v47 = vpop.f32.mrf.mxu0  ;;  %v5077_v51 = vpop.f32.mrf.mxu1 }
 0x282   : > { %7950 = vst [vmem:[#allocation34_spill] sm:$0xff] %v7253_v25  ;;  %v2363_v22 = vadd.f32 %v5077_v51, %v7127_v7 }
 0x283   : > { %v7258_v23 = vpop.f32.mrf.mxu0  ;;  %v2283_v59 = vpop.f32.mrf.mxu1 }
 0x284   : > { %7951 = vst [vmem:[#allocation35_spill] sm:$0xff] %v7258_v23  ;;  %v2362_v16 = vadd.f32 %v2283_v59, %v7130_v0 }
 0x285   : > { %v7261_v20 = vpop.f32.mrf.mxu0  ;;  %v5080_v63 = vpop.f32.mrf.mxu1 }
 0x286   : > { %7952 = vst [vmem:[#allocation36_spill] sm:$0xff] %v7261_v20  ;;  %v2365_v2 = vadd.f32 %v5080_v63, %v7133_v11 }
 0x287   : > { %v5157_v21 = vpop.f32.mrf.mxu0  ;;  %v2293_v18 = vpop.f32.mrf.mxu1 }
 0x288   : > { %v7264_v19 = vadd.f32 %v5157_v21, %v2363_v22  ;;  %v2364_v45 = vadd.f32 %v2293_v18, %v7136_v34 }
 0x289   : > { %v2589_v1 = vpop.f32.mrf.mxu0  ;;  %v5083_v5 = vpop.f32.mrf.mxu1 }
 0x28a   : > { %v7267_v25 = vadd.f32 %v2589_v1, %v2362_v16  ;;  %v2367_v7 = vadd.f32 %v5083_v5, %v7140_v44 }
 0x28b   : > { %v5160_v51 = vpop.f32.mrf.mxu0  ;;  %v2303_v23 = vpop.f32.mrf.mxu1 }
 0x28c   : > { %v7270_v0 = vadd.f32 %v5160_v51, %v2365_v2  ;;  %v2366_v59 = vadd.f32 %v2303_v23, %v7144_v41 }
 0x28d   : > { %v2599_v20 = vpop.f32.mrf.mxu0  ;;  %v5086_v11 = vpop.f32.mrf.mxu1 }
 0x28e   : > { %v7273_v63 = vadd.f32 %v2599_v20, %v2364_v45  ;;  %v2369_v21 = vadd.f32 %v5086_v11, %v7147_v39 }
 0x28f   : > { %v5163_v22 = vpop.f32.mrf.mxu0  ;;  %v2313_v18 = vpop.f32.mrf.mxu1 }
 0x290   : > { %v7276_v34 = vadd.f32 %v5163_v22, %v2367_v7  ;;  %v2368_v16 = vadd.f32 %v2313_v18, %v7150_v55 }
 0x291   : > { %v2609_v1 = vpop.f32.mrf.mxu0  ;;  %v5089_v5 = vpop.f32.mrf.mxu1 }
 0x292   : > { %v7279_v44 = vadd.f32 %v2609_v1, %v2366_v59  ;;  %v2371_v2 = vadd.f32 %v5089_v5, %v7153_v12 }
 0x293   : > { %v5166_v51 = vpop.f32.mrf.mxu0  ;;  %v2323_v23 = vpop.f32.mrf.mxu1 }
 0x294   : > { %v7282_v41 = vadd.f32 %v5166_v51, %v2369_v21  ;;  %v2370_v20 = vadd.f32 %v2323_v23, %v7155_v6 }
 0x295   : > { %v2619_v45 = vpop.f32.mrf.mxu0  ;;  %v5092_v39 = vpop.f32.mrf.mxu1 }
 0x296   : > { %v7285_v11 = vadd.f32 %v2619_v45, %v2368_v16  ;;  %v2373_v7 = vadd.f32 %v5092_v39, %v7160_v9 }
 0x297   : > { %v5169_v22 = vpop.f32.mrf.mxu0  ;;  %v2333_v55 = vpop.f32.mrf.mxu1 }
 0x298   : > { %v7288_v18 = vadd.f32 %v5169_v22, %v2371_v2  ;;  %v2372_v59 = vadd.f32 %v2333_v55, %v7165_v15 }
 0x299   : > { %v2629_v1 = vpop.f32.mrf.mxu0  ;;  %v7291_v12 = vpop.f32.mrf.mxu1 }
 0x29a   : > { %v7293_v5 = vadd.f32 %v2629_v1, %v2370_v20 }
 0x29b   : > { %v5172_v21 = vpop.f32.mrf.mxu0  ;;  %v7295_v51 = vpop.f32.mrf.mxu1 }
 0x29c   : > { %v7297_v6 = vadd.f32 %v5172_v21, %v2373_v7 }
 0x29d   : > { %v2639_v16 = vpop.f32.mrf.mxu0  ;;  %v7299_v23 = vpop.f32.mrf.mxu1 }
 0x29e   : > { %v7301_v9 = vadd.f32 %v2639_v16, %v2372_v59 }
 0x29f   : > { %v7303_v45 = vpop.f32.mrf.mxu0  ;;  %v7305_v2 = vpop.f32.mrf.mxu1 }
 0x2a0   : > { %7953 = vst [vmem:[#allocation37_spill] sm:$0xff] %v7301_v9 }
 0x2a1   : > { %v7307_v15 = vpop.f32.mrf.mxu0  ;;  %v7309_v39 = vpop.f32.mrf.mxu1 }
 0x2a2   : > { %7954 = vst [vmem:[#allocation38_spill] sm:$0xff] %v7307_v15  ;;  %7955 = vst [vmem:[#allocation39_spill] sm:$0xff] %v7309_v39 }
 0x2a3   : > { %v7311_v20 = vpop.f32.mrf.mxu0  ;;  %v7313_v22 = vpop.f32.mrf.mxu1 }
 0x2a4   : > { %7956 = vst [vmem:[#allocation40_spill] sm:$0xff] %v7311_v20  ;;  %7957 = vst [vmem:[#allocation41_spill] sm:$0xff] %v7313_v22 }
 0x2a5   : > { %v7315_v55 = vpop.f32.mrf.mxu0  ;;  %v7317_v7 = vpop.f32.mrf.mxu1 }
 0x2a6   : > { %7958 = vst [vmem:[#allocation42_spill] sm:$0xff] %v7315_v55  ;;  %7959 = vst [vmem:[#allocation43_spill] sm:$0xff] %v7317_v7 }
 0x2a7   : > { %v7319_v1 = vpop.f32.mrf.mxu0  ;;  %v7321_v59 = vpop.f32.mrf.mxu1 }
 0x2a8   : > { %7960 = vst [vmem:[#allocation44_spill] sm:$0xff] %v7319_v1  ;;  %7961 = vst [vmem:[#allocation45_spill] sm:$0xff] %v7321_v59 }
 0x2a9   : > { %v7323_v21 = vpop.f32.mrf.mxu0  ;;  %v7325_v16 = vpop.f32.mrf.mxu1 }
 0x2aa   : > { %7962 = vst [vmem:[#allocation46_spill] sm:$0xff] %v7323_v21  ;;  %7963 = vst [vmem:[#allocation47_spill] sm:$0xff] %v7325_v16 }
 0x2ab   : > { %v7327_v9 = vpop.f32.mrf.mxu0  ;;  %v7329_v15 = vpop.f32.mrf.mxu1 }
 0x2ac   : > { %7964 = vst [vmem:[#allocation48_spill] sm:$0xff] %v7327_v9  ;;  %7965 = vst [vmem:[#allocation49_spill] sm:$0xff] %v7329_v15 }
 0x2ad   : > { %v7331_v39 = vpop.f32.mrf.mxu0  ;;  %v7333_v20 = vpop.f32.mrf.mxu1 }
 0x2ae   : > { %7966 = vst [vmem:[#allocation50_spill] sm:$0xff] %v7331_v39  ;;  %7967 = vst [vmem:[#allocation51_spill] sm:$0xff] %v7333_v20 }
 0x2af   : > { %v7335_v22 = vpop.f32.mrf.mxu0  ;;  %v7337_v55 = vpop.f32.mrf.mxu1 }
 0x2b0   : > { %7968 = vst [vmem:[#allocation52_spill] sm:$0xff] %v7335_v22  ;;  %7969 = vst [vmem:[#allocation53_spill] sm:$0xff] %v7337_v55 }
 0x2b1   : > { %v7339_v7 = vpop.f32.mrf.mxu0  ;;  %v7341_v1 = vpop.f32.mrf.mxu1 }
 0x2b2   : > { %7970 = vst [vmem:[#allocation54_spill] sm:$0xff] %v7339_v7  ;;  %7971 = vst [vmem:[#allocation55_spill] sm:$0xff] %v7341_v1 }
 0x2b3   : > { %v7343_v59 = vpop.f32.mrf.mxu0  ;;  %v7345_v21 = vpop.f32.mrf.mxu1 }
 0x2b4   : > { %7972 = vst [vmem:[#allocation56_spill] sm:$0xff] %v7343_v59  ;;  %7973 = vst [vmem:[#allocation57_spill] sm:$0xff] %v7345_v21 }
 0x2b5   : > { %v7347_v16 = vpop.f32.mrf.mxu0  ;;  %v7349_v9 = vpop.f32.mrf.mxu1 }
 0x2b6   : > { %7974 = vst [vmem:[#allocation58_spill] sm:$0xff] %v7347_v16  ;;  %7975 = vst [vmem:[#allocation59_spill] sm:$0xff] %v7349_v9 }
 0x2b7   : > { %v7351_v15 = vpop.f32.mrf.mxu0  ;;  %v7353_v39 = vpop.f32.mrf.mxu1 }
 0x2b8   : > { %7976 = vst [vmem:[#allocation60_spill] sm:$0xff] %v7351_v15  ;;  %7977 = vst [vmem:[#allocation61_spill] sm:$0xff] %v7353_v39 }
 0x2b9   : > { %v7355_v20 = vpop.f32.mrf.mxu0  ;;  %v7357_v22 = vpop.f32.mrf.mxu1 }
 0x2ba   : > { %7978 = vst [vmem:[#allocation62_spill] sm:$0xff] %v7355_v20  ;;  %7979 = vst [vmem:[#allocation63_spill] sm:$0xff] %v7357_v22 }
 0x2bb   : > { %v7359_v55 = vpop.f32.mrf.mxu0  ;;  %v7361_v7 = vpop.f32.mrf.mxu1 }
 0x2bc   : > { %7980 = vst [vmem:[#allocation64_spill] sm:$0xff] %v7359_v55  ;;  %7981 = vst [vmem:[#allocation65_spill] sm:$0xff] %v7361_v7 }
 0x2bd   : > { %v7363_v1 = vpop.f32.mrf.mxu0  ;;  %v7365_v59 = vpop.f32.mrf.mxu1 }
 0x2be   : > { %7982 = vst [vmem:[#allocation66_spill] sm:$0xff] %v7363_v1  ;;  %7983 = vst [vmem:[#allocation67_spill] sm:$0xff] %v7365_v59 }
 0x2bf   : > { %v7367_v21 = vpop.f32.mrf.mxu0  ;;  %v7369_v16 = vpop.f32.mrf.mxu1 }
 0x2c0   : > { %7984 = vst [vmem:[#allocation68_spill] sm:$0xff] %v7367_v21  ;;  %7985 = vst [vmem:[#allocation69_spill] sm:$0xff] %v7369_v16 }
 0x2c1   : > { %v7371_v9 = vpop.f32.mrf.mxu0  ;;  %v5237_v15 = vpop.f32.mrf.mxu1 }
 0x2c2   : > { %7986 = vst [vmem:[#allocation70_spill] sm:$0xff] %v7371_v9  ;;  %v7374_v39 = vadd.f32 %v5237_v15, %v7264_v19 }
 0x2c3   : > { %v7376_v20 = vpop.f32.mrf.mxu0  ;;  %v2896_v22 = vpop.f32.mrf.mxu1 }
 0x2c4   : > { %7987 = vst [vmem:[#allocation71_spill] sm:$0xff] %v7374_v39  ;;  %7988 = vst [vmem:[#allocation72_spill] sm:$0xff] %v7376_v20  ;;  %v7379_v55 = vadd.f32 %v2896_v22, %v7267_v25 }
 0x2c5   : > { %v7381_v7 = vpop.f32.mrf.mxu0  ;;  %v5240_v1 = vpop.f32.mrf.mxu1 }
 0x2c6   : > { %v7384_v59 = vadd.f32 %v5240_v1, %v7270_v0 }
 0x2c7   : > { %v2906_v21 = vpop.f32.mrf.mxu1  ;;  %v7386_v16 = vpop.f32.mrf.mxu0 }
 0x2c8   : > { %7989 = vst [vmem:[#allocation73_spill] sm:$0xff] %v7384_v59  ;;  %v7389_v9 = vadd.f32 %v2906_v21, %v7273_v63  ;;  %v2648_v21 = vadd.f32 %v7175_v35, %v7163_v31  ;;  %v2654_v31 = vadd.f32 %v7205_v8, %v7193_v36  ;;  %v2659_v35 = vadd.f32 %v7220_v32, %v7208_v13 }
 0x2c9   : > { %v5243_v19 = vpop.f32.mrf.mxu1  ;;  %v7394_v20 = vpop.f32.mrf.mxu0  ;;  %v2662_v36 = vadd.f32 %v7245_v62, %v7233_v29  ;;  %v7995_v62 = vld [vmem:[#allocation37_spill] sm:$0xff] }
 0x2ca   : > { %v7392_v15 = vadd.f32 %v5243_v19, %v7276_v34  ;;  %v2649_v34 = vadd.f32 %v7170_v50, %v7158_v37  ;;  %v2653_v19 = vadd.f32 %v7190_v61, %v7178_v14  ;;  %v2655_v37 = vadd.f32 %v7200_v4, %v7188_v33 }
 0x2cb   : > { %v2916_v39 = vpop.f32.mrf.mxu1  ;;  %v7402_v59 = vpop.f32.mrf.mxu0  ;;  %v2656_v50 = vadd.f32 %v7215_v52, %v7203_v3  ;;  %v2658_v14 = vadd.f32 %v7225_v10, %v7213_v54  ;;  %v2660_v33 = vadd.f32 %v7235_v38, %v7223_v40  ;;  %v2663_v61 = vadd.f32 %v7240_v60, %v7228_v53  ;;  %v7991_v52 = vld [vmem:[#allocation34_spill] sm:$0xff] }
 0x2cc   : > { %v7397_v25 = vadd.f32 %v2916_v39, %v7279_v44  ;;  %v2651_v44 = vadd.f32 %v7180_v28, %v7168_v46  ;;  %v2657_v46 = vadd.f32 %v7210_v42, %v7198_v30  ;;  %v2661_v28 = vadd.f32 %v7230_v48, %v7218_v57  ;;  %v7990_v42 = vld [vmem:[#allocation35_spill] sm:$0xff]  ;;  %v7992_v57 = vld [vmem:[#allocation36_spill] sm:$0xff]  ;;  %v7993_v10 = vld [vmem:[#allocation38_spill] sm:$0xff] }
 0x2cd   : > { %v5246_v22 = vpop.f32.mrf.mxu1  ;;  %v2664_v4 = vadd.f32 %v7255_v47, %v7243_v27  ;;  %v2956_v3 = vadd.f32 %v7291_v12, %v2649_v34  ;;  %v2955_v8 = vadd.f32 %v7295_v51, %v2648_v21  ;;  %v2667_v54 = vadd.f32 %v7990_v42, %v7248_v24  ;;  %v7994_v48 = vld [vmem:[#allocation39_spill] sm:$0xff]  ;;  %v7996_v24 = vld [vmem:[#allocation40_spill] sm:$0xff]  ;;  %v8001_v21 = vld [vmem:[#allocation45_spill] sm:$0xff] }
 0x2ce   : > { %v7400_v0 = vadd.f32 %v5246_v22, %v7282_v41  ;;  %v2650_v41 = vadd.f32 %v7185_v58, %v7173_v56  ;;  %v7460_v29 = vadd.f32 %v7992_v57, %v7991_v52  ;;  %v2960_v38 = vadd.f32 %v7994_v48, %v2653_v19  ;;  %v7491_v57 = vld [vmem:[%s7886_s6] ss:$0 sm:$0xff] }
 0x2cf   : > { %v2926_v1 = vpop.f32.mrf.mxu1  ;;  %v3262_v27 = vadd.f32 %v7303_v45, %v2956_v3  ;;  %v3261_v53 = vadd.f32 %v7993_v10, %v2955_v8  ;;  %v7479_v45 = vld [vmem:[%s7885_s5] ss:$0 sm:$0xff]  ;;  %v8004_v3 = vld [vmem:[#allocation48_spill] sm:$0xff] }
 0x2d0   : > { %v7405_v63 = vadd.f32 %v2926_v1, %v7285_v11  ;;  %v2652_v11 = vadd.f32 %v7195_v17, %v7183_v49  ;;  %v7436_v49 = vpop.f32.mrf.mxu0  ;;  %v2665_v17 = vadd.f32 %v7250_v43, %v7238_v26  ;;  %v2958_v26 = vadd.f32 %v7299_v23, %v2651_v44  ;;  %v8000_v1 = vld [vmem:[#allocation44_spill] sm:$0xff] }
 0x2d1   : > { %v5249_v39 = vpop.f32.mrf.mxu1  ;;  %v2957_v32 = vadd.f32 %v7305_v2, %v2650_v41  ;;  %v3266_v34 = vadd.f32 %v8000_v1, %v2960_v38  ;;  %v2961_v44 = vadd.f32 %v8001_v21, %v2654_v31  ;;  %v8008_v31 = vld [vmem:[#allocation52_spill] sm:$0xff]  ;;  %v8009_v38 = vld [vmem:[#allocation54_spill] sm:$0xff] }
 0x2d2   : > { %v7420_v22 = vadd.f32 %v5249_v39, %v7288_v18  ;;  %v7467_v60 = vpop.f32.mrf.mxu0  ;;  %v3264_v47 = vadd.f32 %v7996_v24, %v2958_v26  ;;  %v7997_v18 = vld [vmem:[#allocation42_spill] sm:$0xff]  ;;  %v8002_v39 = vld [vmem:[#allocation47_spill] sm:$0xff]  ;;  %v8011_v24 = vld [vmem:[#allocation53_spill] sm:$0xff] }
 0x2d3   : > { %v2936_v56 = vpop.f32.mrf.mxu1  ;;  %v3263_v12 = vadd.f32 %v7997_v18, %v2957_v32  ;;  %v2964_v41 = vadd.f32 %v8002_v39, %v2657_v46  ;;  %v8007_v32 = vld [vmem:[#allocation50_spill] sm:$0xff]  ;;  %v2965_v18 = vadd.f32 %v8011_v24, %v2658_v14  ;;  %v8017_v14 = vld [vmem:[#allocation61_spill] sm:$0xff] }
 0x2d4   : > { %v7439_v58 = vadd.f32 %v2936_v56, %v7293_v5  ;;  %v7998_v5 = vld [vmem:[#allocation41_spill] sm:$0xff]  ;;  %v8003_v56 = vld [vmem:[#allocation46_spill] sm:$0xff]  ;;  %v7497_v46 = vpop.f32.mrf.mxu0 }
 0x2d5   : > { %v5252_v30 = vpop.f32.mrf.mxu1  ;;  %v2959_v51 = vadd.f32 %v7998_v5, %v2652_v11  ;;  %v8005_v11 = vld [vmem:[#allocation49_spill] sm:$0xff]  ;;  %v7495_v10 = vadd.f32 %v8008_v31, %v2964_v41  ;;  %v8012_v5 = vld [vmem:[#allocation55_spill] sm:$0xff]  ;;  %v8015_v41 = vld [vmem:[#allocation60_spill] sm:$0xff] }
 0x2d6   : > { %v7454_v13 = vadd.f32 %v5252_v30, %v7297_v6  ;;  %v7999_v6 = vld [vmem:[#allocation43_spill] sm:$0xff]  ;;  %v2963_v42 = vadd.f32 %v8005_v11, %v2656_v50  ;;  %v2969_v11 = vadd.f32 %v8017_v14, %v2662_v36  ;;  %v8019_v31 = vld [vmem:[#allocation64_spill] sm:$0xff]  ;;  %v8021_v36 = vld [vmem:[#allocation65_spill] sm:$0xff] }
 0x2d7   : > { %v2946_v40 = vpop.f32.mrf.mxu1  ;;  %v2962_v23 = vadd.f32 %v7999_v6, %v2655_v37  ;;  %v3265_v30 = vadd.f32 %v8003_v56, %v2959_v51  ;;  %v8006_v37 = vld [vmem:[#allocation51_spill] sm:$0xff]  ;;  %v2968_v51 = vadd.f32 %v8012_v5, %v2661_v28  ;;  %v8025_v14 = vld [vmem:[#allocation70_spill] sm:$0xff] }
 0x2d8   : > { %v7470_v43 = vadd.f32 %v2946_v40, %v7995_v62  ;;  %v2966_v52 = vadd.f32 %v8006_v37, %v2659_v35  ;;  %v3267_v40 = vadd.f32 %v8007_v32, %v2961_v44  ;;  %v7501_v50 = vadd.f32 %v8009_v38, %v2963_v42  ;;  %v8010_v35 = vld [vmem:[#allocation56_spill] sm:$0xff]  ;;  %v8016_v56 = vld [vmem:[#allocation59_spill] sm:$0xff]  ;;  %v7521_v42 = vpop.f32.mrf.mxu0 }
 0x2d9   : > { %v5367_v2 = vpop.f32.mrf.mxu1  ;;  %v3268_v8 = vadd.f32 %v8004_v3, %v2962_v23  ;;  %v8013_v23 = vld [vmem:[#allocation57_spill] sm:$0xff]  ;;  %v2970_v3 = vadd.f32 %v8016_v56, %v2663_v61  ;;  %v8020_v61 = vld [vmem:[#allocation63_spill] sm:$0xff]  ;;  %v2971_v38 = vadd.f32 %v8021_v36, %v2664_v4 }
 0x2da   : > { %v3568_v19 = vadd.f32 %v5367_v2, %v3262_v27  ;;  %v7504_v62 = vadd.f32 %v8010_v35, %v2966_v52  ;;  %v2967_v2 = vadd.f32 %v8013_v23, %v2660_v33  ;;  %v8023_v23 = vld [vmem:[#allocation68_spill] sm:$0xff]  ;;  %v3232_v4 = vpop.f32.mrf.mxu0 }
 0x2db   : > { %v3408_v26 = vpop.f32.mrf.mxu1 }
 0x2dc   : > { %v3607_v27 = vmul.f32 %v7479_v45, %v3568_v19  ;;  %v3567_v48 = vadd.f32 %v3408_v26, %v3261_v53  ;;  %v8014_v53 = vld [vmem:[#allocation58_spill] sm:$0xff]  ;;  %v7517_v19 = vadd.f32 %v8015_v41, %v2968_v51 }
 0x2dd   : > { %v5370_v6 = vpop.f32.mrf.mxu1  ;;  %v7514_v39 = vadd.f32 %v8014_v53, %v2965_v18  ;;  %v8018_v26 = vld [vmem:[#allocation62_spill] sm:$0xff] }
 0x2de   : > { %v7510_v1 = vadd.f32 %v7491_v57, %v3607_v27  ;;  %v3606_v21 = vmul.f32 %v7479_v45, %v3567_v48  ;;  %v3570_v44 = vadd.f32 %v5370_v6, %v3264_v47  ;;  %v7529_v32 = vadd.f32 %v8018_v26, %v2967_v2 }
 0x2df   : > { %v3418_v28 = vpop.f32.mrf.mxu1  ;;  %v7532_v27 = vadd.f32 %v8019_v31, %v2970_v3  ;;  %v2972_v48 = vadd.f32 %v8020_v61, %v2665_v17  ;;  %v8027_v61 = vld [vmem:[#allocation72_spill] sm:$0xff] }
 0x2e0   : > { %v3678_v33 = vsub.f32 0.0, %v7510_v1  ;;  %v7525_v37 = vadd.f32 %v7491_v57, %v3606_v21  ;;  %v3609_v47 = vmul.f32 %v7479_v45, %v3570_v44  ;;  %v3569_v52 = vadd.f32 %v3418_v28, %v3263_v12  ;;  %v8022_v12 = vld [vmem:[#allocation66_spill] sm:$0xff]  ;;  %v8024_v21 = vld [vmem:[#allocation67_spill] sm:$0xff] }
 0x2e1   : > { %v5373_v35 = vpop.f32.mrf.mxu1  ;;  %v7542_v6 = vadd.f32 %v8022_v12, %v2969_v11  ;;  %v7545_v2 = vadd.f32 %v8023_v23, %v2972_v48  ;;  %v2974_v44 = vadd.f32 %v8024_v21, %v2667_v54  ;;  %v7553_v28 = vadd.f32 %v8025_v14, %v2971_v38  ;;  %v8026_v11 = vld [vmem:[#allocation69_spill] sm:$0xff]  ;;  %v8028_v12 = vld [vmem:[#allocation71_spill] sm:$0xff] }
 0x2e2   : > { %v3711_v24 = vmul.f32 1.442695, %v3678_v33  ;;  %v3677_v18 = vsub.f32 0.0, %v7525_v37  ;;  %v7538_v5 = vadd.f32 %v7491_v57, %v3609_v47  ;;  %v3608_v51 = vmul.f32 %v7479_v45, %v3569_v52 }
 0x2e3   : > { %v3572_v17 = vadd.f32 %v5373_v35, %v3266_v34  ;;  %v3428_v53 = vpop.f32.mrf.mxu1  ;;  %v2973_v33 = vadd.f32 %v8026_v11, %v7460_v29  ;;  %v7560_v48 = vadd.f32 %v8027_v61, %v2974_v44 }
 0x2e4   : > { %5550 = vpow2.f32 %v3711_v24  ;;  %v3709_v41 = vmul.f32 1.442695, %v3677_v18  ;;  %v3680_v56 = vsub.f32 0.0, %v7538_v5  ;;  %v7550_v3 = vadd.f32 %v7491_v57, %v3608_v51  ;;  %v5329_v24 = vpop.f32.mrf.mxu0 }
 0x2e5   : > { %v3611_v47 = vmul.f32 %v7479_v45, %v3572_v17  ;;  %v3571_v52 = vadd.f32 %v3428_v53, %v3265_v30  ;;  %v5376_v54 = vpop.f32.mrf.mxu1  ;;  %v7563_v36 = vadd.f32 %v7381_v7, %v2973_v33  ;;  %v7576_v7 = vadd.f32 %v7394_v20, %v7379_v55 }
 0x2e6   : > { %5552 = vpow2.f32 %v3709_v41  ;;  %v3715_v34 = vmul.f32 1.442695, %v3680_v56  ;;  %v3679_v26 = vsub.f32 0.0, %v7550_v3  ;;  %v3574_v31 = vadd.f32 %v5376_v54, %v3268_v8  ;;  %v3242_v11 = vpop.f32.mrf.mxu0 }
 0x2e7   : > { %v7566_v38 = vadd.f32 %v7491_v57, %v3611_v47  ;;  %v3610_v29 = vmul.f32 %v7479_v45, %v3571_v52  ;;  %v3438_v35 = vpop.f32.mrf.mxu1  ;;  %v7572_v8 = vadd.f32 %v7386_v16, %v8028_v12  ;;  %v8029_v16 = vld [vmem:[#allocation73_spill] sm:$0xff]  ;;  %v7593_v20 = vadd.f32 %v7436_v49, %v7389_v9 }
 0x2e8   : > { %5554 = vpow2.f32 %v3715_v34  ;;  %v3713_v30 = vmul.f32 1.442695, %v3679_v26  ;;  %v3613_v18 = vmul.f32 %v7479_v45, %v3574_v31  ;;  %v3573_v51 = vadd.f32 %v3438_v35, %v3267_v40 }
 0x2e9   : > { %v3682_v23 = vsub.f32 0.0, %v7566_v38  ;;  %v7580_v21 = vadd.f32 %v7491_v57, %v3610_v29  ;;  %v5379_v44 = vpop.f32.mrf.mxu1  ;;  %v7589_v41 = vadd.f32 %v7402_v59, %v8029_v16  ;;  %v7604_v59 = vadd.f32 %v7467_v60, %v7392_v15 }
 0x2ea   : > { %5556 = vpow2.f32 %v3713_v30  ;;  %v7583_v17 = vadd.f32 %v7491_v57, %v3613_v18  ;;  %v3612_v40 = vmul.f32 %v7479_v45, %v3573_v51  ;;  %v3576_v53 = vadd.f32 %v5379_v44, %v7495_v10 }
 0x2eb   : > { %v3719_v55 = vmul.f32 1.442695, %v3682_v23  ;;  %v3681_v56 = vsub.f32 0.0, %v7580_v21  ;;  %v3448_v14 = vpop.f32.mrf.mxu1  ;;  %v7608_v9 = vadd.f32 %v7497_v46, %v7397_v25  ;;  %v7620_v15 = vadd.f32 %v3232_v4, %v7405_v63  ;;  %v5332_v46 = vpop.f32.mrf.mxu0 }
 0x2ec   : > { %v3684_v33 = vsub.f32 0.0, %v7583_v17  ;;  %v7598_v47 = vadd.f32 %v7491_v57, %v3612_v40  ;;  %v3615_v10 = vmul.f32 %v7479_v45, %v3576_v53  ;;  %v3575_v52 = vadd.f32 %v3448_v14, %v7501_v50 }
 0x2ed   : > { %5558 = vpow2.f32 %v3719_v55  ;;  %v3717_v49 = vmul.f32 1.442695, %v3681_v56  ;;  %v5382_v54 = vpop.f32.mrf.mxu1  ;;  %v7617_v50 = vadd.f32 %v7521_v42, %v7400_v0  ;;  %v7628_v51 = vadd.f32 %v5329_v24, %v7420_v22 }
 0x2ee   : > { %v3723_v34 = vmul.f32 1.442695, %v3684_v33  ;;  %v3683_v26 = vsub.f32 0.0, %v7598_v47  ;;  %v7612_v31 = vadd.f32 %v7491_v57, %v3615_v10  ;;  %v3614_v61 = vmul.f32 %v7479_v45, %v3575_v52 }
 0x2ef   : > { %5560 = vpow2.f32 %v3717_v49  ;;  %v3578_v25 = vadd.f32 %v5382_v54, %v7504_v62  ;;  %v3458_v60 = vpop.f32.mrf.mxu1  ;;  %v7631_v0 = vadd.f32 %v3242_v11, %v7439_v58  ;;  %v7637_v40 = vadd.f32 %v5332_v46, %v7454_v13  ;;  %v3252_v46 = vpop.f32.mrf.mxu0 }
 0x2f0   : > { %5562 = vpow2.f32 %v3723_v34  ;;  %v3721_v29 = vmul.f32 1.442695, %v3683_v26  ;;  %v3686_v35 = vsub.f32 0.0, %v7612_v31  ;;  %v7625_v30 = vadd.f32 %v7491_v57, %v3614_v61 }
 0x2f1   : > { %v5551_v18 = vpop.eup %5550  ;;  %v3617_v63 = vmul.f32 %v7479_v45, %v3578_v25  ;;  %v3577_v62 = vadd.f32 %v3458_v60, %v7514_v39  ;;  %v5385_v42 = vpop.f32.mrf.mxu1 }
 0x2f2   : > { %v3774_v4 = vadd.f32 1.0, %v5551_v18  ;;  %5564 = vpow2.f32 %v3721_v29  ;;  %v3727_v12 = vmul.f32 1.442695, %v3686_v35  ;;  %v3685_v23 = vsub.f32 0.0, %v7625_v30 }
 0x2f3   : > { %v5553_v44 = vpop.eup %5552  ;;  %v7640_v22 = vadd.f32 %v7491_v57, %v3617_v63  ;;  %v3616_v58 = vmul.f32 %v7479_v45, %v3577_v62  ;;  %v3580_v24 = vadd.f32 %v5385_v42, %v7517_v19  ;;  %v3468_v53 = vpop.f32.mrf.mxu1 }
 0x2f4   : > { %5566 = vrcp.f32 %v3774_v4  ;;  %v3773_v39 = vadd.f32 1.0, %v5553_v44  ;;  %v3725_v16 = vmul.f32 1.442695, %v3685_v23  ;;  %v3579_v55 = vadd.f32 %v3468_v53, %v7529_v32 }
 0x2f5   : > { %v5555_v56 = vpop.eup %5554  ;;  %5568 = vpow2.f32 %v3727_v12  ;;  %v3688_v14 = vsub.f32 0.0, %v7640_v22  ;;  %v7647_v13 = vadd.f32 %v7491_v57, %v3616_v58  ;;  %v3619_v11 = vmul.f32 %v7479_v45, %v3580_v24  ;;  %v5388_v33 = vpop.f32.mrf.mxu1 }
 0x2f6   : > { %5570 = vrcp.f32 %v3773_v39  ;;  %v3776_v10 = vadd.f32 1.0, %v5555_v56  ;;  %v3618_v19 = vmul.f32 %v7479_v45, %v3579_v55  ;;  %v3582_v52 = vadd.f32 %v5388_v33, %v7532_v27 }
 0x2f7   : > { %v5557_v49 = vpop.eup %5556  ;;  %5572 = vpow2.f32 %v3725_v16  ;;  %v3731_v54 = vmul.f32 1.442695, %v3688_v14  ;;  %v3687_v32 = vsub.f32 0.0, %v7647_v13  ;;  %v7654_v34 = vadd.f32 %v7491_v57, %v3619_v11  ;;  %v3478_v26 = vpop.f32.mrf.mxu1 }
 0x2f8   : > { %5574 = vrcp.f32 %v3776_v10  ;;  %v3775_v61 = vadd.f32 1.0, %v5557_v49  ;;  %v7657_v25 = vadd.f32 %v7491_v57, %v3618_v19  ;;  %v3621_v60 = vmul.f32 %v7479_v45, %v3582_v52 }
 0x2f9   : > { %5576 = vpow2.f32 %v3731_v54  ;;  %v3729_v29 = vmul.f32 1.442695, %v3687_v32  ;;  %v3690_v27 = vsub.f32 0.0, %v7654_v34  ;;  %v3581_v35 = vadd.f32 %v3478_v26, %v7542_v6  ;;  %v5391_v18 = vpop.f32.mrf.mxu1 }
 0x2fa   : > { %v5559_v63 = vpop.eup %5558  ;;  %5578 = vrcp.f32 %v3775_v61  ;;  %v3689_v62 = vsub.f32 0.0, %v7657_v25  ;;  %v7664_v42 = vadd.f32 %v7491_v57, %v3621_v60  ;;  %v3584_v4 = vadd.f32 %v5391_v18, %v7545_v2 }
 0x2fb   : > { %v3778_v12 = vadd.f32 1.0, %v5559_v63  ;;  %5580 = vpow2.f32 %v3729_v29  ;;  %v3735_v23 = vmul.f32 1.442695, %v3690_v27  ;;  %v3620_v44 = vmul.f32 %v7479_v45, %v3581_v35  ;;  %v3488_v58 = vpop.f32.mrf.mxu1 }
 0x2fc   : > { %v5561_v24 = vpop.eup %5560  ;;  %v7669_v53 = vadd.f32 %v3252_v46, %v7470_v43  ;;  %v3692_v6 = vsub.f32 0.0, %v7664_v42  ;;  %v3623_v39 = vmul.f32 %v7479_v45, %v3584_v4  ;;  %v3583_v16 = vadd.f32 %v3488_v58, %v7553_v28  ;;  %v5679_v58 = vld [vmem:[%s5757_s14 + $0x8] sm:$0xff] }
 0x2fd   : > { %v5563_v55 = vpop.eup %5562  ;;  %5582 = vrcp.f32 %v3778_v12  ;;  %v3777_v56 = vadd.f32 1.0, %v5561_v24  ;;  %v3733_v2 = vmul.f32 1.442695, %v3689_v62  ;;  %v7675_v14 = vadd.f32 %v7491_v57, %v3620_v44  ;;  %v5394_v11 = vpop.f32.mrf.mxu1 }
 0x2fe   : > { %v3780_v33 = vadd.f32 1.0, %v5563_v55  ;;  %5584 = vpow2.f32 %v3735_v23  ;;  %v3739_v10 = vmul.f32 1.442695, %v3692_v6  ;;  %v7678_v43 = vadd.f32 %v7491_v57, %v3623_v39 }
 0x2ff   : > { %v5565_v19 = vpop.eup %5564  ;;  %5586 = vrcp.f32 %v3777_v56  ;;  %v3691_v52 = vsub.f32 0.0, %v7675_v14  ;;  %v3622_v28 = vmul.f32 %v7479_v45, %v3583_v16  ;;  %v3586_v49 = vadd.f32 %v5394_v11, %v7560_v48  ;;  %v3498_v54 = vpop.f32.mrf.mxu1 }
 0x300   : > { %5588 = vrcp.f32 %v3780_v33  ;;  %v3779_v32 = vadd.f32 1.0, %v5565_v19  ;;  %v3694_v26 = vsub.f32 0.0, %v7678_v43  ;;  %v3585_v61 = vadd.f32 %v3498_v54, %v7563_v36 }
 0x301   : > { %v5567_v60 = vpop.eup %5566  ;;  %5590 = vpow2.f32 %v3733_v2  ;;  %v3737_v46 = vmul.f32 1.442695, %v3691_v52  ;;  %v7686_v29 = vadd.f32 %v7491_v57, %v3622_v28  ;;  %v3625_v27 = vmul.f32 %v7479_v45, %v3586_v49  ;;  %v5397_v35 = vpop.f32.mrf.mxu1 }
 0x302   : > { %v5569_v18 = vpop.eup %5568  ;;  %v3838_v48 = vmul.f32 %v5567_v60, %v7510_v1  ;;  %5592 = vrcp.f32 %v3779_v32  ;;  %v3743_v63 = vmul.f32 1.442695, %v3694_v26  ;;  %v3624_v62 = vmul.f32 %v7479_v45, %v3585_v61  ;;  %v8031_v60 = vld [vmem:[#allocation5_spill] sm:$0xff] }
 0x303   : > { %v5571_v4 = vpop.eup %5570  ;;  %v3782_v36 = vadd.f32 1.0, %v5569_v18  ;;  %5594 = vpow2.f32 %v3739_v10  ;;  %v3693_v12 = vsub.f32 0.0, %v7686_v29  ;;  %v7700_v23 = vadd.f32 %v7491_v57, %v3625_v27  ;;  %v3508_v1 = vpop.f32.mrf.mxu1  ;;  %v8030_v10 = vld [vmem:[#allocation3_spill] sm:$0xff] }
 0x304   : > { %v5573_v44 = vpop.eup %5572  ;;  %v3870_v24 = vadd.f32 %v5679_v58, %v3838_v48  ;;  %v3837_v6 = vmul.f32 %v5571_v4, %v7525_v37  ;;  %5596 = vpow2.f32 %v3737_v46  ;;  %v7705_v39 = vadd.f32 %v7491_v57, %v3624_v62 }
 0x305   : > { %v5575_v16 = vpop.eup %5574  ;;  %5598 = vrcp.f32 %v3782_v36  ;;  %v3781_v55 = vadd.f32 1.0, %v5573_v44  ;;  %v3741_v56 = vmul.f32 1.442695, %v3693_v12  ;;  %v3696_v2 = vsub.f32 0.0, %v7700_v23  ;;  %v5400_v11 = vpop.f32.mrf.mxu1 }
 0x306   : > { %v5577_v33 = vpop.eup %5576  ;;  %3902 = vst [vmem:[%s7696_s13 + $0x8] sm:$0xff] %v3870_v24  ;;  %v3869_v19 = vadd.f32 %v3837_v6, %v8030_v10  ;;  %v3840_v52 = vmul.f32 %v5575_v16, %v7538_v5  ;;  %5600 = vpow2.f32 %v3743_v63  ;;  %v3695_v37 = vsub.f32 0.0, %v7705_v39 }
 0x307   : > { %v5579_v28 = vpop.eup %5578  ;;  %5602 = vrcp.f32 %v3781_v55  ;;  %v3784_v49 = vadd.f32 1.0, %v5577_v33  ;;  %v3747_v54 = vmul.f32 1.442695, %v3696_v2  ;;  %v3588_v32 = vadd.f32 %v5397_v35, %v7572_v8  ;;  %v3518_v26 = vpop.f32.mrf.mxu1  ;;  %v8032_v8 = vld [vmem:[#allocation4_spill] sm:$0xff]  ;;  %v8033_v55 = vld [vmem:[#allocation7_spill] sm:$0xff] }
 0x308   : > { %v5581_v61 = vpop.eup %5580  ;;  %3901 = vst [vmem:[%s7696_s13] sm:$0xff] %v3869_v19  ;;  %v3872_v46 = vadd.f32 %v3840_v52, %v8031_v60  ;;  %v3839_v27 = vmul.f32 %v5579_v28, %v7550_v3  ;;  %5604 = vpow2.f32 %v3741_v56  ;;  %v3745_v18 = vmul.f32 1.442695, %v3695_v37  ;;  %v8035_v60 = vld [vmem:[#allocation9_spill] sm:$0xff] }
 0x309   : > { %5606 = vrcp.f32 %v3784_v49  ;;  %v3783_v5 = vadd.f32 1.0, %v5581_v61  ;;  %v3627_v48 = vmul.f32 %v7479_v45, %v3588_v32  ;;  %v3587_v63 = vadd.f32 %v3508_v1, %v7576_v7  ;;  %v5403_v62 = vpop.f32.mrf.mxu1 }
 0x30a   : > { %v5583_v4 = vpop.eup %5582  ;;  %3904 = vst [vmem:[%s7696_s13 + $0x18] sm:$0xff] %v3872_v46  ;;  %v3871_v35 = vadd.f32 %v3839_v27, %v8032_v8  ;;  %5608 = vpow2.f32 %v3747_v54  ;;  %v3590_v36 = vadd.f32 %v5400_v11, %v7589_v41  ;;  %v3589_v12 = vadd.f32 %v3518_v26, %v7593_v20 }
 0x30b   : > { %v5585_v3 = vpop.eup %5584  ;;  %v3842_v44 = vmul.f32 %v5583_v4, %v7566_v38  ;;  %5610 = vrcp.f32 %v3783_v5  ;;  %v7724_v58 = vadd.f32 %v7491_v57, %v3627_v48  ;;  %v3626_v24 = vmul.f32 %v7479_v45, %v3587_v63  ;;  %v3528_v7 = vpop.f32.mrf.mxu1 }
 0x30c   : > { %v5587_v1 = vpop.eup %5586  ;;  %3903 = vst [vmem:[%s7696_s13 + $0x10] sm:$0xff] %v3871_v35  ;;  %v3786_v6 = vadd.f32 1.0, %v5585_v3  ;;  %5612 = vpow2.f32 %v3745_v18  ;;  %v3629_v16 = vmul.f32 %v7479_v45, %v3590_v36  ;;  %v3628_v41 = vmul.f32 %v7479_v45, %v3589_v12  ;;  %v8036_v12 = vld [vmem:[#allocation8_spill] sm:$0xff] }
 0x30d   : > { %v5589_v20 = vpop.eup %5588  ;;  %v3874_v56 = vadd.f32 %v3842_v44, %v8033_v55  ;;  %v3841_v38 = vmul.f32 %v5587_v1, %v7580_v21  ;;  %v3698_v2 = vsub.f32 0.0, %v7724_v58  ;;  %v7734_v11 = vadd.f32 %v7491_v57, %v3626_v24  ;;  %v5406_v33 = vpop.f32.mrf.mxu1  ;;  %v8034_v21 = vld [vmem:[#allocation6_spill] sm:$0xff] }
 0x30e   : > { %v5591_v10 = vpop.eup %5590  ;;  %v3844_v19 = vmul.f32 %v5589_v20, %v7583_v17  ;;  %5614 = vrcp.f32 %v3786_v6  ;;  %v7738_v52 = vadd.f32 %v7491_v57, %v3629_v16  ;;  %v7741_v37 = vadd.f32 %v7491_v57, %v3628_v41 }
 0x30f   : > { %v5593_v28 = vpop.eup %5592  ;;  %3906 = vst [vmem:[%s7696_s13 + $0x28] sm:$0xff] %v3874_v56  ;;  %v3873_v49 = vadd.f32 %v3841_v38, %v8034_v21  ;;  %v3785_v54 = vadd.f32 1.0, %v5591_v10  ;;  %v3751_v32 = vmul.f32 1.442695, %v3698_v2  ;;  %v3697_v26 = vsub.f32 0.0, %v7734_v11  ;;  %v7746_v61 = vpop.f32.mrf.mxu1  ;;  %v8037_v38 = vld [vmem:[#allocation11_spill] sm:$0xff] }
 0x310   : > { %v5595_v17 = vpop.eup %5594  ;;  %v3876_v46 = vadd.f32 %v3844_v19, %v8035_v60  ;;  %v3843_v27 = vmul.f32 %v5593_v28, %v7598_v47  ;;  %v3700_v18 = vsub.f32 0.0, %v7738_v52  ;;  %v3699_v5 = vsub.f32 0.0, %v7741_v37 }
 0x311   : > { %v5597_v48 = vpop.eup %5596  ;;  %3905 = vst [vmem:[%s7696_s13 + $0x20] sm:$0xff] %v3873_v49  ;;  %5616 = vrcp.f32 %v3785_v54  ;;  %v3788_v63 = vadd.f32 1.0, %v5595_v17  ;;  %v3749_v4 = vmul.f32 1.442695, %v3697_v26  ;;  %v3592_v8 = vadd.f32 %v5403_v62, %v7604_v59  ;;  %v5409_v35 = vpop.f32.mrf.mxu1 }
 0x312   : > { %v5599_v36 = vpop.eup %5598  ;;  %3908 = vst [vmem:[%s7696_s13 + $0x38] sm:$0xff] %v3876_v46  ;;  %v3875_v3 = vadd.f32 %v3843_v27, %v8036_v12  ;;  %v3787_v44 = vadd.f32 1.0, %v5597_v48  ;;  %5618 = vpow2.f32 %v3751_v32  ;;  %v3755_v47 = vmul.f32 1.442695, %v3700_v18  ;;  %v8039_v27 = vld [vmem:[#allocation13_spill] sm:$0xff] }
 0x313   : > { %v5601_v24 = vpop.eup %5600  ;;  %v3846_v1 = vmul.f32 %v5599_v36, %v7612_v31  ;;  %5620 = vrcp.f32 %v3788_v63  ;;  %v3753_v6 = vmul.f32 1.442695, %v3699_v5  ;;  %v3631_v16 = vmul.f32 %v7479_v45, %v3592_v8  ;;  %v3548_v41 = vpop.f32.mrf.mxu1  ;;  %v8040_v36 = vld [vmem:[#allocation12_spill] sm:$0xff] }
 0x314   : > { %v5603_v20 = vpop.eup %5602  ;;  %3907 = vst [vmem:[%s7696_s13 + $0x30] sm:$0xff] %v3875_v3  ;;  %5622 = vrcp.f32 %v3787_v44  ;;  %v3790_v59 = vadd.f32 1.0, %v5601_v24  ;;  %v3591_v62 = vadd.f32 %v3528_v7, %v7608_v9  ;;  %v3594_v55 = vadd.f32 %v5406_v33, %v7617_v50  ;;  %v8038_v50 = vld [vmem:[#allocation10_spill] sm:$0xff] }
 0x315   : > { %v5605_v56 = vpop.eup %5604  ;;  %v3878_v2 = vadd.f32 %v3846_v1, %v8037_v38  ;;  %v3845_v10 = vmul.f32 %v5603_v20, %v7625_v30  ;;  %5624 = vpow2.f32 %v3749_v4  ;;  %v7764_v31 = vadd.f32 %v7491_v57, %v3631_v16  ;;  %v5412_v54 = vpop.f32.mrf.mxu1 }
 0x316   : > { %v5607_v19 = vpop.eup %5606  ;;  %5626 = vrcp.f32 %v3790_v59  ;;  %v3789_v28 = vadd.f32 1.0, %v5605_v56  ;;  %v3630_v21 = vmul.f32 %v7479_v45, %v3591_v62  ;;  %v3633_v49 = vmul.f32 %v7479_v45, %v3594_v55 }
 0x317   : > { %v5609_v9 = vpop.eup %5608  ;;  %3910 = vst [vmem:[%s7696_s13 + $0x48] sm:$0xff] %v3878_v2  ;;  %v3877_v7 = vadd.f32 %v3845_v10, %v8038_v50  ;;  %v3848_v33 = vmul.f32 %v5607_v19, %v7640_v22  ;;  %5628 = vpow2.f32 %v3755_v47  ;;  %v3702_v30 = vsub.f32 0.0, %v7764_v31  ;;  %v8042_v10 = vld [vmem:[#allocation14_spill] sm:$0xff] }
 0x318   : > { %v5611_v32 = vpop.eup %5610  ;;  %5630 = vrcp.f32 %v3789_v28  ;;  %v3792_v26 = vadd.f32 1.0, %v5609_v9  ;;  %v7773_v17 = vadd.f32 %v7491_v57, %v3630_v21  ;;  %v7776_v60 = vadd.f32 %v7491_v57, %v3633_v49 }
 0x319   : > { %v5613_v46 = vpop.eup %5612  ;;  %3909 = vst [vmem:[%s7696_s13 + $0x40] sm:$0xff] %v3877_v7  ;;  %v3880_v18 = vadd.f32 %v3848_v33, %v8039_v27  ;;  %v3847_v22 = vmul.f32 %v5611_v32, %v7647_v13  ;;  %5632 = vpow2.f32 %v3753_v6  ;;  %v3759_v5 = vmul.f32 1.442695, %v3702_v30  ;;  %v3558_v13 = vpop.f32.mrf.mxu1  ;;  %v8043_v33 = vld [vmem:[#allocation17_spill] sm:$0xff] }
 0x31a   : > { %5634 = vrcp.f32 %v3792_v26  ;;  %v3791_v48 = vadd.f32 1.0, %v5613_v46  ;;  %v3701_v63 = vsub.f32 0.0, %v7773_v17  ;;  %v3704_v4 = vsub.f32 0.0, %v7776_v60  ;;  %v8044_v46 = vld [vmem:[#allocation16_spill] sm:$0xff] }
 0x31b   : > { %v5615_v8 = vpop.eup %5614  ;;  %3912 = vst [vmem:[%s7696_s13 + $0x58] sm:$0xff] %v3880_v18  ;;  %v3879_v12 = vadd.f32 %v3847_v22, %v8040_v36  ;;  %5636 = vpow2.f32 %v3759_v5  ;;  %v3593_v3 = vadd.f32 %v7746_v61, %v7620_v15  ;;  %v3596_v44 = vadd.f32 %v5409_v35, %v7628_v51  ;;  %v8041_v15 = vld [vmem:[#allocation15_spill] sm:$0xff] }
 0x31c   : > { %v3850_v47 = vmul.f32 %v5615_v8, %v7654_v34  ;;  %5638 = vrcp.f32 %v3791_v48  ;;  %v3757_v24 = vmul.f32 1.442695, %v3701_v63  ;;  %v3763_v1 = vmul.f32 1.442695, %v3704_v4  ;;  %v8045_v8 = vld [vmem:[#allocation19_spill] sm:$0xff] }
 0x31d   : > { %3911 = vst [vmem:[%s7696_s13 + $0x50] sm:$0xff] %v3879_v12  ;;  %v3632_v6 = vmul.f32 %v7479_v45, %v3593_v3  ;;  %v3635_v16 = vmul.f32 %v7479_v45, %v3596_v44  ;;  %v3595_v20 = vadd.f32 %v3548_v41, %v7631_v0  ;;  %v3598_v59 = vadd.f32 %v5412_v54, %v7637_v40 }
 0x31e   : > { %v5617_v62 = vpop.eup %5616  ;;  %v3882_v61 = vadd.f32 %v3850_v47, %v8041_v15  ;;  %5640 = vpow2.f32 %v3757_v24  ;;  %v3597_v51 = vadd.f32 %v3558_v13, %v7669_v53  ;;  %v8046_v24 = vld [vmem:[#allocation18_spill] sm:$0xff] }
 0x31f   : > { %v5619_v34 = vpop.eup %5618  ;;  %v3849_v35 = vmul.f32 %v5617_v62, %v7657_v25  ;;  %5642 = vpow2.f32 %v3763_v1  ;;  %v7798_v55 = vadd.f32 %v7491_v57, %v3632_v6  ;;  %v7801_v56 = vadd.f32 %v7491_v57, %v3635_v16 }
 0x320   : > { %v5621_v38 = vpop.eup %5620  ;;  %3914 = vst [vmem:[%s7696_s13 + $0x68] sm:$0xff] %v3882_v61  ;;  %v3794_v0 = vadd.f32 1.0, %v5619_v34  ;;  %v3634_v40 = vmul.f32 %v7479_v45, %v3595_v20  ;;  %v3637_v41 = vmul.f32 %v7479_v45, %v3598_v59  ;;  %v3636_v53 = vmul.f32 %v7479_v45, %v3597_v51  ;;  %v8047_v59 = vld [vmem:[#allocation21_spill] sm:$0xff]  ;;  %v8048_v34 = vld [vmem:[#allocation20_spill] sm:$0xff] }
 0x321   : > { %v5623_v2 = vpop.eup %5622  ;;  %v3881_v25 = vadd.f32 %v3849_v35, %v8042_v10  ;;  %v3852_v19 = vmul.f32 %v5621_v38, %v7664_v42  ;;  %v3703_v28 = vsub.f32 0.0, %v7798_v55  ;;  %v3706_v21 = vsub.f32 0.0, %v7801_v56 }
 0x322   : > { %v5625_v49 = vpop.eup %5624  ;;  %v3851_v9 = vmul.f32 %v5623_v2, %v7675_v14  ;;  %5644 = vrcp.f32 %v3794_v0  ;;  %v7813_v50 = vadd.f32 %v7491_v57, %v3634_v40  ;;  %v7816_v7 = vadd.f32 %v7491_v57, %v3637_v41  ;;  %v8049_v41 = vld [vmem:[#allocation23_spill] sm:$0xff] }
 0x323   : > { %v5627_v45 = vpop.eup %5626  ;;  %3913 = vst [vmem:[%s7696_s13 + $0x60] sm:$0xff] %v3881_v25  ;;  %v3884_v42 = vadd.f32 %v3852_v19, %v8043_v33  ;;  %v3793_v30 = vadd.f32 1.0, %v5625_v49  ;;  %v3761_v54 = vmul.f32 1.442695, %v3703_v28  ;;  %v3767_v32 = vmul.f32 1.442695, %v3706_v21 }
 0x324   : > { %v5629_v26 = vpop.eup %5628  ;;  %v3883_v27 = vadd.f32 %v3851_v9, %v8044_v46  ;;  %v3854_v14 = vmul.f32 %v5627_v45, %v7678_v43  ;;  %v3705_v18 = vsub.f32 0.0, %v7813_v50  ;;  %v3708_v22 = vsub.f32 0.0, %v7816_v7  ;;  %v8050_v21 = vld [vmem:[#allocation22_spill] sm:$0xff]  ;;  %v8052_v46 = vld [vmem:[#allocation24_spill] sm:$0xff] }
 0x325   : > { %v5631_v5 = vpop.eup %5630  ;;  %3916 = vst [vmem:[%s7696_s13 + $0x78] sm:$0xff] %v3884_v42  ;;  %5646 = vrcp.f32 %v3793_v30  ;;  %v3796_v48 = vadd.f32 1.0, %v5629_v26  ;;  %v7826_v63 = vadd.f32 %v7491_v57, %v3636_v53  ;;  %v8051_v42 = vld [vmem:[#allocation25_spill] sm:$0xff] }
 0x326   : > { %v5633_v4 = vpop.eup %5632  ;;  %3915 = vst [vmem:[%s7696_s13 + $0x70] sm:$0xff] %v3883_v27  ;;  %v3886_v36 = vadd.f32 %v3854_v14, %v8045_v8  ;;  %v3853_v12 = vmul.f32 %v5631_v5, %v7686_v29  ;;  %5648 = vpow2.f32 %v3761_v54  ;;  %v3765_v43 = vmul.f32 1.442695, %v3705_v18  ;;  %v8053_v5 = vld [vmem:[#allocation27_spill] sm:$0xff] }
 0x327   : > { %v5635_v3 = vpop.eup %5634  ;;  %5650 = vrcp.f32 %v3796_v48  ;;  %v3795_v44 = vadd.f32 1.0, %v5633_v4  ;;  %v3707_v13 = vsub.f32 0.0, %v7826_v63  ;;  %v3771_v6 = vmul.f32 1.442695, %v3708_v22 }
 0x328   : > { %v5637_v47 = vpop.eup %5636  ;;  %3918 = vst [vmem:[%s7696_s13 + $0x88] sm:$0xff] %v3886_v36  ;;  %v3885_v57 = vadd.f32 %v3853_v12, %v8046_v24  ;;  %v3856_v1 = vmul.f32 %v5635_v3, %v7700_v23  ;;  %5652 = vpow2.f32 %v3767_v32  ;;  %v8056_v24 = vld [vmem:[#allocation28_spill] sm:$0xff] }
 0x329   : > { %v5639_v16 = vpop.eup %5638  ;;  %5654 = vrcp.f32 %v3795_v44  ;;  %v3798_v29 = vadd.f32 1.0, %v5637_v47  ;;  %v3769_v20 = vmul.f32 1.442695, %v3707_v13 }
 0x32a   : > { %3917 = vst [vmem:[%s7696_s13 + $0x80] sm:$0xff] %v3885_v57  ;;  %v3888_v62 = vadd.f32 %v3856_v1, %v8047_v59  ;;  %v3855_v15 = vmul.f32 %v5639_v16, %v7705_v39  ;;  %5656 = vpow2.f32 %v3765_v43  ;;  %v8055_v43 = vld [vmem:[#allocation29_spill] sm:$0xff]  ;;  %v8057_v1 = vld [vmem:[#allocation31_spill] sm:$0xff]  ;;  %v8058_v59 = vld [vmem:[#allocation30_spill] sm:$0xff] }
 0x32b   : > { %v5641_v61 = vpop.eup %5640  ;;  %5658 = vrcp.f32 %v3798_v29 }
 0x32c   : > { %v5643_v51 = vpop.eup %5642  ;;  %3920 = vst [vmem:[%s7696_s13 + $0x98] sm:$0xff] %v3888_v62  ;;  %v3887_v23 = vadd.f32 %v3855_v15, %v8048_v34  ;;  %v3797_v35 = vadd.f32 1.0, %v5641_v61  ;;  %5660 = vpow2.f32 %v3771_v6  ;;  %v8059_v61 = vld [vmem:[#allocation33_spill] sm:$0xff]  ;;  %v8060_v34 = vld [vmem:[#allocation32_spill] sm:$0xff] }
 0x32d   : > { %v3800_v38 = vadd.f32 1.0, %v5643_v51  ;;  %5662 = vpow2.f32 %v3769_v20 }
 0x32e   : > { %3919 = vst [vmem:[%s7696_s13 + $0x90] sm:$0xff] %v3887_v23  ;;  %5664 = vrcp.f32 %v3797_v35 }
 0x32f   : > { %v5645_v0 = vpop.eup %5644  ;;  %5666 = vrcp.f32 %v3800_v38 }
 0x330   : > { %v3858_v40 = vmul.f32 %v5645_v0, %v7724_v58 }
 0x332   : > { %v5647_v39 = vpop.eup %5646  ;;  %v3890_v53 = vadd.f32 %v3858_v40, %v8049_v41 }
 0x333   : > { %v5649_v2 = vpop.eup %5648  ;;  %v3857_v10 = vmul.f32 %v5647_v39, %v7734_v11 }
 0x334   : > { %v5651_v25 = vpop.eup %5650  ;;  %3922 = vst [vmem:[%s7696_s13 + $0xa8] sm:$0xff] %v3890_v53  ;;  %v3799_v19 = vadd.f32 1.0, %v5649_v2 }
 0x335   : > { %v5653_v28 = vpop.eup %5652  ;;  %v3889_v49 = vadd.f32 %v3857_v10, %v8050_v21  ;;  %v3860_v9 = vmul.f32 %v5651_v25, %v7738_v52 }
 0x336   : > { %v5655_v45 = vpop.eup %5654  ;;  %5668 = vrcp.f32 %v3799_v19  ;;  %v3802_v33 = vadd.f32 1.0, %v5653_v28 }
 0x337   : > { %v5657_v58 = vpop.eup %5656  ;;  %3921 = vst [vmem:[%s7696_s13 + $0xa0] sm:$0xff] %v3889_v49  ;;  %v3892_v30 = vadd.f32 %v3860_v9, %v8051_v42  ;;  %v3859_v54 = vmul.f32 %v5655_v45, %v7741_v37 }
 0x338   : > { %v5659_v11 = vpop.eup %5658  ;;  %5670 = vrcp.f32 %v3802_v33  ;;  %v3801_v32 = vadd.f32 1.0, %v5657_v58 }
 0x339   : > { %v5661_v26 = vpop.eup %5660  ;;  %3924 = vst [vmem:[%s7696_s13 + $0xb8] sm:$0xff] %v3892_v30  ;;  %v3891_v27 = vadd.f32 %v3859_v54, %v8052_v46  ;;  %v3862_v52 = vmul.f32 %v5659_v11, %v7764_v31  ;;  %v8054_v31 = vld [vmem:[#allocation26_spill] sm:$0xff] }
 0x33a   : > { %v5663_v14 = vpop.eup %5662  ;;  %5672 = vrcp.f32 %v3801_v32  ;;  %v3804_v18 = vadd.f32 1.0, %v5661_v26 }
 0x33b   : > { %v5665_v22 = vpop.eup %5664  ;;  %3923 = vst [vmem:[%s7696_s13 + $0xb0] sm:$0xff] %v3891_v27  ;;  %v3894_v48 = vadd.f32 %v3862_v52, %v8053_v5  ;;  %v3803_v37 = vadd.f32 1.0, %v5663_v14 }
 0x33c   : > { %v5667_v4 = vpop.eup %5666  ;;  %v3861_v8 = vmul.f32 %v5665_v22, %v7773_v17  ;;  %5674 = vrcp.f32 %v3804_v18 }
 0x33d   : > { %3926 = vst [vmem:[%s7696_s13 + $0xc8] sm:$0xff] %v3894_v48  ;;  %v3864_v36 = vmul.f32 %v5667_v4, %v7776_v60  ;;  %5676 = vrcp.f32 %v3803_v37 }
 0x33e   : > { %v3893_v12 = vadd.f32 %v3861_v8, %v8054_v31 }
 0x33f   : > { %v3896_v3 = vadd.f32 %v3864_v36, %v8055_v43 }
 0x340   : > { %3925 = vst [vmem:[%s7696_s13 + $0xc0] sm:$0xff] %v3893_v12 }
 0x341   : > { %3928 = vst [vmem:[%s7696_s13 + $0xd8] sm:$0xff] %v3896_v3 }
 0x343   : > { %v5669_v44 = vpop.eup %5668 }
 0x344   : > { %v3863_v13 = vmul.f32 %v5669_v44, %v7798_v55 }
 0x345   : > { %v5671_v47 = vpop.eup %5670 }
 0x346   : > { %v3895_v17 = vadd.f32 %v3863_v13, %v8056_v24  ;;  %v3866_v57 = vmul.f32 %v5671_v47, %v7801_v56 }
 0x347   : > { %v5673_v60 = vpop.eup %5672 }
 0x348   : > { %3927 = vst [vmem:[%s7696_s13 + $0xd0] sm:$0xff] %v3895_v17  ;;  %v3898_v6 = vadd.f32 %v3866_v57, %v8057_v1  ;;  %v3865_v16 = vmul.f32 %v5673_v60, %v7813_v50 }
 0x349   : > { %v5675_v29 = vpop.eup %5674 }
 0x34a   : > { %v5677_v20 = vpop.eup %5676  ;;  %3930 = vst [vmem:[%s7696_s13 + $0xe8] sm:$0xff] %v3898_v6  ;;  %v3897_v62 = vadd.f32 %v3865_v16, %v8058_v59  ;;  %v3868_v55 = vmul.f32 %v5675_v29, %v7816_v7 }
 0x34b   : > { %v3867_v15 = vmul.f32 %v5677_v20, %v7826_v63 }
 0x34c   : > { %3929 = vst [vmem:[%s7696_s13 + $0xe0] sm:$0xff] %v3897_v62  ;;  %v3900_v51 = vadd.f32 %v3868_v55, %v8059_v61 }
 0x34d   : > { %v3899_v56 = vadd.f32 %v3867_v15, %v8060_v34 }
 0x34e   : > { %3932 = vst [vmem:[%s7696_s13 + $0xf8] sm:$0xff] %v3900_v51 }
 0x34f   : > { %3931 = vst [vmem:[%s7696_s13 + $0xf0] sm:$0xff] %v3899_v56 }
 0x350 PF: > { %s17_s24 = sadd.s32 1, %s5686_s24  }
 0x351   : > { %p14_p4 = scmp.ge.s32.totalorder %s17_s24, 4  }
 0x353   :  { %16 = sbr.rel (!%p14_p4) target bundleno = 1 (0x1), region = 88 }

</bundles_post_ra>
